<compile_context>
chip_gen: v6e
topology: v6e:2x2x1
jax: 0.10.0
libtpu: 0.0.40
codegen_flags: <defaults>
</compile_context>

<pallas_src>
import math
import functools

import jax
import jax.numpy as jnp
from jax.experimental import pallas as pl
from jax.experimental.pallas import tpu as pltpu

EPS = 1e-5
NEG_INF = -1e9


# ---------------------------------------------------------------------------
# In-kernel building blocks (traced inside the Pallas kernel body)
# ---------------------------------------------------------------------------
def _layer_norm(v, w, b):
    mu = jnp.mean(v, axis=-1, keepdims=True)
    c = v - mu
    var = jnp.mean(c * c, axis=-1, keepdims=True)
    return c * jax.lax.rsqrt(var + EPS) * w + b


def _gelu(v):
    # TODO(synk): PyTorch nn.GELU defaults to the erf form; tanh approximation
    # used here (EUP-friendly), ~1e-3 level deviation.
    c = math.sqrt(2.0 / math.pi)
    return 0.5 * v * (1.0 + jnp.tanh(c * (v + 0.044715 * v * v * v)))


def _softmax_lastdim(s):
    m = jnp.max(s, axis=-1, keepdims=True)
    p = jnp.exp(s - m)
    denom = jnp.sum(p, axis=-1, keepdims=True)
    return p * pl.reciprocal(denom, approx=True)


def _attention_core(q3, k3, v3, bias, dh):
    """q3: (H,T,dh), k3/v3: (H,S,dh) in compute dtype; bias broadcastable to (T,S)."""
    scale = 1.0 / math.sqrt(dh)
    s = jnp.einsum('htd,hsd->hts', q3, k3, preferred_element_type=jnp.float32)
    s = s * scale + bias
    p = _softmax_lastdim(s)
    return jnp.einsum('hts,hsd->htd', p.astype(v3.dtype), v3,
                      preferred_element_type=jnp.float32)      # (H, T, dh) f32


def _merge_heads_out_proj(o3, wo_r, bo):
    """Fold the head-concat into the output projection: sum_h o3[h] @ Wo[h]."""
    cdt = wo_r.dtype
    out = jnp.einsum('htf,hfd->htd', o3.astype(cdt), wo_r,
                     preferred_element_type=jnp.float32)        # (H, T, D)
    return jnp.sum(out, axis=0) + bo                            # (T, D) f32


def _self_attention(xn, wqkv_r, bqkv_r, wo_r, bo, bias, H, dh):
    cdt = wqkv_r.dtype
    T, D = xn.shape
    xb = jnp.broadcast_to(xn.astype(cdt), (H, T, D))
    qkv = jnp.einsum('htd,hdf->htf', xb, wqkv_r,
                     preferred_element_type=jnp.float32) + bqkv_r   # (H, T, 3*dh)
    q3 = qkv[:, :, :dh].astype(cdt)
    k3 = qkv[:, :, dh:2 * dh].astype(cdt)
    v3 = qkv[:, :, 2 * dh:].astype(cdt)
    o3 = _attention_core(q3, k3, v3, bias, dh)
    return _merge_heads_out_proj(o3, wo_r, bo)


def _cross_attention(xn, mem, wq_r, bq_r, wkv_r, bkv_r, wo_r, bo, bias, H, dh):
    cdt = wq_r.dtype
    T, D = xn.shape
    S = mem.shape[0]
    qb = jnp.broadcast_to(xn.astype(cdt), (H, T, D))
    mb = jnp.broadcast_to(mem.astype(cdt), (H, S, D))
    q3 = (jnp.einsum('htd,hdf->htf', qb, wq_r,
                     preferred_element_type=jnp.float32) + bq_r).astype(cdt)  # (H,T,dh)
    kv = jnp.einsum('hsd,hdf->hsf', mb, wkv_r,
                    preferred_element_type=jnp.float32) + bkv_r               # (H,S,2dh)
    k3 = kv[:, :, :dh].astype(cdt)
    v3 = kv[:, :, dh:].astype(cdt)
    o3 = _attention_core(q3, k3, v3, bias, dh)
    return _merge_heads_out_proj(o3, wo_r, bo)


# ---------------------------------------------------------------------------
# Pallas kernels
# ---------------------------------------------------------------------------
def _decoder_block_kernel(H, dh, apply_final_ln,
                          x_ref, mem_ref, kpb_ref,
                          ln1w, ln1b, sa_wqkv, sa_bqkv, sa_wo, sa_bo,
                          ln2w, ln2b, ca_wq, ca_bq, ca_wkv, ca_bkv, ca_wo, ca_bo,
                          ln3w, ln3b, w1, b1, w2, b2,
                          fnw, fnb,
                          o_ref):
    x = x_ref[...].astype(jnp.float32)     # (T, D) residual stream in f32
    mem = mem_ref[...]                     # (S, D) (compute dtype)
    kpb = kpb_ref[...]                     # (1, S) additive key-padding bias (f32)

    T = x.shape[0]
    # Causal mask built in-kernel from iota (cheap VPU work, no (T,T) DMA).
    row = jax.lax.broadcasted_iota(jnp.int32, (T, T), 0)
    col = jax.lax.broadcasted_iota(jnp.int32, (T, T), 1)
    causal_bias = jnp.where(col > row, NEG_INF, 0.0).astype(jnp.float32)

    # --- self attention (pre-norm, residual) ---
    xn = _layer_norm(x, ln1w[...], ln1b[...])
    x = x + _self_attention(xn, sa_wqkv[...], sa_bqkv[...], sa_wo[...], sa_bo[...],
                            causal_bias, H, dh)

    # --- cross attention (pre-norm, residual) ---
    xn = _layer_norm(x, ln2w[...], ln2b[...])
    x = x + _cross_attention(xn, mem, ca_wq[...], ca_bq[...], ca_wkv[...],
                             ca_bkv[...], ca_wo[...], ca_bo[...], kpb, H, dh)

    # --- FFN (pre-norm, residual) ---
    xn = _layer_norm(x, ln3w[...], ln3b[...])
    w1v, w2v = w1[...], w2[...]
    cdt = w1v.dtype
    h1 = _gelu(jnp.dot(xn.astype(cdt), w1v, preferred_element_type=jnp.float32) + b1[...])
    x = x + jnp.dot(h1.astype(cdt), w2v, preferred_element_type=jnp.float32) + b2[...]

    if apply_final_ln:   # static flag -> fused epilogue on the last layer only
        x = _layer_norm(x, fnw[...], fnb[...])

    o_ref[...] = x.astype(o_ref.dtype)


# ---------------------------------------------------------------------------
# Wrappers
# ---------------------------------------------------------------------------
_PARAM_KEYS = ['ln1_w', 'ln1_b', 'sa_wqkv', 'sa_bqkv', 'sa_wo', 'sa_bo',
               'ln2_w', 'ln2_b', 'ca_wq', 'ca_bq', 'ca_wkv', 'ca_bkv', 'ca_wo', 'ca_bo',
               'ln3_w', 'ln3_b', 'w1', 'b1', 'w2', 'b2']


def _full_spec(shape):
    n = len(shape)
    return pl.BlockSpec(shape, lambda b, n=n: (0,) * n)


def decoder_block(x, memory, kpb, layer, H, fn_w, fn_b, apply_final_ln):
    B, T, D = x.shape
    S = memory.shape[1]
    dh = D // H
    params = [layer[k] for k in _PARAM_KEYS] + [fn_w, fn_b]

    in_specs = [
        pl.BlockSpec((None, T, D), lambda b: (b, 0, 0)),   # x, per-batch
        pl.BlockSpec((None, S, D), lambda b: (b, 0, 0)),   # memory, per-batch
        pl.BlockSpec((None, 1, S), lambda b: (b, 0, 0)),   # key-padding bias
    ] + [_full_spec(p.shape) for p in params]
    out_spec = pl.BlockSpec((None, T, D), lambda b: (b, 0, 0))

    # Explicit VMEM budget (blocks are double-buffered by the pipeline).
    block_bytes = (2 * T * D + S * D + S) * 4
    block_bytes += sum(int(p.size) * p.dtype.itemsize for p in params)
    vmem_limit = int(min(64 * 2 ** 20, max(32 * 2 ** 20, 4 * block_bytes)))

    kernel = functools.partial(_decoder_block_kernel, H, dh, apply_final_ln)
    return pl.pallas_call(
        kernel,
        out_shape=jax.ShapeDtypeStruct((B, T, D), x.dtype),
        grid_spec=pltpu.PrefetchScalarGridSpec(
            num_scalar_prefetch=0,
            grid=(B,),
            in_specs=in_specs,
            out_specs=out_spec),
        compiler_params=pltpu.CompilerParams(
            dimension_semantics=("parallel",),
            vmem_limit_bytes=vmem_limit),
    )(x, memory, kpb, *params)


def transformer_decoder(x, memory, memory_key_padding_mask, params, H,
                        compute_dtype=jnp.bfloat16):
    B, S = memory_key_padding_mask.shape
    kpb = jnp.where(memory_key_padding_mask, NEG_INF, 0.0).astype(jnp.float32)
    kpb = kpb.reshape(B, 1, S)
    mem_c = memory.astype(compute_dtype)   # halves memory DMA bytes per layer
    n_layers = len(params['layers'])
    for i, layer in enumerate(params['layers']):
        x = decoder_block(x, mem_c, kpb, layer, H,
                          params['norm_w'], params['norm_b'],
                          apply_final_ln=(i == n_layers - 1))
    return x


# ---------------------------------------------------------------------------
# Parameters: PyTorch-layout init + conversion to kernel (head-major) layout
# ---------------------------------------------------------------------------
def init_params(key, D, H, num_layers):
    """Deterministic parameters in PyTorch TransformerDecoder layout."""
    def dense(k, shape, scale=0.02):
        return (scale * jax.random.normal(k, shape)).astype(jnp.float32)

    layers = []
    for l in range(num_layers):
        ks = jax.random.split(jax.random.fold_in(key, l), 12)
        layers.append(dict(
            norm1_w=jnp.ones((D,), jnp.float32), norm1_b=jnp.zeros((D,), jnp.float32),
            sa_in_proj_w=dense(ks[0], (3 * D, D)), sa_in_proj_b=dense(ks[1], (3 * D,)),
            sa_out_proj_w=dense(ks[2], (D, D)), sa_out_proj_b=dense(ks[3], (D,)),
            norm2_w=jnp.ones((D,), jnp.float32), norm2_b=jnp.zeros((D,), jnp.float32),
            ca_in_proj_w=dense(ks[4], (3 * D, D)), ca_in_proj_b=dense(ks[5], (3 * D,)),
            ca_out_proj_w=dense(ks[6], (D, D)), ca_out_proj_b=dense(ks[7], (D,)),
            norm3_w=jnp.ones((D,), jnp.float32), norm3_b=jnp.zeros((D,), jnp.float32),
            lin1_w=dense(ks[8], (4 * D, D)), lin1_b=dense(ks[9], (4 * D,)),
            lin2_w=dense(ks[10], (D, 4 * D)), lin2_b=dense(ks[11], (D,)),
        ))
    return dict(layers=layers,
                norm_w=jnp.ones((D,), jnp.float32),
                norm_b=jnp.zeros((D,), jnp.float32))


def _head_major(w_xform, H, dh):
    """(D_in, H*dh) projection in `x @ w` form -> (H, D_in, dh)."""
    d_in = w_xform.shape[0]
    return jnp.transpose(w_xform.reshape(d_in, H, dh), (1, 0, 2))


def prepare_params(params, H, compute_dtype=jnp.bfloat16):
    """Convert PyTorch-layout params to the kernel layout (done once, outside
    the kernel): matmul weights head-major + cast to `compute_dtype` (bf16 ->
    2x MXU rate, f32 accumulation in-kernel); LN params and biases stay f32."""
    D = params['norm_w'].shape[0]
    assert D % H == 0, "embedding_dim must be divisible by num_heads"
    dh = D // H

    def conv_layer(p):
        def split3(w):   # PyTorch (3D, D) in_proj -> three (D, D) in x@w form
            return w[:D].T, w[D:2 * D].T, w[2 * D:].T
        sq, sk, sv = split3(p['sa_in_proj_w'])
        cq, ck, cv = split3(p['ca_in_proj_w'])
        sb, cb = p['sa_in_proj_b'], p['ca_in_proj_b']
        sbq, sbk, sbv = sb[:D], sb[D:2 * D], sb[2 * D:]
        cbq, cbk, cbv = cb[:D], cb[D:2 * D], cb[2 * D:]
        return dict(
            ln1_w=p['norm1_w'].reshape(1, D), ln1_b=p['norm1_b'].reshape(1, D),
            sa_wqkv=jnp.concatenate(
                [_head_major(sq, H, dh), _head_major(sk, H, dh), _head_major(sv, H, dh)],
                axis=-1).astype(compute_dtype),                          # (H, D, 3dh)
            sa_bqkv=jnp.concatenate(
                [sbq.reshape(H, 1, dh), sbk.reshape(H, 1, dh), sbv.reshape(H, 1, dh)],
                axis=-1),                                                # (H, 1, 3dh)
            sa_wo=p['sa_out_proj_w'].T.reshape(H, dh, D).astype(compute_dtype),
            sa_bo=p['sa_out_proj_b'].reshape(1, D),
            ln2_w=p['norm2_w'].reshape(1, D), ln2_b=p['norm2_b'].reshape(1, D),
            ca_wq=_head_major(cq, H, dh).astype(compute_dtype),          # (H, D, dh)
            ca_bq=cbq.reshape(H, 1, dh),
            ca_wkv=jnp.concatenate(
                [_head_major(ck, H, dh), _head_major(cv, H, dh)],
                axis=-1).astype(compute_dtype),                          # (H, D, 2dh)
            ca_bkv=jnp.concatenate(
                [cbk.reshape(H, 1, dh), cbv.reshape(H, 1, dh)], axis=-1),
            ca_wo=p['ca_out_proj_w'].T.reshape(H, dh, D).astype(compute_dtype),
            ca_bo=p['ca_out_proj_b'].reshape(1, D),
            ln3_w=p['norm3_w'].reshape(1, D), ln3_b=p['norm3_b'].reshape(1, D),
            w1=p['lin1_w'].T.astype(compute_dtype), b1=p['lin1_b'].reshape(1, 4 * D),
            w2=p['lin2_w'].T.astype(compute_dtype), b2=p['lin2_b'].reshape(1, D),
        )

    return dict(layers=[conv_layer(p) for p in params['layers']],
                norm_w=params['norm_w'].reshape(1, D),
                norm_b=params['norm_b'].reshape(1, D))


# ---------------------------------------------------------------------------
if __name__ == "__main__":
    # Small demo shapes; dh = D // H = 128 keeps heads lane-aligned (per review).
    D, H, L = 256, 2, 2          # embedding_dim, num_heads, num_layers
    B, T, S = 2, 8, 8            # batch, target seq len, memory seq len

    key = jax.random.PRNGKey(0)
    kx, km, kp = jax.random.split(key, 3)
    x = jax.random.normal(kx, (B, T, D), jnp.float32)
    memory = jax.random.normal(km, (B, S, D), jnp.float32)

    # Boolean key-padding mask: True = ignore. Mask last 2 memory slots of batch 1.
    memory_key_padding_mask = jnp.zeros((B, S), bool).at[1, S - 2:].set(True)

    params_pt = init_params(kp, D, H, L)
    params = prepare_params(params_pt, H, compute_dtype=jnp.bfloat16)

    out = transformer_decoder(x, memory, memory_key_padding_mask, params, H)
    out = jax.block_until_ready(out)
    assert out.shape == (B, T, D) and out.dtype == jnp.float32
    assert bool(jnp.all(jnp.isfinite(out)))
    print("KERNEL_OK")
</pallas_src>

<mosaic_0001>
module attributes {stable_mosaic.version = 11 : i64} {
  func.func @_decoder_block_kernel(%arg0: i32, %arg1: memref<1x8x256xf32, #tpu.memory_space<vmem>>, %arg2: memref<1x8x256xbf16, #tpu.memory_space<vmem>>, %arg3: memref<1x1x8xf32, #tpu.memory_space<vmem>>, %arg4: memref<1x256xf32, #tpu.memory_space<vmem>>, %arg5: memref<1x256xf32, #tpu.memory_space<vmem>>, %arg6: memref<2x256x384xbf16, #tpu.memory_space<vmem>>, %arg7: memref<2x1x384xf32, #tpu.memory_space<vmem>>, %arg8: memref<2x128x256xbf16, #tpu.memory_space<vmem>>, %arg9: memref<1x256xf32, #tpu.memory_space<vmem>>, %arg10: memref<1x256xf32, #tpu.memory_space<vmem>>, %arg11: memref<1x256xf32, #tpu.memory_space<vmem>>, %arg12: memref<2x256x128xbf16, #tpu.memory_space<vmem>>, %arg13: memref<2x1x128xf32, #tpu.memory_space<vmem>>, %arg14: memref<2x256x256xbf16, #tpu.memory_space<vmem>>, %arg15: memref<2x1x256xf32, #tpu.memory_space<vmem>>, %arg16: memref<2x128x256xbf16, #tpu.memory_space<vmem>>, %arg17: memref<1x256xf32, #tpu.memory_space<vmem>>, %arg18: memref<1x256xf32, #tpu.memory_space<vmem>>, %arg19: memref<1x256xf32, #tpu.memory_space<vmem>>, %arg20: memref<256x1024xbf16, #tpu.memory_space<vmem>>, %arg21: memref<1x1024xf32, #tpu.memory_space<vmem>>, %arg22: memref<1024x256xbf16, #tpu.memory_space<vmem>>, %arg23: memref<1x256xf32, #tpu.memory_space<vmem>>, %arg24: memref<1x256xf32, #tpu.memory_space<vmem>>, %arg25: memref<1x256xf32, #tpu.memory_space<vmem>>, %arg26: memref<1x8x256xf32, #tpu.memory_space<vmem>>) attributes {dimension_semantics = [#tpu.dimension_semantics<parallel>], iteration_bounds = array<i64: 2>, scalar_prefetch = 0 : i64, scratch_operands = 0 : i64, tpu.core_type = #tpu.core_type<tc>, window_params = [{transform_indices = @transform_0, window_bounds = array<i64: 1, 8, 256>}, {transform_indices = @transform_1, window_bounds = array<i64: 1, 8, 256>}, {transform_indices = @transform_2, window_bounds = array<i64: 1, 1, 8>}, {pipeline_mode = #tpu.pipeline_mode<synchronous>, transform_indices = @transform_3, window_bounds = array<i64: 1, 256>}, {pipeline_mode = #tpu.pipeline_mode<synchronous>, transform_indices = @transform_4, window_bounds = array<i64: 1, 256>}, {pipeline_mode = #tpu.pipeline_mode<synchronous>, transform_indices = @transform_5, window_bounds = array<i64: 2, 256, 384>}, {pipeline_mode = #tpu.pipeline_mode<synchronous>, transform_indices = @transform_6, window_bounds = array<i64: 2, 1, 384>}, {pipeline_mode = #tpu.pipeline_mode<synchronous>, transform_indices = @transform_7, window_bounds = array<i64: 2, 128, 256>}, {pipeline_mode = #tpu.pipeline_mode<synchronous>, transform_indices = @transform_8, window_bounds = array<i64: 1, 256>}, {pipeline_mode = #tpu.pipeline_mode<synchronous>, transform_indices = @transform_9, window_bounds = array<i64: 1, 256>}, {pipeline_mode = #tpu.pipeline_mode<synchronous>, transform_indices = @transform_10, window_bounds = array<i64: 1, 256>}, {pipeline_mode = #tpu.pipeline_mode<synchronous>, transform_indices = @transform_11, window_bounds = array<i64: 2, 256, 128>}, {pipeline_mode = #tpu.pipeline_mode<synchronous>, transform_indices = @transform_12, window_bounds = array<i64: 2, 1, 128>}, {pipeline_mode = #tpu.pipeline_mode<synchronous>, transform_indices = @transform_13, window_bounds = array<i64: 2, 256, 256>}, {pipeline_mode = #tpu.pipeline_mode<synchronous>, transform_indices = @transform_14, window_bounds = array<i64: 2, 1, 256>}, {pipeline_mode = #tpu.pipeline_mode<synchronous>, transform_indices = @transform_15, window_bounds = array<i64: 2, 128, 256>}, {pipeline_mode = #tpu.pipeline_mode<synchronous>, transform_indices = @transform_16, window_bounds = array<i64: 1, 256>}, {pipeline_mode = #tpu.pipeline_mode<synchronous>, transform_indices = @transform_17, window_bounds = array<i64: 1, 256>}, {pipeline_mode = #tpu.pipeline_mode<synchronous>, transform_indices = @transform_18, window_bounds = array<i64: 1, 256>}, {pipeline_mode = #tpu.pipeline_mode<synchronous>, transform_indices = @transform_19, window_bounds = array<i64: 256, 1024>}, {pipeline_mode = #tpu.pipeline_mode<synchronous>, transform_indices = @transform_20, window_bounds = array<i64: 1, 1024>}, {pipeline_mode = #tpu.pipeline_mode<synchronous>, transform_indices = @transform_21, window_bounds = array<i64: 1024, 256>}, {pipeline_mode = #tpu.pipeline_mode<synchronous>, transform_indices = @transform_22, window_bounds = array<i64: 1, 256>}, {pipeline_mode = #tpu.pipeline_mode<synchronous>, transform_indices = @transform_23, window_bounds = array<i64: 1, 256>}, {pipeline_mode = #tpu.pipeline_mode<synchronous>, transform_indices = @transform_24, window_bounds = array<i64: 1, 256>}, {transform_indices = @transform_25, window_bounds = array<i64: 1, 8, 256>}]} {
    %c0 = arith.constant 0 : index
    %c0_0 = arith.constant 0 : index
    %c0_1 = arith.constant 0 : index
    %0 = vector.load %arg1[%c0, %c0_0, %c0_1] : memref<1x8x256xf32, #tpu.memory_space<vmem>>, vector<1x8x256xf32>
    %1 = vector.shape_cast %0 : vector<1x8x256xf32> to vector<8x256xf32>
    %c0_2 = arith.constant 0 : index
    %c0_3 = arith.constant 0 : index
    %c0_4 = arith.constant 0 : index
    %2 = vector.load %arg2[%c0_2, %c0_3, %c0_4] : memref<1x8x256xbf16, #tpu.memory_space<vmem>>, vector<1x8x256xbf16>
    %3 = vector.shape_cast %2 : vector<1x8x256xbf16> to vector<8x256xbf16>
    %c0_5 = arith.constant 0 : index
    %c0_6 = arith.constant 0 : index
    %c0_7 = arith.constant 0 : index
    %4 = vector.load %arg3[%c0_5, %c0_6, %c0_7] : memref<1x1x8xf32, #tpu.memory_space<vmem>>, vector<1x1x8xf32>
    %5 = vector.shape_cast %4 : vector<1x1x8xf32> to vector<1x8xf32>
    %6 = tpu.iota {dimensions = array<i32: 0>} : vector<8x8xi32>
    %7 = tpu.iota {dimensions = array<i32: 1>} : vector<8x8xi32>
    %8 = arith.cmpi sgt, %7, %6 : vector<8x8xi32>
    %cst = arith.constant -1.000000e+09 : f32
    %cst_8 = arith.constant 0.000000e+00 : f32
    %9 = vector.broadcast %cst : f32 to vector<8x8xf32>
    %10 = vector.broadcast %cst_8 : f32 to vector<8x8xf32>
    %11 = arith.select %8, %9, %10 : vector<8x8xi1>, vector<8x8xf32>
    %c0_9 = arith.constant 0 : index
    %c0_10 = arith.constant 0 : index
    %12 = vector.load %arg4[%c0_9, %c0_10] : memref<1x256xf32, #tpu.memory_space<vmem>>, vector<1x256xf32>
    %c0_11 = arith.constant 0 : index
    %c0_12 = arith.constant 0 : index
    %13 = vector.load %arg5[%c0_11, %c0_12] : memref<1x256xf32, #tpu.memory_space<vmem>>, vector<1x256xf32>
    %cst_13 = arith.constant dense<0.000000e+00> : vector<8xf32>
    %14 = vector.multi_reduction <add>, %1, %cst_13 [1] : vector<8x256xf32> to vector<8xf32>
    %15 = vector.shape_cast %14 : vector<8xf32> to vector<8x1xf32>
    %cst_14 = arith.constant 2.560000e+02 : f32
    %16 = vector.broadcast %cst_14 : f32 to vector<8x1xf32>
    %17 = arith.divf %15, %16 : vector<8x1xf32>
    %18 = vector.broadcast %17 : vector<8x1xf32> to vector<8x256xf32>
    %19 = arith.subf %1, %18 : vector<8x256xf32>
    %20 = arith.mulf %19, %19 : vector<8x256xf32>
    %cst_15 = arith.constant dense<0.000000e+00> : vector<8xf32>
    %21 = vector.multi_reduction <add>, %20, %cst_15 [1] : vector<8x256xf32> to vector<8xf32>
    %22 = vector.shape_cast %21 : vector<8xf32> to vector<8x1xf32>
    %cst_16 = arith.constant 2.560000e+02 : f32
    %23 = vector.broadcast %cst_16 : f32 to vector<8x1xf32>
    %24 = arith.divf %22, %23 : vector<8x1xf32>
    %cst_17 = arith.constant 9.99999974E-6 : f32
    %25 = vector.broadcast %cst_17 : f32 to vector<8x1xf32>
    %26 = arith.addf %24, %25 : vector<8x1xf32>
    %27 = math.rsqrt %26 : vector<8x1xf32>
    %28 = vector.broadcast %27 : vector<8x1xf32> to vector<8x256xf32>
    %29 = arith.mulf %19, %28 : vector<8x256xf32>
    %30 = vector.broadcast %12 : vector<1x256xf32> to vector<8x256xf32>
    %31 = arith.mulf %29, %30 : vector<8x256xf32>
    %32 = vector.broadcast %13 : vector<1x256xf32> to vector<8x256xf32>
    %33 = arith.addf %31, %32 : vector<8x256xf32>
    %c0_18 = arith.constant 0 : index
    %c0_19 = arith.constant 0 : index
    %c0_20 = arith.constant 0 : index
    %34 = vector.load %arg6[%c0_18, %c0_19, %c0_20] : memref<2x256x384xbf16, #tpu.memory_space<vmem>>, vector<2x256x384xbf16>
    %c0_21 = arith.constant 0 : index
    %c0_22 = arith.constant 0 : index
    %c0_23 = arith.constant 0 : index
    %35 = vector.load %arg7[%c0_21, %c0_22, %c0_23] : memref<2x1x384xf32, #tpu.memory_space<vmem>>, vector<2x1x384xf32>
    %c0_24 = arith.constant 0 : index
    %c0_25 = arith.constant 0 : index
    %c0_26 = arith.constant 0 : index
    %36 = vector.load %arg8[%c0_24, %c0_25, %c0_26] : memref<2x128x256xbf16, #tpu.memory_space<vmem>>, vector<2x128x256xbf16>
    %c0_27 = arith.constant 0 : index
    %c0_28 = arith.constant 0 : index
    %37 = vector.load %arg9[%c0_27, %c0_28] : memref<1x256xf32, #tpu.memory_space<vmem>>, vector<1x256xf32>
    %38 = arith.truncf %33 : vector<8x256xf32> to vector<8x256xbf16>
    %39 = vector.shape_cast %38 : vector<8x256xbf16> to vector<1x8x256xbf16>
    %40 = vector.broadcast %39 : vector<1x8x256xbf16> to vector<2x8x256xbf16>
    "tpu.trace_start"() <{level = 10 : i32, message = "htd,hdf->htf"}> : () -> ()
    %cst_29 = arith.constant dense<0.000000e+00> : vector<2x8x384xf32>
    %41 = tpu.matmul %40, %34, %cst_29 {dimension_numbers = #tpu.dot_dimension_numbers<[2], [1], [1], [2], [0, 0, 0, 1, 1, 2], [0], [0]>} : vector<2x8x256xbf16>, vector<2x256x384xbf16>, vector<2x8x384xf32> -> vector<2x8x384xf32>
    "tpu.trace_stop"() : () -> ()
    %42 = vector.broadcast %35 : vector<2x1x384xf32> to vector<2x8x384xf32>
    %43 = arith.addf %41, %42 : vector<2x8x384xf32>
    %44 = vector.extract_strided_slice %43 {offsets = [0, 0, 0], sizes = [2, 8, 128], strides = [1, 1, 1]} : vector<2x8x384xf32> to vector<2x8x128xf32>
    %45 = arith.truncf %44 : vector<2x8x128xf32> to vector<2x8x128xbf16>
    %46 = vector.extract_strided_slice %43 {offsets = [0, 0, 128], sizes = [2, 8, 128], strides = [1, 1, 1]} : vector<2x8x384xf32> to vector<2x8x128xf32>
    %47 = arith.truncf %46 : vector<2x8x128xf32> to vector<2x8x128xbf16>
    %48 = vector.extract_strided_slice %43 {offsets = [0, 0, 256], sizes = [2, 8, 128], strides = [1, 1, 1]} : vector<2x8x384xf32> to vector<2x8x128xf32>
    %49 = arith.truncf %48 : vector<2x8x128xf32> to vector<2x8x128xbf16>
    "tpu.trace_start"() <{level = 10 : i32, message = "htd,hsd->hts"}> : () -> ()
    %cst_30 = arith.constant dense<0.000000e+00> : vector<2x8x8xf32>
    %50 = tpu.matmul %45, %47, %cst_30 {dimension_numbers = #tpu.dot_dimension_numbers<[2], [2], [1], [1], [0, 0, 0, 1, 1, 1], [0], [0]>} : vector<2x8x128xbf16>, vector<2x8x128xbf16>, vector<2x8x8xf32> -> vector<2x8x8xf32>
    "tpu.trace_stop"() : () -> ()
    %cst_31 = arith.constant 0.0883883461 : f32
    %51 = vector.broadcast %cst_31 : f32 to vector<2x8x8xf32>
    %52 = arith.mulf %50, %51 : vector<2x8x8xf32>
    %53 = vector.shape_cast %11 : vector<8x8xf32> to vector<1x8x8xf32>
    %54 = vector.broadcast %53 : vector<1x8x8xf32> to vector<2x8x8xf32>
    %55 = arith.addf %52, %54 : vector<2x8x8xf32>
    %cst_32 = arith.constant dense<0xFF800000> : vector<2x8xf32>
    %56 = vector.multi_reduction <maximumf>, %55, %cst_32 [2] : vector<2x8x8xf32> to vector<2x8xf32>
    %57 = vector.shape_cast %56 : vector<2x8xf32> to vector<2x8x1xf32>
    %58 = vector.broadcast %57 : vector<2x8x1xf32> to vector<2x8x8xf32>
    %59 = arith.subf %55, %58 : vector<2x8x8xf32>
    %60 = math.exp %59 : vector<2x8x8xf32>
    %cst_33 = arith.constant dense<0.000000e+00> : vector<2x8xf32>
    %61 = vector.multi_reduction <add>, %60, %cst_33 [2] : vector<2x8x8xf32> to vector<2x8xf32>
    %62 = vector.shape_cast %61 : vector<2x8xf32> to vector<2x8x1xf32>
    %63 = tpu.reciprocal %62 {approx = true} : vector<2x8x1xf32> -> vector<2x8x1xf32>
    %64 = vector.broadcast %63 : vector<2x8x1xf32> to vector<2x8x8xf32>
    %65 = arith.mulf %60, %64 : vector<2x8x8xf32>
    %66 = arith.truncf %65 : vector<2x8x8xf32> to vector<2x8x8xbf16>
    "tpu.trace_start"() <{level = 10 : i32, message = "hts,hsd->htd"}> : () -> ()
    %cst_34 = arith.constant dense<0.000000e+00> : vector<2x8x128xf32>
    %67 = tpu.matmul %66, %49, %cst_34 {dimension_numbers = #tpu.dot_dimension_numbers<[2], [1], [1], [2], [0, 0, 0, 1, 1, 2], [0], [0]>} : vector<2x8x8xbf16>, vector<2x8x128xbf16>, vector<2x8x128xf32> -> vector<2x8x128xf32>
    "tpu.trace_stop"() : () -> ()
    %68 = arith.truncf %67 : vector<2x8x128xf32> to vector<2x8x128xbf16>
    "tpu.trace_start"() <{level = 10 : i32, message = "htf,hfd->htd"}> : () -> ()
    %cst_35 = arith.constant dense<0.000000e+00> : vector<2x8x256xf32>
    %69 = tpu.matmul %68, %36, %cst_35 {dimension_numbers = #tpu.dot_dimension_numbers<[2], [1], [1], [2], [0, 0, 0, 1, 1, 2], [0], [0]>} : vector<2x8x128xbf16>, vector<2x128x256xbf16>, vector<2x8x256xf32> -> vector<2x8x256xf32>
    "tpu.trace_stop"() : () -> ()
    %cst_36 = arith.constant dense<0.000000e+00> : vector<8x256xf32>
    %70 = vector.multi_reduction <add>, %69, %cst_36 [0] : vector<2x8x256xf32> to vector<8x256xf32>
    %71 = vector.broadcast %37 : vector<1x256xf32> to vector<8x256xf32>
    %72 = arith.addf %70, %71 : vector<8x256xf32>
    %73 = arith.addf %1, %72 : vector<8x256xf32>
    %c0_37 = arith.constant 0 : index
    %c0_38 = arith.constant 0 : index
    %74 = vector.load %arg10[%c0_37, %c0_38] : memref<1x256xf32, #tpu.memory_space<vmem>>, vector<1x256xf32>
    %c0_39 = arith.constant 0 : index
    %c0_40 = arith.constant 0 : index
    %75 = vector.load %arg11[%c0_39, %c0_40] : memref<1x256xf32, #tpu.memory_space<vmem>>, vector<1x256xf32>
    %cst_41 = arith.constant dense<0.000000e+00> : vector<8xf32>
    %76 = vector.multi_reduction <add>, %73, %cst_41 [1] : vector<8x256xf32> to vector<8xf32>
    %77 = vector.shape_cast %76 : vector<8xf32> to vector<8x1xf32>
    %cst_42 = arith.constant 2.560000e+02 : f32
    %78 = vector.broadcast %cst_42 : f32 to vector<8x1xf32>
    %79 = arith.divf %77, %78 : vector<8x1xf32>
    %80 = vector.broadcast %79 : vector<8x1xf32> to vector<8x256xf32>
    %81 = arith.subf %73, %80 : vector<8x256xf32>
    %82 = arith.mulf %81, %81 : vector<8x256xf32>
    %cst_43 = arith.constant dense<0.000000e+00> : vector<8xf32>
    %83 = vector.multi_reduction <add>, %82, %cst_43 [1] : vector<8x256xf32> to vector<8xf32>
    %84 = vector.shape_cast %83 : vector<8xf32> to vector<8x1xf32>
    %cst_44 = arith.constant 2.560000e+02 : f32
    %85 = vector.broadcast %cst_44 : f32 to vector<8x1xf32>
    %86 = arith.divf %84, %85 : vector<8x1xf32>
    %cst_45 = arith.constant 9.99999974E-6 : f32
    %87 = vector.broadcast %cst_45 : f32 to vector<8x1xf32>
    %88 = arith.addf %86, %87 : vector<8x1xf32>
    %89 = math.rsqrt %88 : vector<8x1xf32>
    %90 = vector.broadcast %89 : vector<8x1xf32> to vector<8x256xf32>
    %91 = arith.mulf %81, %90 : vector<8x256xf32>
    %92 = vector.broadcast %74 : vector<1x256xf32> to vector<8x256xf32>
    %93 = arith.mulf %91, %92 : vector<8x256xf32>
    %94 = vector.broadcast %75 : vector<1x256xf32> to vector<8x256xf32>
    %95 = arith.addf %93, %94 : vector<8x256xf32>
    %c0_46 = arith.constant 0 : index
    %c0_47 = arith.constant 0 : index
    %c0_48 = arith.constant 0 : index
    %96 = vector.load %arg12[%c0_46, %c0_47, %c0_48] : memref<2x256x128xbf16, #tpu.memory_space<vmem>>, vector<2x256x128xbf16>
    %c0_49 = arith.constant 0 : index
    %c0_50 = arith.constant 0 : index
    %c0_51 = arith.constant 0 : index
    %97 = vector.load %arg13[%c0_49, %c0_50, %c0_51] : memref<2x1x128xf32, #tpu.memory_space<vmem>>, vector<2x1x128xf32>
    %c0_52 = arith.constant 0 : index
    %c0_53 = arith.constant 0 : index
    %c0_54 = arith.constant 0 : index
    %98 = vector.load %arg14[%c0_52, %c0_53, %c0_54] : memref<2x256x256xbf16, #tpu.memory_space<vmem>>, vector<2x256x256xbf16>
    %c0_55 = arith.constant 0 : index
    %c0_56 = arith.constant 0 : index
    %c0_57 = arith.constant 0 : index
    %99 = vector.load %arg15[%c0_55, %c0_56, %c0_57] : memref<2x1x256xf32, #tpu.memory_space<vmem>>, vector<2x1x256xf32>
    %c0_58 = arith.constant 0 : index
    %c0_59 = arith.constant 0 : index
    %c0_60 = arith.constant 0 : index
    %100 = vector.load %arg16[%c0_58, %c0_59, %c0_60] : memref<2x128x256xbf16, #tpu.memory_space<vmem>>, vector<2x128x256xbf16>
    %c0_61 = arith.constant 0 : index
    %c0_62 = arith.constant 0 : index
    %101 = vector.load %arg17[%c0_61, %c0_62] : memref<1x256xf32, #tpu.memory_space<vmem>>, vector<1x256xf32>
    %102 = arith.truncf %95 : vector<8x256xf32> to vector<8x256xbf16>
    %103 = vector.shape_cast %102 : vector<8x256xbf16> to vector<1x8x256xbf16>
    %104 = vector.broadcast %103 : vector<1x8x256xbf16> to vector<2x8x256xbf16>
    %105 = vector.shape_cast %3 : vector<8x256xbf16> to vector<1x8x256xbf16>
    %106 = vector.broadcast %105 : vector<1x8x256xbf16> to vector<2x8x256xbf16>
    "tpu.trace_start"() <{level = 10 : i32, message = "htd,hdf->htf"}> : () -> ()
    %cst_63 = arith.constant dense<0.000000e+00> : vector<2x8x128xf32>
    %107 = tpu.matmul %104, %96, %cst_63 {dimension_numbers = #tpu.dot_dimension_numbers<[2], [1], [1], [2], [0, 0, 0, 1, 1, 2], [0], [0]>} : vector<2x8x256xbf16>, vector<2x256x128xbf16>, vector<2x8x128xf32> -> vector<2x8x128xf32>
    "tpu.trace_stop"() : () -> ()
    %108 = vector.broadcast %97 : vector<2x1x128xf32> to vector<2x8x128xf32>
    %109 = arith.addf %107, %108 : vector<2x8x128xf32>
    %110 = arith.truncf %109 : vector<2x8x128xf32> to vector<2x8x128xbf16>
    "tpu.trace_start"() <{level = 10 : i32, message = "hsd,hdf->hsf"}> : () -> ()
    %cst_64 = arith.constant dense<0.000000e+00> : vector<2x8x256xf32>
    %111 = tpu.matmul %106, %98, %cst_64 {dimension_numbers = #tpu.dot_dimension_numbers<[2], [1], [1], [2], [0, 0, 0, 1, 1, 2], [0], [0]>} : vector<2x8x256xbf16>, vector<2x256x256xbf16>, vector<2x8x256xf32> -> vector<2x8x256xf32>
    "tpu.trace_stop"() : () -> ()
    %112 = vector.broadcast %99 : vector<2x1x256xf32> to vector<2x8x256xf32>
    %113 = arith.addf %111, %112 : vector<2x8x256xf32>
    %114 = vector.extract_strided_slice %113 {offsets = [0, 0, 0], sizes = [2, 8, 128], strides = [1, 1, 1]} : vector<2x8x256xf32> to vector<2x8x128xf32>
    %115 = arith.truncf %114 : vector<2x8x128xf32> to vector<2x8x128xbf16>
    %116 = vector.extract_strided_slice %113 {offsets = [0, 0, 128], sizes = [2, 8, 128], strides = [1, 1, 1]} : vector<2x8x256xf32> to vector<2x8x128xf32>
    %117 = arith.truncf %116 : vector<2x8x128xf32> to vector<2x8x128xbf16>
    "tpu.trace_start"() <{level = 10 : i32, message = "htd,hsd->hts"}> : () -> ()
    %cst_65 = arith.constant dense<0.000000e+00> : vector<2x8x8xf32>
    %118 = tpu.matmul %110, %115, %cst_65 {dimension_numbers = #tpu.dot_dimension_numbers<[2], [2], [1], [1], [0, 0, 0, 1, 1, 1], [0], [0]>} : vector<2x8x128xbf16>, vector<2x8x128xbf16>, vector<2x8x8xf32> -> vector<2x8x8xf32>
    "tpu.trace_stop"() : () -> ()
    %cst_66 = arith.constant 0.0883883461 : f32
    %119 = vector.broadcast %cst_66 : f32 to vector<2x8x8xf32>
    %120 = arith.mulf %118, %119 : vector<2x8x8xf32>
    %121 = vector.shape_cast %5 : vector<1x8xf32> to vector<1x1x8xf32>
    %122 = vector.broadcast %121 : vector<1x1x8xf32> to vector<2x8x8xf32>
    %123 = arith.addf %120, %122 : vector<2x8x8xf32>
    %cst_67 = arith.constant dense<0xFF800000> : vector<2x8xf32>
    %124 = vector.multi_reduction <maximumf>, %123, %cst_67 [2] : vector<2x8x8xf32> to vector<2x8xf32>
    %125 = vector.shape_cast %124 : vector<2x8xf32> to vector<2x8x1xf32>
    %126 = vector.broadcast %125 : vector<2x8x1xf32> to vector<2x8x8xf32>
    %127 = arith.subf %123, %126 : vector<2x8x8xf32>
    %128 = math.exp %127 : vector<2x8x8xf32>
    %cst_68 = arith.constant dense<0.000000e+00> : vector<2x8xf32>
    %129 = vector.multi_reduction <add>, %128, %cst_68 [2] : vector<2x8x8xf32> to vector<2x8xf32>
    %130 = vector.shape_cast %129 : vector<2x8xf32> to vector<2x8x1xf32>
    %131 = tpu.reciprocal %130 {approx = true} : vector<2x8x1xf32> -> vector<2x8x1xf32>
    %132 = vector.broadcast %131 : vector<2x8x1xf32> to vector<2x8x8xf32>
    %133 = arith.mulf %128, %132 : vector<2x8x8xf32>
    %134 = arith.truncf %133 : vector<2x8x8xf32> to vector<2x8x8xbf16>
    "tpu.trace_start"() <{level = 10 : i32, message = "hts,hsd->htd"}> : () -> ()
    %cst_69 = arith.constant dense<0.000000e+00> : vector<2x8x128xf32>
    %135 = tpu.matmul %134, %117, %cst_69 {dimension_numbers = #tpu.dot_dimension_numbers<[2], [1], [1], [2], [0, 0, 0, 1, 1, 2], [0], [0]>} : vector<2x8x8xbf16>, vector<2x8x128xbf16>, vector<2x8x128xf32> -> vector<2x8x128xf32>
    "tpu.trace_stop"() : () -> ()
    %136 = arith.truncf %135 : vector<2x8x128xf32> to vector<2x8x128xbf16>
    "tpu.trace_start"() <{level = 10 : i32, message = "htf,hfd->htd"}> : () -> ()
    %cst_70 = arith.constant dense<0.000000e+00> : vector<2x8x256xf32>
    %137 = tpu.matmul %136, %100, %cst_70 {dimension_numbers = #tpu.dot_dimension_numbers<[2], [1], [1], [2], [0, 0, 0, 1, 1, 2], [0], [0]>} : vector<2x8x128xbf16>, vector<2x128x256xbf16>, vector<2x8x256xf32> -> vector<2x8x256xf32>
    "tpu.trace_stop"() : () -> ()
    %cst_71 = arith.constant dense<0.000000e+00> : vector<8x256xf32>
    %138 = vector.multi_reduction <add>, %137, %cst_71 [0] : vector<2x8x256xf32> to vector<8x256xf32>
    %139 = vector.broadcast %101 : vector<1x256xf32> to vector<8x256xf32>
    %140 = arith.addf %138, %139 : vector<8x256xf32>
    %141 = arith.addf %73, %140 : vector<8x256xf32>
    %c0_72 = arith.constant 0 : index
    %c0_73 = arith.constant 0 : index
    %142 = vector.load %arg18[%c0_72, %c0_73] : memref<1x256xf32, #tpu.memory_space<vmem>>, vector<1x256xf32>
    %c0_74 = arith.constant 0 : index
    %c0_75 = arith.constant 0 : index
    %143 = vector.load %arg19[%c0_74, %c0_75] : memref<1x256xf32, #tpu.memory_space<vmem>>, vector<1x256xf32>
    %cst_76 = arith.constant dense<0.000000e+00> : vector<8xf32>
    %144 = vector.multi_reduction <add>, %141, %cst_76 [1] : vector<8x256xf32> to vector<8xf32>
    %145 = vector.shape_cast %144 : vector<8xf32> to vector<8x1xf32>
    %cst_77 = arith.constant 2.560000e+02 : f32
    %146 = vector.broadcast %cst_77 : f32 to vector<8x1xf32>
    %147 = arith.divf %145, %146 : vector<8x1xf32>
    %148 = vector.broadcast %147 : vector<8x1xf32> to vector<8x256xf32>
    %149 = arith.subf %141, %148 : vector<8x256xf32>
    %150 = arith.mulf %149, %149 : vector<8x256xf32>
    %cst_78 = arith.constant dense<0.000000e+00> : vector<8xf32>
    %151 = vector.multi_reduction <add>, %150, %cst_78 [1] : vector<8x256xf32> to vector<8xf32>
    %152 = vector.shape_cast %151 : vector<8xf32> to vector<8x1xf32>
    %cst_79 = arith.constant 2.560000e+02 : f32
    %153 = vector.broadcast %cst_79 : f32 to vector<8x1xf32>
    %154 = arith.divf %152, %153 : vector<8x1xf32>
    %cst_80 = arith.constant 9.99999974E-6 : f32
    %155 = vector.broadcast %cst_80 : f32 to vector<8x1xf32>
    %156 = arith.addf %154, %155 : vector<8x1xf32>
    %157 = math.rsqrt %156 : vector<8x1xf32>
    %158 = vector.broadcast %157 : vector<8x1xf32> to vector<8x256xf32>
    %159 = arith.mulf %149, %158 : vector<8x256xf32>
    %160 = vector.broadcast %142 : vector<1x256xf32> to vector<8x256xf32>
    %161 = arith.mulf %159, %160 : vector<8x256xf32>
    %162 = vector.broadcast %143 : vector<1x256xf32> to vector<8x256xf32>
    %163 = arith.addf %161, %162 : vector<8x256xf32>
    %c0_81 = arith.constant 0 : index
    %c0_82 = arith.constant 0 : index
    %164 = vector.load %arg20[%c0_81, %c0_82] : memref<256x1024xbf16, #tpu.memory_space<vmem>>, vector<256x1024xbf16>
    %c0_83 = arith.constant 0 : index
    %c0_84 = arith.constant 0 : index
    %165 = vector.load %arg22[%c0_83, %c0_84] : memref<1024x256xbf16, #tpu.memory_space<vmem>>, vector<1024x256xbf16>
    %166 = arith.truncf %163 : vector<8x256xf32> to vector<8x256xbf16>
    %cst_85 = arith.constant dense<0.000000e+00> : vector<8x1024xf32>
    %167 = tpu.matmul %166, %164, %cst_85 {dimension_numbers = #tpu.dot_dimension_numbers<[1], [0], [0], [1], [0, 0, 1, 1], [], []>} : vector<8x256xbf16>, vector<256x1024xbf16>, vector<8x1024xf32> -> vector<8x1024xf32>
    %c0_86 = arith.constant 0 : index
    %c0_87 = arith.constant 0 : index
    %168 = vector.load %arg21[%c0_86, %c0_87] : memref<1x1024xf32, #tpu.memory_space<vmem>>, vector<1x1024xf32>
    %169 = vector.broadcast %168 : vector<1x1024xf32> to vector<8x1024xf32>
    %170 = arith.addf %167, %169 : vector<8x1024xf32>
    %cst_88 = arith.constant 5.000000e-01 : f32
    %171 = vector.broadcast %cst_88 : f32 to vector<8x1024xf32>
    %172 = arith.mulf %171, %170 : vector<8x1024xf32>
    %cst_89 = arith.constant 4.471500e-02 : f32
    %173 = vector.broadcast %cst_89 : f32 to vector<8x1024xf32>
    %174 = arith.mulf %173, %170 : vector<8x1024xf32>
    %175 = arith.mulf %174, %170 : vector<8x1024xf32>
    %176 = arith.mulf %175, %170 : vector<8x1024xf32>
    %177 = arith.addf %170, %176 : vector<8x1024xf32>
    %cst_90 = arith.constant 0.797884583 : f32
    %178 = vector.broadcast %cst_90 : f32 to vector<8x1024xf32>
    %179 = arith.mulf %178, %177 : vector<8x1024xf32>
    %180 = math.tanh %179 : vector<8x1024xf32>
    %cst_91 = arith.constant 1.000000e+00 : f32
    %181 = vector.broadcast %cst_91 : f32 to vector<8x1024xf32>
    %182 = arith.addf %181, %180 : vector<8x1024xf32>
    %183 = arith.mulf %172, %182 : vector<8x1024xf32>
    %184 = arith.truncf %183 : vector<8x1024xf32> to vector<8x1024xbf16>
    %cst_92 = arith.constant dense<0.000000e+00> : vector<8x256xf32>
    %185 = tpu.matmul %184, %165, %cst_92 {dimension_numbers = #tpu.dot_dimension_numbers<[1], [0], [0], [1], [0, 0, 1, 1], [], []>} : vector<8x1024xbf16>, vector<1024x256xbf16>, vector<8x256xf32> -> vector<8x256xf32>
    %186 = arith.addf %141, %185 : vector<8x256xf32>
    %c0_93 = arith.constant 0 : index
    %c0_94 = arith.constant 0 : index
    %187 = vector.load %arg23[%c0_93, %c0_94] : memref<1x256xf32, #tpu.memory_space<vmem>>, vector<1x256xf32>
    %188 = vector.broadcast %187 : vector<1x256xf32> to vector<8x256xf32>
    %189 = arith.addf %186, %188 : vector<8x256xf32>
    %c0_95 = arith.constant 0 : index
    %c0_96 = arith.constant 0 : index
    %c0_97 = arith.constant 0 : index
    %190 = vector.load %arg26[%c0_95, %c0_96, %c0_97] : memref<1x8x256xf32, #tpu.memory_space<vmem>>, vector<1x8x256xf32>
    %191 = vector.shape_cast %190 : vector<1x8x256xf32> to vector<8x256xf32>
    %192 = vector.shape_cast %189 : vector<8x256xf32> to vector<1x8x256xf32>
    tpu.vector_store %arg26[%c0_95, %c0_96, %c0_97], %192 {strides = array<i32>} : memref<1x8x256xf32, #tpu.memory_space<vmem>>, vector<1x8x256xf32>,
    return
  }
  func.func @transform_0(%arg0: i32) -> (i32, i32, i32) {
    %c0_i32 = arith.constant 0 : i32
    %c0_i32_0 = arith.constant 0 : i32
    %c0_i32_1 = arith.constant 0 : i32
    return %arg0, %c0_i32, %c0_i32_0 : i32, i32, i32
  }
  func.func @transform_1(%arg0: i32) -> (i32, i32, i32) {
    %c0_i32 = arith.constant 0 : i32
    %c0_i32_0 = arith.constant 0 : i32
    %c0_i32_1 = arith.constant 0 : i32
    return %arg0, %c0_i32, %c0_i32_0 : i32, i32, i32
  }
  func.func @transform_2(%arg0: i32) -> (i32, i32, i32) {
    %c0_i32 = arith.constant 0 : i32
    %c0_i32_0 = arith.constant 0 : i32
    %c0_i32_1 = arith.constant 0 : i32
    return %arg0, %c0_i32, %c0_i32_0 : i32, i32, i32
  }
  func.func @transform_3(%arg0: i32) -> (i32, i32) {
    %c0_i32 = arith.constant 0 : i32
    %c0_i32_0 = arith.constant 0 : i32
    %c0_i32_1 = arith.constant 0 : i32
    return %c0_i32, %c0_i32_0 : i32, i32
  }
  func.func @transform_4(%arg0: i32) -> (i32, i32) {
    %c0_i32 = arith.constant 0 : i32
    %c0_i32_0 = arith.constant 0 : i32
    %c0_i32_1 = arith.constant 0 : i32
    return %c0_i32, %c0_i32_0 : i32, i32
  }
  func.func @transform_5(%arg0: i32) -> (i32, i32, i32) {
    %c0_i32 = arith.constant 0 : i32
    %c0_i32_0 = arith.constant 0 : i32
    %c0_i32_1 = arith.constant 0 : i32
    %c0_i32_2 = arith.constant 0 : i32
    return %c0_i32, %c0_i32_0, %c0_i32_1 : i32, i32, i32
  }
  func.func @transform_6(%arg0: i32) -> (i32, i32, i32) {
    %c0_i32 = arith.constant 0 : i32
    %c0_i32_0 = arith.constant 0 : i32
    %c0_i32_1 = arith.constant 0 : i32
    %c0_i32_2 = arith.constant 0 : i32
    return %c0_i32, %c0_i32_0, %c0_i32_1 : i32, i32, i32
  }
  func.func @transform_7(%arg0: i32) -> (i32, i32, i32) {
    %c0_i32 = arith.constant 0 : i32
    %c0_i32_0 = arith.constant 0 : i32
    %c0_i32_1 = arith.constant 0 : i32
    %c0_i32_2 = arith.constant 0 : i32
    return %c0_i32, %c0_i32_0, %c0_i32_1 : i32, i32, i32
  }
  func.func @transform_8(%arg0: i32) -> (i32, i32) {
    %c0_i32 = arith.constant 0 : i32
    %c0_i32_0 = arith.constant 0 : i32
    %c0_i32_1 = arith.constant 0 : i32
    return %c0_i32, %c0_i32_0 : i32, i32
  }
  func.func @transform_9(%arg0: i32) -> (i32, i32) {
    %c0_i32 = arith.constant 0 : i32
    %c0_i32_0 = arith.constant 0 : i32
    %c0_i32_1 = arith.constant 0 : i32
    return %c0_i32, %c0_i32_0 : i32, i32
  }
  func.func @transform_10(%arg0: i32) -> (i32, i32) {
    %c0_i32 = arith.constant 0 : i32
    %c0_i32_0 = arith.constant 0 : i32
    %c0_i32_1 = arith.constant 0 : i32
    return %c0_i32, %c0_i32_0 : i32, i32
  }
  func.func @transform_11(%arg0: i32) -> (i32, i32, i32) {
    %c0_i32 = arith.constant 0 : i32
    %c0_i32_0 = arith.constant 0 : i32
    %c0_i32_1 = arith.constant 0 : i32
    %c0_i32_2 = arith.constant 0 : i32
    return %c0_i32, %c0_i32_0, %c0_i32_1 : i32, i32, i32
  }
  func.func @transform_12(%arg0: i32) -> (i32, i32, i32) {
    %c0_i32 = arith.constant 0 : i32
    %c0_i32_0 = arith.constant 0 : i32
    %c0_i32_1 = arith.constant 0 : i32
    %c0_i32_2 = arith.constant 0 : i32
    return %c0_i32, %c0_i32_0, %c0_i32_1 : i32, i32, i32
  }
  func.func @transform_13(%arg0: i32) -> (i32, i32, i32) {
    %c0_i32 = arith.constant 0 : i32
    %c0_i32_0 = arith.constant 0 : i32
    %c0_i32_1 = arith.constant 0 : i32
    %c0_i32_2 = arith.constant 0 : i32
    return %c0_i32, %c0_i32_0, %c0_i32_1 : i32, i32, i32
  }
  func.func @transform_14(%arg0: i32) -> (i32, i32, i32) {
    %c0_i32 = arith.constant 0 : i32
    %c0_i32_0 = arith.constant 0 : i32
    %c0_i32_1 = arith.constant 0 : i32
    %c0_i32_2 = arith.constant 0 : i32
    return %c0_i32, %c0_i32_0, %c0_i32_1 : i32, i32, i32
  }
  func.func @transform_15(%arg0: i32) -> (i32, i32, i32) {
    %c0_i32 = arith.constant 0 : i32
    %c0_i32_0 = arith.constant 0 : i32
    %c0_i32_1 = arith.constant 0 : i32
    %c0_i32_2 = arith.constant 0 : i32
    return %c0_i32, %c0_i32_0, %c0_i32_1 : i32, i32, i32
  }
  func.func @transform_16(%arg0: i32) -> (i32, i32) {
    %c0_i32 = arith.constant 0 : i32
    %c0_i32_0 = arith.constant 0 : i32
    %c0_i32_1 = arith.constant 0 : i32
    return %c0_i32, %c0_i32_0 : i32, i32
  }
  func.func @transform_17(%arg0: i32) -> (i32, i32) {
    %c0_i32 = arith.constant 0 : i32
    %c0_i32_0 = arith.constant 0 : i32
    %c0_i32_1 = arith.constant 0 : i32
    return %c0_i32, %c0_i32_0 : i32, i32
  }
  func.func @transform_18(%arg0: i32) -> (i32, i32) {
    %c0_i32 = arith.constant 0 : i32
    %c0_i32_0 = arith.constant 0 : i32
    %c0_i32_1 = arith.constant 0 : i32
    return %c0_i32, %c0_i32_0 : i32, i32
  }
  func.func @transform_19(%arg0: i32) -> (i32, i32) {
    %c0_i32 = arith.constant 0 : i32
    %c0_i32_0 = arith.constant 0 : i32
    %c0_i32_1 = arith.constant 0 : i32
    return %c0_i32, %c0_i32_0 : i32, i32
  }
  func.func @transform_20(%arg0: i32) -> (i32, i32) {
    %c0_i32 = arith.constant 0 : i32
    %c0_i32_0 = arith.constant 0 : i32
    %c0_i32_1 = arith.constant 0 : i32
    return %c0_i32, %c0_i32_0 : i32, i32
  }
  func.func @transform_21(%arg0: i32) -> (i32, i32) {
    %c0_i32 = arith.constant 0 : i32
    %c0_i32_0 = arith.constant 0 : i32
    %c0_i32_1 = arith.constant 0 : i32
    return %c0_i32, %c0_i32_0 : i32, i32
  }
  func.func @transform_22(%arg0: i32) -> (i32, i32) {
    %c0_i32 = arith.constant 0 : i32
    %c0_i32_0 = arith.constant 0 : i32
    %c0_i32_1 = arith.constant 0 : i32
    return %c0_i32, %c0_i32_0 : i32, i32
  }
  func.func @transform_23(%arg0: i32) -> (i32, i32) {
    %c0_i32 = arith.constant 0 : i32
    %c0_i32_0 = arith.constant 0 : i32
    %c0_i32_1 = arith.constant 0 : i32
    return %c0_i32, %c0_i32_0 : i32, i32
  }
  func.func @transform_24(%arg0: i32) -> (i32, i32) {
    %c0_i32 = arith.constant 0 : i32
    %c0_i32_0 = arith.constant 0 : i32
    %c0_i32_1 = arith.constant 0 : i32
    return %c0_i32, %c0_i32_0 : i32, i32
  }
  func.func @transform_25(%arg0: i32) -> (i32, i32, i32) {
    %c0_i32 = arith.constant 0 : i32
    %c0_i32_0 = arith.constant 0 : i32
    %c0_i32_1 = arith.constant 0 : i32
    return %arg0, %c0_i32, %c0_i32_0 : i32, i32, i32
  }
}

</mosaic_0001>

<bundles_post_ra>
// kernel: tpu_custom_call.1
= control target key start
LH: loop header
LB: loop body
LE: loop exit
PB: predicated region body
PF: predicated region fallthrough
CT: control target
= control target key end

     0   :  { %s8826_s0 = inlined_call_operand.hbm [shape: f32[2,8,256], index: 0, kind: input, shape index: {}]   ;;  %s8827_s1 = inlined_call_operand.hbm [shape: bf16[2,8,256], index: 1, kind: input, shape index: {}]   ;;  %s8828_s2 = inlined_call_operand.hbm [shape: f32[2,1,8], index: 2, kind: input, shape index: {}]   ;;  %s8829_s3 = inlined_call_operand.hbm [shape: f32[1,256], index: 3, kind: input, shape index: {}]   ;;  %s8830_s4 = inlined_call_operand.hbm [shape: f32[1,256], index: 4, kind: input, shape index: {}]   ;;  %s8831_s5 = inlined_call_operand.hbm [shape: bf16[2,256,384], index: 5, kind: input, shape index: {}]   ;;  %s8832_s6 = inlined_call_operand.vmem [shape: f32[2,1,384], index: 6, kind: input, shape index: {}]   ;;  %s8833_s7 = inlined_call_operand.hbm [shape: bf16[2,128,256], index: 7, kind: input, shape index: {}]   ;;  %s8834_s8 = inlined_call_operand.hbm [shape: f32[1,256], index: 8, kind: input, shape index: {}]   ;;  %s8835_s9 = inlined_call_operand.hbm [shape: f32[1,256], index: 9, kind: input, shape index: {}]   ;;  %s8836_s10 = inlined_call_operand.hbm [shape: f32[1,256], index: 10, kind: input, shape index: {}]   ;;  %s8837_s11 = inlined_call_operand.hbm [shape: bf16[2,256,128], index: 11, kind: input, shape index: {}]   ;;  %s8838_s12 = inlined_call_operand.vmem [shape: f32[2,1,128], index: 12, kind: input, shape index: {}]   ;;  %s8839_s13 = inlined_call_operand.hbm [shape: bf16[2,256,256], index: 13, kind: input, shape index: {}]   ;;  %s8840_s14 = inlined_call_operand.vmem [shape: f32[2,1,256], index: 14, kind: input, shape index: {}]   ;;  %s8841_s15 = inlined_call_operand.hbm [shape: bf16[2,128,256], index: 15, kind: input, shape index: {}]   ;;  %s8842_s16 = inlined_call_operand.vmem [shape: f32[1,256], index: 16, kind: input, shape index: {}]   ;;  %s8843_s17 = inlined_call_operand.vmem [shape: f32[1,256], index: 17, kind: input, shape index: {}]   ;;  %s8844_s18 = inlined_call_operand.vmem [shape: f32[1,256], index: 18, kind: input, shape index: {}]   ;;  %s8845_s19 = inlined_call_operand.hbm [shape: bf16[256,1024], index: 19, kind: input, shape index: {}]   ;;  %s8846_s20 = inlined_call_operand.vmem [shape: f32[1,1024], index: 20, kind: input, shape index: {}]   ;;  %s8847_s21 = inlined_call_operand.hbm [shape: bf16[1024,256], index: 21, kind: input, shape index: {}]   ;;  %s8848_s22 = inlined_call_operand.vmem [shape: f32[1,256], index: 22, kind: input, shape index: {}]   ;;  %s8849_s23 = inlined_call_operand.vmem [shape: f32[1,256], index: 23, kind: input, shape index: {}]   ;;  %s8850_s24 = inlined_call_operand.vmem [shape: f32[1,256], index: 24, kind: input, shape index: {}]   ;;  %s8851_s25 = inlined_call_operand.hbm [shape: f32[2,8,256], index: 25, kind: output, shape index: {}]  }
   0x1   :  { %8882 = sst [smem:[#allocation42_spill]] %s8826_s0 }
   0x2   :  { %8883 = sst [smem:[#allocation43_spill]] %s8827_s1 }
   0x3   :  { %8884 = sst [smem:[#allocation44_spill]] %s8828_s2 }
   0x4   :  { %8885 = sst [smem:[#allocation45_spill]] %s8829_s3 }
   0x5   :  { %8886 = sst [smem:[#allocation46_spill]] %s8830_s4 }
   0x6   :  { %8887 = sst [smem:[#allocation47_spill]] %s8831_s5 }
   0x7   :  { %8888 = sst [smem:[#allocation48_spill]] %s8832_s6 }
   0x8   :  { %8889 = sst [smem:[#allocation49_spill]] %s8833_s7 }
   0x9   :  { %8890 = sst [smem:[#allocation50_spill]] %s8834_s8 }
   0xa   :  { %8891 = sst [smem:[#allocation51_spill]] %s8835_s9 }
   0xb   :  { %8892 = sst [smem:[#allocation52_spill]] %s8836_s10 }
   0xc   :  { %8893 = sst [smem:[#allocation53_spill]] %s8837_s11 }
   0xd   :  { %8894 = sst [smem:[#allocation54_spill]] %s8839_s13 }
   0xe   :  { %8895 = sst [smem:[#allocation55_spill]] %s8844_s18 }
   0xf   :  { %8896 = sst [smem:[#allocation56_spill]] %s8845_s19 }
  0x10   :  { %8897 = sst [smem:[#allocation57_spill]] %s8846_s20 }
  0x11   :  { %8898 = sst [smem:[#allocation58_spill]] %s8848_s22 }
  0x12   :  { %8899 = sst [smem:[#allocation59_spill]] %s8851_s25 }
  0x13   :  { %30 = vsyncpa [#allocation3], 0 }
  0x14   :  { %32 = vsyncpa [#allocation3 + $0x1], 0 }
  0x15   :  { %33 = vsyncpa [#allocation6], 0 }
  0x16   :  { %35 = vsyncpa [#allocation6 + $0x1], 0 }
  0x17   :  { %36 = vsyncpa [#allocation9], 0 }
  0x18   :  { %37 = vsyncpa [#allocation12], 0 }
  0x19   :  { %38 = vsyncpa [#allocation15], 0 }
  0x1a   :  { %39 = vsyncpa [#allocation18], 0 }
  0x1b   :  { %40 = vsyncpa [#allocation21], 0 }
  0x1c   :  { %41 = vsyncpa [#allocation24], 0 }
  0x1d   :  { %42 = vsyncpa [#allocation4], 0 }
  0x1e   :  { %44 = vsyncpa [#allocation4 + $0x1], 0  ;;  %s8238_s29 = smov 0   ;;  %s8240_s23 = smov 0  }
  0x1f   :  { %s8242_s24 = smov 0   ;;  %s8244_s2 = smov 0  }
  0x20 LB: > { %8900 = sst [smem:[#allocation36_spill]] %s8067_s29  ;;  %s8081_s6 = smov [#allocation8]   ;;  %s8079_s2 = sphi %s8244_s2, %s8959_s2   ;;  %s8075_s24 = sphi %s8242_s24, %s8961_s24   ;;  %s8071_s23 = sphi %s8240_s23, %s8963_s23   ;;  %s8067_s29 = sphi %s8238_s29, %s8962_s29  }
  0x21   : > { %8901 = sst [smem:[#allocation37_spill]] %s8075_s24  ;;  %s634_s30 = sshll.u32 %s8081_s6, 4  ;;  %s635_s30 = int_to_ptr.vmem [resolvable:$true] %s634_s30 }
  0x22   : > { %s8259_s7 = sadd.s32 4294967295, %s8079_s2   ;;  %p6099_p0 = scmp.ge.s32.totalorder %s8079_s2, 1 }
  0x23   : > { %p8869_p1 = scmp.eq.s32.totalorder %s8259_s7, 0  ;;  %p621_p2 = scmp.lt.s32.totalorder %s8079_s2, 3 }
  0x24   : > { %s8082_s26 = smov [#allocation11]   ;;  %s8083_s27 = smov [#allocation14]  }
  0x25   : > { %p8264_p3 = pnand %p6099_p0, %p621_p2  ;;  %s655_s1 = sshll.u32 %s8082_s26, 4  ;;  %s8271_s1 = int_to_ptr.vmem [resolvable:$true] %s655_s1 }
  0x26   : > { %s685_s4 = sshll.u32 %s8083_s27, 4  ;;  %s7602_s9 = scalar_lea.vmem %s635_s30, 32  ;;  %s8279_s4 = int_to_ptr.vmem [resolvable:$true] %s685_s4 }
  0x27   : > { %s8902_s3 = scalar_select %p8264_p3, 1, 0 }
  0x28   : > { %p6873_p5 = pneg %p8264_p3  ;;  %p7603_p8 = scmp.ne.s32.totalorder %s635_s30, %s7602_s9 }
  0x29   : > { %p7610_p11 = scmp.lt.s32.totalorder %s635_s30, %s635_s30  ;;  %p7611_p12 = scmp.lt.s32.totalorder %s7602_s9, %s7602_s9 }
  0x2a   : > { %p8275_p6 = pnand %p6873_p5, %p8869_p1 }
  0x2b   : > { %p7612_p13 = por %p7611_p12, %p7610_p11 }
  0x2c   : > { %s8903_s8 = scalar_select %p8275_p6, 1, 0 }
  0x2d   : > { %p8283_p7 = pneg %p8275_p6 }
  0x2f   : > { %s8904_s28 = scalar_select %p8283_p7, 1, 0 }
  0x30   : > { %p7605_p9 = pnand %p7603_p8, %p8283_p7 }
  0x32   : > { %p7606_p10 = pneg %p7605_p9 }
  0x34   : > { %p7613_p0 = pnand %p7612_p13, %p7606_p10 }
  0x36   : > { %7616 = shalt.err (!%p7613_p0)
}
  0x37   : > { %s8905_s6 = sld [smem:[#allocation45_spill]]  ;;  %s7628_s26 = scalar_lea.vmem %s8271_s1, 12288 }
  0x38   : > { %p7629_p2 = scmp.ne.s32.totalorder %s8271_s1, %s7628_s26  ;;  %p7636_p9 = scmp.lt.s32.totalorder %s8271_s1, %s8271_s1 }
  0x39   : > { %p7637_p11 = scmp.lt.s32.totalorder %s7628_s26, %s7628_s26 }
  0x3a   : > { %p7631_p5 = pnand %p7629_p2, %p8283_p7 }
  0x3b   : > { %p7638_p10 = por %p7637_p11, %p7636_p9 }
  0x3c   : > { %p7632_p8 = pneg %p7631_p5 }
  0x3d   : > { %6876 = dma.hbm_to_vmem [thread:$0]  (!%p8275_p6), %s8905_s6, 32, %s635_s30, [#allocation9]  }
  0x3e   : > { %p7639_p12 = pnand %p7638_p10, %p7632_p8 }
  0x40   : > { %7642 = shalt.err (!%p7639_p12)
}
  0x41   : > { %s8084_s27 = smov 192   ;;  %s8085_s9 = smov 12  }
  0x42   : > { %s8906_s0 = sld [smem:[#allocation47_spill]]  ;;  %s7654_s6 = scalar_lea.vmem %s8279_s4, 32 }
  0x43   : > { %p7655_p13 = scmp.ne.s32.totalorder %s8279_s4, %s7654_s6  ;;  %p7662_p5 = scmp.lt.s32.totalorder %s8279_s4, %s8279_s4 }
  0x44   : > { %p7663_p8 = scmp.lt.s32.totalorder %s7654_s6, %s7654_s6 }
  0x45   : > { %p7657_p0 = pnand %p7655_p13, %p8283_p7 }
  0x46   : > { %p7664_p9 = por %p7663_p8, %p7662_p5 }
  0x47   : > { %p7658_p2 = pneg %p7657_p0 }
  0x48   : > { %6882 = dma.hbm_to_vmem [thread:$0]  (!%p8275_p6), %s8906_s0, 12288, %s8271_s1, [#allocation12], %s8084_s27, %s8084_s27, %s8085_s9  }
  0x49   : > { %p7665_p11 = pnand %p7664_p9, %p7658_p2 }
  0x4b   : > { %7668 = shalt.err (!%p7665_p11)
}
  0x4c   : > { %s8907_s22 = sld [smem:[#allocation50_spill]]  ;;  %s8086_s1 = smov [#allocation17]  }
  0x4d   : > { %s707_s27 = sshll.u32 %s8086_s1, 4  ;;  %s708_s27 = int_to_ptr.vmem [resolvable:$true] %s707_s27 }
  0x4e   : > { %s7680_s9 = scalar_lea.vmem %s708_s27, 32  ;;  %p7688_p0 = scmp.lt.s32.totalorder %s708_s27, %s708_s27 }
  0x4f   : > { %p7681_p10 = scmp.ne.s32.totalorder %s708_s27, %s7680_s9  ;;  %p7689_p5 = scmp.lt.s32.totalorder %s7680_s9, %s7680_s9 }
  0x51   : > { %p7683_p12 = pnand %p7681_p10, %p8283_p7  ;;  %p7690_p2 = por %p7689_p5, %p7688_p0 }
  0x52   : > { %6888 = dma.hbm_to_vmem [thread:$0]  (!%p8275_p6), %s8907_s22, 32, %s8279_s4, [#allocation15]  }
  0x53   : > { %p7684_p13 = pneg %p7683_p12 }
  0x55   : > { %p7691_p8 = pnand %p7690_p2, %p7684_p13 }
  0x57   : > { %7694 = shalt.err (!%p7691_p8)
}
  0x58   : > { %s8908_s10 = sld [smem:[#allocation52_spill]]  ;;  %s8087_s22 = smov [#allocation20]  }
  0x59   : > { %s733_s25 = sshll.u32 %s8087_s22, 4  ;;  %s8088_s4 = smov [#allocation23]   ;;  %s734_s25 = int_to_ptr.vmem [resolvable:$true] %s733_s25 }
  0x5a   : > { %s771_s0 = sshll.u32 %s8088_s4, 4  ;;  %s7706_s6 = scalar_lea.vmem %s734_s25, 8192  ;;  %s772_s0 = int_to_ptr.vmem [resolvable:$true] %s771_s0 }
  0x5b   : > { %p7707_p9 = scmp.ne.s32.totalorder %s734_s25, %s7706_s6  ;;  %p7714_p12 = scmp.lt.s32.totalorder %s734_s25, %s734_s25 }
  0x5c   : > { %p7715_p13 = scmp.lt.s32.totalorder %s7706_s6, %s7706_s6 }
  0x5d   : > { %p7709_p11 = pnand %p7707_p9, %p8283_p7 }
  0x5e   : > { %6894 = dma.hbm_to_vmem [thread:$0]  (!%p8275_p6), %s8908_s10, 32, %s708_s27, [#allocation18]  }
  0x5f   : > { %p7710_p10 = pneg %p7709_p11  ;;  %p7716_p0 = por %p7715_p13, %p7714_p12 }
  0x61   : > { %p7717_p5 = pnand %p7716_p0, %p7710_p10 }
  0x63   : > { %7720 = shalt.err (!%p7717_p5)
}
  0x64   : > { %s8857_s26 = smov 128   ;;  %s8860_s1 = smov 8  }
  0x65   : > { %s8909_s13 = sld [smem:[#allocation54_spill]]  ;;  %s7732_s30 = scalar_lea.vmem %s772_s0, 16384 }
  0x66   : > { %p7733_p2 = scmp.ne.s32.totalorder %s772_s0, %s7732_s30  ;;  %p7740_p11 = scmp.lt.s32.totalorder %s772_s0, %s772_s0 }
  0x67   : > { %p7741_p10 = scmp.lt.s32.totalorder %s7732_s30, %s7732_s30 }
  0x68   : > { %p7735_p8 = pnand %p7733_p2, %p8283_p7 }
  0x69   : > { %p7742_p12 = por %p7741_p10, %p7740_p11 }
  0x6a   : > { %p7736_p9 = pneg %p7735_p8 }
  0x6b   : > { %6900 = dma.hbm_to_vmem [thread:$0]  (!%p8275_p6), %s8909_s13, 8192, %s734_s25, [#allocation21], %s8857_s26, %s8857_s26, %s8860_s1  }
  0x6c   : > { %p7743_p13 = pnand %p7742_p12, %p7736_p9 }
  0x6e   : > { %7746 = shalt.err (!%p7743_p13)
}
  0x6f   : > { %s8091_s5 = smov 512   ;;  %s8092_s22 = smov 32  }
  0x70   : > { %s8910_s19 = sld [smem:[#allocation56_spill]]  ;;  %s6098_s6 = sadd.s32 4294967294, %s8079_s2  }
  0x71   : > { %s8344_s27 = sadd.s32 1, %s8079_s2   ;;  %s57_s30 = sadd.s32 1, %s8075_s24 }
  0x72   : > { %8911 = sst [smem:[#allocation38_spill]] %s8344_s27  ;;  %s54_s9 = ssub.s32 %s8079_s2, %s8344_s27 }
  0x73   : > { %p55_p0 = scmp.eq.s32.totalorder %s54_s9, 0  ;;  %p64_p5 = scmp.ne.s32.totalorder %s8075_s24, %s8071_s23 }
  0x74   : > { %p65_p2 = scmp.eq.s32.totalorder %s8079_s2, 0  ;;  %p70_p8 = scmp.ne.s32.totalorder %s8071_s23, %s8067_s29 }
  0x75   : > { %s8355_s26 = scalar_select %p55_p0, %s8075_s24, %s57_s30  }
  0x76   : > { %6906 = dma.hbm_to_vmem [thread:$0]  (!%p8275_p6), %s8910_s19, 16384, %s772_s0, [#allocation24], %s8091_s5, %s8091_s5, %s8092_s22  }
  0x77   : > { %8912 = sst [smem:[#allocation39_spill]] %s8355_s26  ;;  %p66_p9 = por %p65_p2, %p64_p5 }
  0x78   : > { %p8359_p11 = por %p8869_p1, %p70_p8  ;;  %p608_p10 = scmp.eq.s32.totalorder %s8259_s7, 1 }
  0x79   : > { %p614_p12 = scmp.eq.s32.totalorder %s6098_s6, 1  ;;  %p6936_p13 = scmp.lt.s32.totalorder %s8079_s2, 2 }
  0x7a   : > { %s8913_s25 = scalar_select %p8359_p11, 1, 0 }
  0x7b   : > { %s8366_s0 = sand.u32 1, %s8075_s24   ;;  %p8368_p4 = por %p608_p10, %p64_p5 }
  0x7c   : > { %p8372_p3 = por %p614_p12, %p70_p8  ;;  %p8376_p0 = pnand %p6936_p13, %p66_p9 }
  0x7d   : > { %s8914_s5 = scalar_select %p8368_p4, 1, 0 }
  0x7e   : > { %s8916_s22 = scalar_select %p8372_p3, 1, 0 }
  0x7f   : > { %8915 = sst [smem:[#allocation40_spill]] %s8914_s5  ;;  %s829_s9 = sand.u32 1, %s8079_s2  }
  0x80   : > { %8917 = sst [smem:[#allocation41_spill]] %s8916_s22  ;;  %s6116_s30 = sshll.u32 %s8366_s0, 3 }
  0x81   : > { %s8918_s4 = scalar_select %p8376_p0, 1, 0 }
  0x82   : > { %s6663_s6 = sshll.u32 %s8079_s2, 7  ;;  %s833_s1 = scalar_lea.vmem [#allocation5], %s6116_s30 }
  0x83   : > { %s841_s10 = sshll.u32 %s833_s1, 4  ;;  %s8919_s26 = sld [smem:[#allocation43_spill]]  ;;  %s842_s10 = int_to_ptr.vmem [resolvable:$true] %s841_s10 }
  0x84   : > { %s8386_s27 = scalar_lea.sflag [#allocation6], %s829_s9  ;;  %p8390_p2 = pneg %p8376_p0 }
  0x86   : > { %s8920_s22 = scalar_select %p8390_p2, 1, 0 }
  0x89   : > { %s839_s24 = scalar_lea.hbm %s8919_s26, %s6663_s6  ;;  %s7752_s5 = scalar_lea.hbm %s8919_s26, 256 }
  0x8a   : > { %s7747_s29 = scalar_lea.hbm %s839_s24, 128  ;;  %p7753_p10 = scmp.lt.s32.totalorder %s839_s24, %s8919_s26 }
  0x8b   : > { %p7748_p5 = scmp.ne.s32.totalorder %s839_s24, %s7747_s29  ;;  %p7754_p12 = scmp.lt.s32.totalorder %s7752_s5, %s7747_s29 }
  0x8d   : > { %p7750_p8 = pnand %p8390_p2, %p7748_p5  ;;  %p7755_p13 = por %p7754_p12, %p7753_p10 }
  0x8f   : > { %p7751_p9 = pneg %p7750_p8 }
  0x91   : > { %p7756_p1 = pnand %p7755_p13, %p7751_p9 }
  0x93   : > { %7759 = shalt.err (!%p7756_p1)
}
  0x94   : > { %s7760_s9 = scalar_lea.vmem %s842_s10, 128  ;;  %s8093_s6 = smov [#allocation5]  }
  0x95   : > { %p7761_p3 = scmp.ne.s32.totalorder %s842_s10, %s7760_s9  ;;  %s7765_s20 = sshll.u32 %s8093_s6, 4  ;;  %s7766_s20 = int_to_ptr.vmem [resolvable:$false] %s7765_s20 }
  0x96   : > { %s7767_s18 = scalar_lea.vmem %s7766_s20, 256  ;;  %p7768_p5 = scmp.lt.s32.totalorder %s842_s10, %s7766_s20 }
  0x97   : > { %p7763_p4 = pnand %p7761_p3, %p8390_p2  ;;  %p7769_p8 = scmp.lt.s32.totalorder %s7767_s18, %s7760_s9 }
  0x99   : > { %p7764_p11 = pneg %p7763_p4  ;;  %p7770_p6 = por %p7769_p8, %p7768_p5 }
  0x9b   : > { %p7771_p7 = pnand %p7770_p6, %p7764_p11 }
  0x9d   : > { %7774 = shalt.err (!%p7771_p7)
}
  0x9e   : > { %6916 = dma.hbm_to_vmem [thread:$0]  (!%p8376_p0), %s839_s24, 128, %s842_s10, %s8386_s27  }
  0x9f   : > { %s8094_s29 = smov [#allocation10]   ;;  %s8095_s30 = smov [#allocation13]  }
  0xa0   : > { %s645_s5 = sshll.u32 %s8094_s29, 4  ;;  %s671_s1 = sshll.u32 %s8095_s30, 4  ;;  %s646_s5 = int_to_ptr.vmem [resolvable:$true] %s645_s5  ;;  %s672_s1 = int_to_ptr.vmem [resolvable:$true] %s671_s1 }
  0xa1   : > { %s7786_s13 = scalar_lea.vmem %s646_s5, 32  ;;  %p8921_p3 = scmp.ne.s32.totalorder %s8904_s28, 0 }
  0xa2   : > { %p7787_p1 = scmp.ne.s32.totalorder %s646_s5, %s7786_s13  ;;  %p7794_p10 = scmp.lt.s32.totalorder %s646_s5, %s646_s5 }
  0xa3   : > { %p7795_p12 = scmp.lt.s32.totalorder %s7786_s13, %s7786_s13 }
  0xa4   : > { %p7789_p4 = pnand %p7787_p1, %p8921_p3 }
  0xa5   : > { %p7796_p6 = por %p7795_p12, %p7794_p10 }
  0xa6   : > { %p7790_p9 = pneg %p7789_p4 }
  0xa8   : > { %p7797_p7 = pnand %p7796_p6, %p7790_p9 }
  0xaa   : > { %7800 = shalt.err (!%p7797_p7)
}
  0xab   : > { %p8922_p11 = scmp.ne.s32.totalorder %s8903_s8, 0  ;;  %s8923_s20 = sld [smem:[#allocation46_spill]] }
  0xac   : > { %s7812_s24 = scalar_lea.vmem %s672_s1, 4096  ;;  %p7820_p0 = scmp.lt.s32.totalorder %s672_s1, %s672_s1 }
  0xad   : > { %p7813_p13 = scmp.ne.s32.totalorder %s672_s1, %s7812_s24  ;;  %p7821_p1 = scmp.lt.s32.totalorder %s7812_s24, %s7812_s24 }
  0xaf   : > { %p7815_p5 = pnand %p7813_p13, %p8921_p3  ;;  %p7822_p4 = por %p7821_p1, %p7820_p0 }
  0xb1   : > { %6879 = dma.hbm_to_vmem [thread:$0]  (!%p8922_p11), %s8923_s20, 32, %s646_s5, [#allocation9]  }
  0xb2   : > { %p7816_p8 = pneg %p7815_p5 }
  0xb4   : > { %p7823_p2 = pnand %p7822_p4, %p7816_p8 }
  0xb6   : > { %7826 = shalt.err (!%p7823_p2)
}
  0xb7   : > { %s8924_s19 = smov 8   ;;  %s8925_s9 = smov 128  }
  0xb8   : > { %s8926_s30 = sld [smem:[#allocation49_spill]]  ;;  %s8096_s5 = smov [#allocation16]  }
  0xb9   : > { %s696_s13 = sshll.u32 %s8096_s5, 4  ;;  %s8097_s18 = smov [#allocation19]   ;;  %s697_s13 = int_to_ptr.vmem [resolvable:$true] %s696_s13 }
  0xba   : > { %s717_s10 = sshll.u32 %s8097_s18, 4  ;;  %s7838_s20 = scalar_lea.vmem %s697_s13, 32  ;;  %s718_s10 = int_to_ptr.vmem [resolvable:$true] %s717_s10 }
  0xbb   : > { %p7839_p0 = scmp.ne.s32.totalorder %s697_s13, %s7838_s20  ;;  %p7846_p10 = scmp.lt.s32.totalorder %s697_s13, %s697_s13 }
  0xbc   : > { %p7847_p12 = scmp.lt.s32.totalorder %s7838_s20, %s7838_s20 }
  0xbd   : > { %p7841_p2 = pnand %p7839_p0, %p8921_p3 }
  0xbe   : > { %6885 = dma.hbm_to_vmem [thread:$0]  (!%p8922_p11), %s8926_s30, 4096, %s672_s1, [#allocation12], %s8925_s9, %s8925_s9, %s8924_s19  }
  0xbf   : > { %p7842_p9 = pneg %p7841_p2  ;;  %p7848_p6 = por %p7847_p12, %p7846_p10 }
  0xc1   : > { %p7849_p7 = pnand %p7848_p6, %p7842_p9 }
  0xc3   : > { %7852 = shalt.err (!%p7849_p7)
}
  0xc4   : > { %s8927_s6 = sld [smem:[#allocation51_spill]]  ;;  %s7864_s29 = scalar_lea.vmem %s718_s10, 4096 }
  0xc5   : > { %p7865_p13 = scmp.ne.s32.totalorder %s718_s10, %s7864_s29  ;;  %p7872_p1 = scmp.lt.s32.totalorder %s718_s10, %s718_s10 }
  0xc6   : > { %p7873_p4 = scmp.lt.s32.totalorder %s7864_s29, %s7864_s29 }
  0xc7   : > { %p7867_p5 = pnand %p7865_p13, %p8921_p3 }
  0xc8   : > { %p7874_p0 = por %p7873_p4, %p7872_p1 }
  0xc9   : > { %p7868_p8 = pneg %p7867_p5 }
  0xca   : > { %6891 = dma.hbm_to_vmem [thread:$0]  (!%p8922_p11), %s8927_s6, 32, %s697_s13, [#allocation15]  }
  0xcb   : > { %p7875_p2 = pnand %p7874_p0, %p7868_p8 }
  0xcd   : > { %7878 = shalt.err (!%p7875_p2)
}
  0xce   : > { %s8098_s30 = smov 64   ;;  %s8099_s5 = smov 4  }
  0xcf   : > { %s8928_s11 = sld [smem:[#allocation53_spill]]  ;;  %s8100_s13 = smov [#allocation22]  }
  0xd0   : > { %s749_s24 = sshll.u32 %s8100_s13, 4  ;;  %s8101_s1 = smov [#allocation25]   ;;  %s750_s24 = int_to_ptr.vmem [resolvable:$true] %s749_s24 }
  0xd1   : > { %s787_s6 = sshll.u32 %s8101_s1, 4  ;;  %s7890_s26 = scalar_lea.vmem %s750_s24, 4096  ;;  %s788_s6 = int_to_ptr.vmem [resolvable:$true] %s787_s6 }
  0xd2   : > { %p7891_p9 = scmp.ne.s32.totalorder %s750_s24, %s7890_s26  ;;  %p7898_p6 = scmp.lt.s32.totalorder %s750_s24, %s750_s24 }
  0xd3   : > { %p7899_p7 = scmp.lt.s32.totalorder %s7890_s26, %s7890_s26 }
  0xd4   : > { %p7893_p10 = pnand %p7891_p9, %p8921_p3 }
  0xd5   : > { %6897 = dma.hbm_to_vmem [thread:$0]  (!%p8922_p11), %s8928_s11, 4096, %s718_s10, [#allocation18], %s8098_s30, %s8098_s30, %s8099_s5  }
  0xd6   : > { %p7894_p12 = pneg %p7893_p10  ;;  %p7900_p13 = por %p7899_p7, %p7898_p6 }
  0xd8   : > { %p7901_p5 = pnand %p7900_p13, %p7894_p12 }
  0xda   : > { %7904 = shalt.err (!%p7901_p5)
}
  0xdb   : > { %6903 = dma.hbm_to_vmem [thread:$0]  (!%p8922_p11), %s8841_s15, 4096, %s750_s24, [#allocation21], %s8925_s9, %s8925_s9, %s8924_s19  }
  0xdc   : > { %s7916_s30 = scalar_lea.vmem %s788_s6, 16384  ;;  %p7924_p0 = scmp.lt.s32.totalorder %s788_s6, %s788_s6 }
  0xdd   : > { %p7917_p8 = scmp.ne.s32.totalorder %s788_s6, %s7916_s30  ;;  %p7925_p2 = scmp.lt.s32.totalorder %s7916_s30, %s7916_s30 }
  0xdf   : > { %p7919_p1 = pnand %p7917_p8, %p8921_p3  ;;  %p7926_p9 = por %p7925_p2, %p7924_p0 }
  0xe1   : > { %p7920_p4 = pneg %p7919_p1 }
  0xe3   : > { %p7927_p10 = pnand %p7926_p9, %p7920_p4 }
  0xe5   : > { %7930 = shalt.err (!%p7927_p10)
}
  0xe6   : > { %6909 = dma.hbm_to_vmem [thread:$0]  (!%p8922_p11), %s8847_s21, 16384, %s788_s6, [#allocation24], %s8925_s9, %s8925_s9, %s8924_s19  }
  0xe7   : > { %s6113_s28 = sshll.u32 %s8366_s0, 4  ;;  %s6662_s18 = sshll.u32 %s8079_s2, 8 }
  0xe8   : > { %s8929_s24 = sld [smem:[#allocation42_spill]]  ;;  %s814_s8 = scalar_lea.vmem [#allocation2], %s6113_s28 }
  0xe9   : > { %s822_s29 = sshll.u32 %s814_s8, 4  ;;  %s811_s30 = scalar_lea.sflag [#allocation3], %s8366_s0  ;;  %s823_s29 = int_to_ptr.vmem [resolvable:$true] %s822_s29 }
  0xea   : > { %p8931_p12 = scmp.ne.s32.totalorder %s8920_s22, 0 }
  0xee   : > { %s8930_s1 = smov %s8929_s24  ;;  %s8463_s10 = scalar_lea.hbm %s8929_s24, %s6662_s18 }
  0xef   : > { %s7931_s26 = scalar_lea.hbm %s8463_s10, 256  ;;  %s7936_s6 = scalar_lea.hbm %s8930_s1, 512 }
  0xf0   : > { %p7932_p3 = scmp.ne.s32.totalorder %s8463_s10, %s7931_s26  ;;  %p7937_p11 = scmp.lt.s32.totalorder %s8463_s10, %s8930_s1 }
  0xf1   : > { %p7938_p13 = scmp.lt.s32.totalorder %s7936_s6, %s7931_s26 }
  0xf2   : > { %p7934_p6 = pnand %p7932_p3, %p8931_p12 }
  0xf3   : > { %p7939_p5 = por %p7938_p13, %p7937_p11 }
  0xf4   : > { %p7935_p7 = pneg %p7934_p6 }
  0xf6   : > { %p7940_p8 = pnand %p7939_p5, %p7935_p7 }
  0xf8   : > { %7943 = shalt.err (!%p7940_p8)
}
  0xf9   : > { %s7944_s28 = scalar_lea.vmem %s823_s29, 256  ;;  %s8102_s18 = smov [#allocation2]  }
  0xfa   : > { %p7945_p1 = scmp.ne.s32.totalorder %s823_s29, %s7944_s28  ;;  %s7949_s13 = sshll.u32 %s8102_s18, 4  ;;  %s7950_s13 = int_to_ptr.vmem [resolvable:$false] %s7949_s13 }
  0xfb   : > { %s7951_s24 = scalar_lea.vmem %s7950_s13, 512  ;;  %p7952_p2 = scmp.lt.s32.totalorder %s823_s29, %s7950_s13 }
  0xfc   : > { %p7947_p4 = pnand %p7945_p1, %p8931_p12  ;;  %p7953_p9 = scmp.lt.s32.totalorder %s7951_s24, %s7944_s28 }
  0xfe   : > { %p7948_p0 = pneg %p7947_p4  ;;  %p7954_p10 = por %p7953_p9, %p7952_p2 }
 0x100   : > { %p7955_p3 = pnand %p7954_p10, %p7948_p0 }
 0x102   : > { %7958 = shalt.err (!%p7955_p3)
}
 0x103   : > { %p8932_p6 = scmp.ne.s32.totalorder %s8918_s4, 0  ;;  %s6119_s8 = sshll.u32 %s8079_s2, 4 }
 0x104   : > { %s851_s26 = scalar_lea.vmem [#allocation7], %s8366_s0  ;;  %s8933_s5 = sld [smem:[#allocation44_spill]] }
 0x105   : > { %6913 = dma.hbm_to_vmem [thread:$0]  (!%p8932_p6), %s8463_s10, 256, %s823_s29, %s811_s30  }
 0x106   : > { %s858_s19 = sshll.u32 %s851_s26, 4  ;;  %s859_s19 = int_to_ptr.vmem [resolvable:$true] %s858_s19 }
 0x10a   : > { %s856_s20 = scalar_lea.hbm %s8933_s5, %s6119_s8  ;;  %s7964_s24 = scalar_lea.hbm %s8933_s5, 32 }
 0x10b   : > { %s7959_s18 = scalar_lea.hbm %s856_s20, 16  ;;  %p7965_p5 = scmp.lt.s32.totalorder %s856_s20, %s8933_s5 }
 0x10c   : > { %p7960_p7 = scmp.ne.s32.totalorder %s856_s20, %s7959_s18  ;;  %p7966_p8 = scmp.lt.s32.totalorder %s7964_s24, %s7959_s18 }
 0x10e   : > { %p7962_p11 = pnand %p7960_p7, %p8931_p12  ;;  %p7967_p1 = por %p7966_p8, %p7965_p5 }
 0x110   : > { %p7963_p13 = pneg %p7962_p11 }
 0x112   : > { %p7968_p4 = pnand %p7967_p1, %p7963_p13 }
 0x114   : > { %7971 = shalt.err (!%p7968_p4)
}
 0x115   : > { %s7972_s0 = scalar_lea.vmem %s859_s19, 16  ;;  %s8103_s10 = smov [#allocation7]  }
 0x116   : > { %p7973_p0 = scmp.ne.s32.totalorder %s859_s19, %s7972_s0  ;;  %s7977_s29 = sshll.u32 %s8103_s10, 4  ;;  %s7978_s29 = int_to_ptr.vmem [resolvable:$false] %s7977_s29 }
 0x117   : > { %s7979_s30 = scalar_lea.vmem %s7978_s29, 32  ;;  %p7980_p10 = scmp.lt.s32.totalorder %s859_s19, %s7978_s29 }
 0x118   : > { %p7975_p2 = pnand %p7973_p0, %p8931_p12  ;;  %p7981_p3 = scmp.lt.s32.totalorder %s7979_s30, %s7972_s0 }
 0x11a   : > { %p7976_p9 = pneg %p7975_p2  ;;  %p7982_p7 = por %p7981_p3, %p7980_p10 }
 0x11c   : > { %p7983_p11 = pnand %p7982_p7, %p7976_p9 }
 0x11e   : > { %7986 = shalt.err (!%p7983_p11)
}
 0x11f   : > { %6919 = dma.hbm_to_vmem [thread:$0]  (!%p8932_p6), %s856_s20, 16, %s859_s19, %s8386_s27  }
 0x120   : > { %p8934_p13 = scmp.ne.s32.totalorder %s8902_s3, 0 }
 0x121   : > { %s8503_s11 = sand.u32 (!%p8934_p13), 1, %s8071_s23   ;;  %p8935_p12 = scmp.ne.s32.totalorder (!%p8934_p13), %s8913_s25, 0 }
 0x122   : > { %867 = sbr.rel (%p8934_p13) target bundleno = 4119 (0x1017), region = 120  ;;  %s6121_s22 = sshll.u32 (!%p8934_p13), %s8503_s11, 4 }
 0x123   : > { %s870_s1 = scalar_lea.sflag (!%p8934_p13), [#allocation3], %s8503_s11  ;;  %s8509_s8 = scalar_lea.vmem (!%p8934_p13), [#allocation2], %s6121_s22 }
 0x127   : > { %8030 = dma.done.wait (%p8935_p12), %s870_s1, 256  }
 0x128   : > { %8032 = vsyncadd (%p8935_p12), %s870_s1, 4294967040  ;;  %s878_s3 = sand.u32 1, %s8259_s7   ;;  %s6122_s27 = sshll.u32 %s8503_s11, 3 }
 0x129   : > { %s879_s4 = scalar_lea.sflag [#allocation6], %s878_s3  ;;  %s8517_s26 = scalar_lea.vmem [#allocation5], %s6122_s27 }
 0x12a   : > { %8034 = dma.done.wait (%p8935_p12), %s879_s4, 144  }
 0x12b   : > { %8036 = vsyncadd (%p8935_p12), %s879_s4, 4294967152  ;;  %s890_s19 = scalar_lea.vmem [#allocation7], %s8503_s11  ;;  %p8936_p6 = scmp.eq.s32.totalorder %s8259_s7, 0 }
 0x12d   : > { %8038 = dma.done.wait (%p8936_p6), [#allocation9], 64   ;;  %p8937_p5 = pmov %p8936_p6 }
 0x12f   : > { %8040 = vsyncadd (%p8937_p5), [#allocation9], 4294967232  ;;  %p8938_p8 = pmov %p8937_p5 }
 0x130   : > { %p8939_p1 = pmov %p8937_p5 }
 0x131   : > { %8042 = dma.done.wait (%p8938_p8), [#allocation12], 16384  }
 0x132   : > { %8044 = vsyncadd (%p8939_p1), [#allocation12], 4294950912  ;;  %p8940_p4 = pmov %p8939_p1 }
 0x133   : > { %p8941_p0 = pmov %p8939_p1 }
 0x134   : > { %8046 = dma.done.wait (%p8940_p4), [#allocation15], 64  }
 0x135   : > { %8048 = vsyncadd (%p8941_p0), [#allocation15], 4294967232  ;;  %p8942_p2 = pmov %p8941_p0 }
 0x136   : > { %p8943_p9 = pmov %p8941_p0 }
 0x137   : > { %8050 = dma.done.wait (%p8942_p2), [#allocation18], 4128  }
 0x138   : > { %8052 = vsyncadd (%p8943_p9), [#allocation18], 4294963168  ;;  %p8944_p10 = pmov %p8941_p0 }
 0x139   : > { %p8945_p3 = pmov %p8941_p0 }
 0x13a   : > { %8054 = dma.done.wait (%p8944_p10), [#allocation21], 12288  }
 0x13b   : > { %8056 = vsyncadd (%p8945_p3), [#allocation21], 4294955008  ;;  %p8946_p7 = pmov %p8941_p0 }
 0x13c   : > { %p8947_p11 = pmov %p8941_p0 }
 0x13d   : > { %8058 = dma.done.wait (%p8946_p7), [#allocation24], 32768  }
 0x13e   : > { %8060 = vsyncadd (%p8947_p11), [#allocation24], 4294934528  ;;  %v1015_v0 = vld [vmem:[%s8509_s8] sm:$0xff]  ;;  %v1016_v1 = vld [vmem:[%s8509_s8 + $0x8] sm:$0xff]  ;;  %v1019_v63 = vlaneseq  ;;  %vm8105_vm0 = vmmov 0   ;;  %s8948_s6 = sld [smem:[#allocation48_spill]] }
 0x13f   : > { %v1027_v2 = vadd.f32 %v1016_v1, %v1015_v0  ;;  %v7005_v3 = vld [vmem:[#allocation11 + $0xac] ss:$12 sps:$4 sm:$0xff]   ;;  %v7007_v4 = vld [vmem:[#allocation11 + $0xa8] ss:$12 sps:$4 sm:$0xff]   ;;  %v7010_v6 = vld [vmem:[#allocation11 + $0x90] ss:$12 sps:$4 sm:$0xff]  }
 0x140   : > { %v7008_v5 = vld [vmem:[#allocation11 + $0x94] ss:$12 sps:$4 sm:$0xff]   ;;  %1523 = vmatprep.subr.bf16.mxu0 %v7005_v3  ;;  %v7011_v7 = vld [vmem:[#allocation11 + $0x7c] ss:$12 sps:$4 sm:$0xff]   ;;  %v7013_v9 = vld [vmem:[#allocation11 + $0x78] ss:$12 sps:$4 sm:$0xff]  }
 0x141   : > { %1028 = vadd.xlane.f32.xlu0 %v1027_v2  ;;  %1524 = vmatpush1.bf16.msra.mxu0 %v7007_v4  ;;  %v7031_v8 = vld [vmem:[#allocation11 + $0x170] ss:$12 sps:$4 sm:$0xff]   ;;  %v7036_v12 = vld [vmem:[#allocation11 + $0x158] ss:$12 sps:$4 sm:$0xff]   ;;  %v7016_v14 = vld [vmem:[#allocation11 + $0x60] ss:$12 sps:$4 sm:$0xff]  }
 0x142   : > { %1525 = vmatprep.subr.bf16.mxu0 %v7008_v5  ;;  %v7033_v10 = vld [vmem:[#allocation11 + $0xb0] ss:$12 sps:$4 sm:$0xff]   ;;  %6665 = vmatprep.subr.bf16.mxu1 %v7031_v8  ;;  %v7038_v13 = vld [vmem:[#allocation11 + $0x98] ss:$12 sps:$4 sm:$0xff]   ;;  %v7019_v16 = vld [vmem:[#allocation11 + $0x48] ss:$12 sps:$4 sm:$0xff]  }
 0x143   : > { %v7014_v11 = vld [vmem:[#allocation11 + $0x64] ss:$12 sps:$4 sm:$0xff]   ;;  %6666 = vmatpush3.bf16.msra.mxu1 %v7033_v10  ;;  %v7017_v15 = vld [vmem:[#allocation11 + $0x4c] ss:$12 sps:$4 sm:$0xff]   ;;  %v7020_v17 = vld [vmem:[#allocation11 + $0x34] ss:$12 sps:$4 sm:$0xff]  }
 0x144   : > { %6667 = vmatprep.subr.bf16.mxu1 %v7036_v12  ;;  %v7022_v18 = vld [vmem:[#allocation11 + $0x30] ss:$12 sps:$4 sm:$0xff]   ;;  %v7025_v20 = vld [vmem:[#allocation11 + $0x18] ss:$12 sps:$4 sm:$0xff]   ;;  %v7028_v22 = vld [vmem:[#allocation11] ss:$12 sps:$4 sm:$0xff]  }
 0x145   : > { %1526 = vmatpush1.bf16.msra.mxu0 %v7010_v6  ;;  %v7023_v19 = vld [vmem:[#allocation11 + $0x1c] ss:$12 sps:$4 sm:$0xff]   ;;  %v7026_v21 = vld [vmem:[#allocation11 + $0x4] ss:$12 sps:$4 sm:$0xff]   ;;  %v7029_v23 = vld [vmem:[#allocation11 + $0x16c] ss:$12 sps:$4 sm:$0xff]  }
 0x146   : > { %1527 = vmatprep.subr.bf16.mxu0 %v7011_v7  ;;  %v7032_v24 = vld [vmem:[#allocation11 + $0x168] ss:$12 sps:$4 sm:$0xff]   ;;  %v7037_v26 = vld [vmem:[#allocation11 + $0x150] ss:$12 sps:$4 sm:$0xff]   ;;  %v7041_v35 = vld [vmem:[#allocation11 + $0x140] ss:$12 sps:$4 sm:$0xff]  }
 0x147   : > { %6668 = vmatpush3.bf16.msra.mxu1 %v7038_v13  ;;  %v7034_v25 = vld [vmem:[#allocation11 + $0x154] ss:$12 sps:$4 sm:$0xff]   ;;  %v7039_v34 = vld [vmem:[#allocation11 + $0x13c] ss:$12 sps:$4 sm:$0xff]   ;;  %v7042_v36 = vld [vmem:[#allocation11 + $0x138] ss:$12 sps:$4 sm:$0xff]  }
 0x148   : > { %v7043_v37 = vld [vmem:[#allocation11 + $0x80] ss:$12 sps:$4 sm:$0xff]   ;;  %6669 = vmatprep.subr.bf16.mxu1 %v7041_v35  ;;  %v7044_v38 = vld [vmem:[#allocation11 + $0x124] ss:$12 sps:$4 sm:$0xff]   ;;  %v7046_v39 = vld [vmem:[#allocation11 + $0x128] ss:$12 sps:$4 sm:$0xff]  }
 0x149   : > { %1528 = vmatpush1.bf16.msra.mxu0 %v7013_v9  ;;  %v7047_v40 = vld [vmem:[#allocation11 + $0x120] ss:$12 sps:$4 sm:$0xff]   ;;  %v7048_v41 = vld [vmem:[#allocation11 + $0x68] ss:$12 sps:$4 sm:$0xff]   ;;  %v7051_v43 = vld [vmem:[#allocation11 + $0x110] ss:$12 sps:$4 sm:$0xff]  }
 0x14a   : > { %1529 = vmatprep.subr.bf16.mxu0 %v7014_v11  ;;  %v7049_v42 = vld [vmem:[#allocation11 + $0x10c] ss:$12 sps:$4 sm:$0xff]   ;;  %v7052_v44 = vld [vmem:[#allocation11 + $0x108] ss:$12 sps:$4 sm:$0xff]   ;;  %v7053_v45 = vld [vmem:[#allocation11 + $0x50] ss:$12 sps:$4 sm:$0xff]  }
 0x14b   : > { %6670 = vmatpush3.bf16.msra.mxu1 %v7043_v37  ;;  %v7054_v46 = vld [vmem:[#allocation11 + $0xf4] ss:$12 sps:$4 sm:$0xff]   ;;  %v7056_v47 = vld [vmem:[#allocation11 + $0xf8] ss:$12 sps:$4 sm:$0xff]   ;;  %v7057_v48 = vld [vmem:[#allocation11 + $0xf0] ss:$12 sps:$4 sm:$0xff]  }
 0x14c   : > { %6671 = vmatprep.subr.bf16.mxu1 %v7046_v39  ;;  %v7058_v49 = vld [vmem:[#allocation11 + $0x38] ss:$12 sps:$4 sm:$0xff]   ;;  %v7059_v50 = vld [vmem:[#allocation11 + $0xdc] ss:$12 sps:$4 sm:$0xff]   ;;  %v7061_v51 = vld [vmem:[#allocation11 + $0xe0] ss:$12 sps:$4 sm:$0xff]  }
 0x14d   : > { %1530 = vmatpush1.bf16.msra.mxu0 %v7016_v14  ;;  %v7062_v52 = vld [vmem:[#allocation11 + $0xd8] ss:$12 sps:$4 sm:$0xff]   ;;  %v7063_v53 = vld [vmem:[#allocation11 + $0x20] ss:$12 sps:$4 sm:$0xff]   ;;  %v7066_v55 = vld [vmem:[#allocation11 + $0xc8] ss:$12 sps:$4 sm:$0xff]  }
 0x14e   : > { %1531 = vmatprep.subr.bf16.mxu0 %v7017_v15  ;;  %v7064_v54 = vld [vmem:[#allocation11 + $0xc4] ss:$12 sps:$4 sm:$0xff]   ;;  %v7067_v56 = vld [vmem:[#allocation11 + $0xc0] ss:$12 sps:$4 sm:$0xff]   ;;  %v7068_v57 = vld [vmem:[#allocation11 + $0x8] ss:$12 sps:$4 sm:$0xff]  }
 0x14f   : > { %6672 = vmatpush3.bf16.msra.mxu1 %v7048_v41  ;;  %v7071_v58 = vld [vmem:[#allocation11 + $0x22c] ss:$12 sps:$4 sm:$0xff]   ;;  %v7072_v59 = vld [vmem:[#allocation11 + $0x2f0] ss:$12 sps:$4 sm:$0xff]   ;;  %vm2059_vm1 = vcmask 1043456   ;;  %vm2031_vm3 = vcmask 64512  }
 0x150   : > { %6673 = vmatprep.subr.bf16.mxu1 %v7051_v43  ;;  %v1025_v3 = vld [vmem:[#allocation8] sm:$0x3]  ;;  %v1026_v4 = vld [vmem:[#allocation10] sm:$0x3]  ;;  %v7097_v37 = vld [vmem:[#allocation11 + $0x278] ss:$12 sps:$4 sm:$0xff]  }
 0x151   : > { %1532 = vmatpush1.bf16.msra.mxu0 %v7019_v16  ;;  %v7093_v35 = vld [vmem:[#allocation11 + $0x1d0] ss:$12 sps:$4 sm:$0xff]   ;;  %v7098_v39 = vld [vmem:[#allocation11 + $0x1b8] ss:$12 sps:$4 sm:$0xff]   ;;  %v7102_v41 = vld [vmem:[#allocation11 + $0x260] ss:$12 sps:$4 sm:$0xff]  }
 0x152   : > { %1533 = vmatprep.subr.bf16.mxu0 %v7020_v17  ;;  %v7069_v17 = vld [vmem:[#allocation11 + $0x228] ss:$12 sps:$4 sm:$0xff]   ;;  %v7103_v43 = vld [vmem:[#allocation11 + $0x1a0] ss:$12 sps:$4 sm:$0xff]   ;;  %s8949_s25 = sld [smem:[#allocation55_spill]]  ;;  %s6664_s10 = sshll.u32 %s8259_s7, 8 }
 0x153   : > { %6674 = vmatpush3.bf16.msra.mxu1 %v7053_v45  ;;  %v7107_v45 = vld [vmem:[#allocation11 + $0x248] ss:$12 sps:$4 sm:$0xff]   ;;  %s8950_s18 = sld [smem:[#allocation57_spill]]  ;;  %s1013_s29 = scalar_lea.vmem [#allocation26], %s6121_s22 }
 0x154   : > { %6675 = vmatprep.subr.bf16.mxu1 %v7056_v47  ;;  %v7108_v47 = vld [vmem:[#allocation11 + $0x188] ss:$12 sps:$4 sm:$0xff]   ;;  %s8951_s24 = sld [smem:[#allocation58_spill]]  ;;  %s5874_s30 = sshll.u32 %s1013_s29, 4  ;;  %s5875_s30 = int_to_ptr.vmem [resolvable:$true] %s5874_s30 }
 0x155   : > { %1534 = vmatpush1.bf16.msra.mxu0 %v7022_v18  ;;  %s8952_s0 = sld [smem:[#allocation40_spill]]  ;;  %s5860_s4 = scalar_lea.sflag [#allocation4], %s8503_s11 }
 0x156   : > { %1535 = vmatprep.subr.bf16.mxu0 %v7023_v19  ;;  %v7073_v19 = vld [vmem:[#allocation11 + $0x230] ss:$12 sps:$4 sm:$0xff]   ;;  %s8953_s3 = sld [smem:[#allocation59_spill]]  ;;  %s8107_s7 = smov [#allocation26]  }
 0x157   : > { %6676 = vmatpush3.bf16.msra.mxu1 %v7058_v49  ;;  %v7109_v49 = vld [vmem:[#allocation11 + $0x2e8] ss:$12 sps:$4 sm:$0xff]   ;;  %s7991_s22 = sshll.u32 %s8107_s7, 4  ;;  %s7992_s22 = int_to_ptr.vmem [resolvable:$false] %s7991_s22 }
 0x158   : > { %6677 = vmatprep.subr.bf16.mxu1 %v7061_v51  ;;  %v7112_v51 = vld [vmem:[#allocation11 + $0x2d0] ss:$12 sps:$4 sm:$0xff]   ;;  %p7994_p8 = scmp.lt.s32.totalorder %s5875_s30, %s7992_s22 }
 0x159   : > { %1536 = vmatpush1.bf16.msra.mxu0 %v7025_v20  ;;  %v7076_v20 = vld [vmem:[#allocation11 + $0x214] ss:$12 sps:$4 sm:$0xff]  }
 0x15a   : > { %1537 = vmatprep.subr.bf16.mxu0 %v7026_v21  ;;  %v7077_v21 = vld [vmem:[#allocation11 + $0x2d8] ss:$12 sps:$4 sm:$0xff]  }
 0x15b   : > { %6678 = vmatpush3.bf16.msra.mxu1 %v7063_v53  ;;  %v7115_v53 = vld [vmem:[#allocation11 + $0x2b8] ss:$12 sps:$4 sm:$0xff]   ;;  %p8954_p12 = scmp.ne.s32.totalorder %s8952_s0, 0 }
 0x15c   : > { %6679 = vmatprep.subr.bf16.mxu1 %v7066_v55  ;;  %v7118_v55 = vld [vmem:[#allocation11 + $0x2a0] ss:$12 sps:$4 sm:$0xff]   ;;  %s5872_s27 = scalar_lea.hbm %s8953_s3, %s6664_s10 }
 0x15d   : > { %1538 = vmatpush1.bf16.msra.mxu0 %v7028_v22  ;;  %v7074_v22 = vld [vmem:[#allocation11 + $0x210] ss:$12 sps:$4 sm:$0xff]  }
 0x15e   : > { %1539 = vmatprep.subr.bf16.mxu0 %v7029_v23  ;;  %v7078_v23 = vld [vmem:[#allocation11 + $0x218] ss:$12 sps:$4 sm:$0xff]  }
 0x15f   : > { %6680 = vmatpush3.bf16.msra.mxu1 %v7068_v57  ;;  %v7121_v57 = vld [vmem:[#allocation11 + $0x288] ss:$12 sps:$4 sm:$0xff]  }
 0x160   : > { %1860 = vmatprep.subr.bf16.mxu1 %v7071_v58  ;;  %v7126_v58 = vld [vmem:[#allocation11 + $0x274] ss:$12 sps:$4 sm:$0xff]  }
 0x161   : > { %1540 = vmatpush2.bf16.msra.mxu0 %v7032_v24  ;;  %v7081_v24 = vld [vmem:[#allocation11 + $0x1fc] ss:$12 sps:$4 sm:$0xff]  }
 0x162   : > { %1541 = vmatprep.subr.bf16.mxu0 %v7034_v25  ;;  %v7082_v25 = vld [vmem:[#allocation11 + $0x2c0] ss:$12 sps:$4 sm:$0xff]  }
 0x165   : > { %1542 = vmatpush2.bf16.msra.mxu0 %v7037_v26  ;;  %v7079_v26 = vld [vmem:[#allocation11 + $0x1f8] ss:$12 sps:$4 sm:$0xff]  }
 0x166   : > { %1543 = vmatprep.subr.bf16.mxu0 %v7039_v34  ;;  %v7089_v34 = vld [vmem:[#allocation11 + $0x1c8] ss:$12 sps:$4 sm:$0xff]  }
 0x169   : > { %1544 = vmatpush2.bf16.msra.mxu0 %v7042_v36  ;;  %v7096_v36 = vld [vmem:[#allocation11 + $0x1b4] ss:$12 sps:$4 sm:$0xff]  }
 0x16a   : > { %1545 = vmatprep.subr.bf16.mxu0 %v7044_v38  ;;  %v7094_v38 = vld [vmem:[#allocation11 + $0x1b0] ss:$12 sps:$4 sm:$0xff]  }
 0x16d   : > { %1546 = vmatpush2.bf16.msra.mxu0 %v7047_v40  ;;  %v7101_v40 = vld [vmem:[#allocation11 + $0x19c] ss:$12 sps:$4 sm:$0xff]  }
 0x16e   : > { %1547 = vmatprep.subr.bf16.mxu0 %v7049_v42  ;;  %v7099_v42 = vld [vmem:[#allocation11 + $0x198] ss:$12 sps:$4 sm:$0xff]  }
 0x171   : > { %1548 = vmatpush2.bf16.msra.mxu0 %v7052_v44  ;;  %v7106_v44 = vld [vmem:[#allocation11 + $0x184] ss:$12 sps:$4 sm:$0xff]  }
 0x172   : > { %1549 = vmatprep.subr.bf16.mxu0 %v7054_v46  ;;  %v7104_v46 = vld [vmem:[#allocation11 + $0x180] ss:$12 sps:$4 sm:$0xff]  }
 0x175   : > { %1550 = vmatpush2.bf16.msra.mxu0 %v7057_v48  ;;  %v7111_v48 = vld [vmem:[#allocation11 + $0x2ec] ss:$12 sps:$4 sm:$0xff]  }
 0x176   : > { %1551 = vmatprep.subr.bf16.mxu0 %v7059_v50  ;;  %v7114_v50 = vld [vmem:[#allocation11 + $0x2d4] ss:$12 sps:$4 sm:$0xff]  }
 0x179   : > { %1552 = vmatpush2.bf16.msra.mxu0 %v7062_v52  ;;  %v7117_v52 = vld [vmem:[#allocation11 + $0x2bc] ss:$12 sps:$4 sm:$0xff]  }
 0x17a   : > { %1553 = vmatprep.subr.bf16.mxu0 %v7064_v54  ;;  %v7120_v54 = vld [vmem:[#allocation11 + $0x2a4] ss:$12 sps:$4 sm:$0xff]  }
 0x17d   : > { %1554 = vmatpush2.bf16.msra.mxu0 %v7067_v56  ;;  %v7123_v56 = vld [vmem:[#allocation11 + $0x28c] ss:$12 sps:$4 sm:$0xff]  }
 0x17e   : > { %6687 = vmatprep.subr.bf16.mxu0 %v7072_v59  ;;  %v7124_v59 = vld [vmem:[#allocation11 + $0x270] ss:$12 sps:$4 sm:$0xff]  }
 0x1ca   : > { %v1029_v27 = vpop.xlane.xlu0 %1028 }
 0x1cb   : > { %v1031_v28 = vmul.f32 0.00390625, %v1029_v27  ;;  %v7083_v27 = vld [vmem:[#allocation11 + $0x200] ss:$12 sps:$4 sm:$0xff]  }
 0x1cd   : > { %v8550_v29 = vsub.f32 %v1015_v0, %v1031_v28  ;;  %v8552_v30 = vsub.f32 %v1016_v1, %v1031_v28  ;;  %v8559_v0 = vshrl.u32 %v1019_v63, 7  ;;  %v7086_v28 = vld [vmem:[#allocation11 + $0x1e4] ss:$12 sps:$4 sm:$0xff]  }
 0x1cf   : > { %v1034_v31 = vmul.f32 %v8550_v29, %v8550_v29  ;;  %v1035_v32 = vmul.f32 %v8552_v30, %v8552_v30  ;;  %v8562_v1 = vsub.s32 1, %v8559_v0  ;;  %v8565_v2 = vsub.s32 0, %v8559_v0 }
 0x1d1   : > { %v1036_v33 = vadd.f32 %v1035_v32, %v1034_v31  ;;  %v1052_v5 = vrot.slane %v1025_v3, %v8562_v1  ;;  %v1048_v6 = vrot.slane %v1025_v3, %v8565_v2  ;;  %v1065_v9 = vrot.slane %v1026_v4, %v8562_v1  ;;  %v7088_v31 = vld [vmem:[#allocation11 + $0x1e8] ss:$12 sps:$4 sm:$0xff]   ;;  %v7091_v32 = vld [vmem:[#allocation11 + $0x1cc] ss:$12 sps:$4 sm:$0xff]  }
 0x1d2   : > { %v1061_v11 = vrot.slane %v1026_v4, %v8565_v2  ;;  %v7130_v3 = vld [vmem:[#allocation11 + $0x240] ss:$12 sps:$4 sm:$0xff]   ;;  %v8104_v4 = vmov 0.0  }
 0x1d3   : > { %1037 = vadd.xlane.f32.xlu0 %v1036_v33  ;;  %v7092_v33 = vld [vmem:[#allocation11 + $0x290] ss:$12 sps:$4 sm:$0xff]  }
 0x25c   : > { %v1038_v60 = vpop.xlane.xlu0 %1037 }
 0x25d   : > { %v1039_v61 = vmul.f32 0.00390625, %v1038_v60  ;;  %v7129_v60 = vld [vmem:[#allocation11 + $0x25c] ss:$12 sps:$4 sm:$0xff]  }
 0x25f   : > { %v1040_v62 = vadd.f32 1e-05, %v1039_v61  ;;  %v7127_v61 = vld [vmem:[#allocation11 + $0x258] ss:$12 sps:$4 sm:$0xff]  }
 0x261   : > { %7551 = vrsqrt.f32 %v1040_v62  ;;  %v7132_v62 = vld [vmem:[#allocation11 + $0x244] ss:$12 sps:$4 sm:$0xff]  }
 0x26e   : > { %v7552_v7 = vpop.eup %7551 }
 0x26f   : > { %v1043_v8 = vmul.f32 %v7552_v7, %v8552_v30  ;;  %v1042_v10 = vmul.f32 %v7552_v7, %v8550_v29  ;;  %v7087_v29 = vld [vmem:[#allocation11 + $0x2a8] ss:$12 sps:$4 sm:$0xff]   ;;  %v7084_v30 = vld [vmem:[#allocation11 + $0x1e0] ss:$12 sps:$4 sm:$0xff]  }
 0x271   : > { %v1056_v12 = vmul.f32 %v1052_v5, %v1043_v8  ;;  %v1055_v13 = vmul.f32 %v1048_v6, %v1042_v10  ;;  %v1198_v5 = vld [vmem:[%s8948_s6] sm:$0x7]  ;;  %v8589_v6 = vsub.s32 2, %v8559_v0 }
 0x272   : > { %v1244_v7 = vrot.slane %v1198_v5, %v8562_v1 }
 0x273   : > { %v1069_v14 = vadd.f32 %v1065_v9, %v1056_v12  ;;  %v1068_v15 = vadd.f32 %v1061_v11, %v1055_v13  ;;  %v1248_v11 = vrot.slane %v1198_v5, %v8589_v6 }
 0x275   : > { %v1234_v16 = vpack.c.bf16 %v1069_v14, %v1069_v14  ;;  %v8573_v18 = vpack.c.bf16 %v1068_v15, %v1068_v15  ;;  %v1240_v15 = vrot.slane %v1198_v5, %v8565_v2 }
 0x277   : > { %1555 = vmatprep.mubr.bf16.mxu0 %v1234_v16  ;;  %1596 = vmatprep.mubr.bf16.mxu1 %v1234_v16 }
 0x278   : > { %1556 = vmatmul.mubr.bf16.vlgmr.msra.gmra.mxu0 %v8573_v18  ;;  %1597 = vmatmul.mubr.bf16.vlgmr.msra.gmra.mxu1 %v8573_v18 }
 0x279   : > { %1861 = vmatpush1.bf16.msra.mxu1 %v7069_v17  ;;  %6688 = vmatpush3.bf16.msra.mxu0 %v7073_v19 }
 0x27a   : > { %1892 = vmatprep.mubr.bf16.mxu1 %v1234_v16  ;;  %1933 = vmatprep.mubr.bf16.mxu0 %v1234_v16 }
 0x27b   : > { %1862 = vmatprep.subr.bf16.mxu1 %v7076_v20  ;;  %6689 = vmatprep.subr.bf16.mxu0 %v7077_v21 }
 0x27d   : > { %1863 = vmatpush1.bf16.msra.mxu1 %v7074_v22  ;;  %6690 = vmatpush3.bf16.msra.mxu0 %v7078_v23 }
 0x27e   : > { %1864 = vmatprep.subr.bf16.mxu1 %v7081_v24  ;;  %6691 = vmatprep.subr.bf16.mxu0 %v7082_v25 }
 0x281   : > { %1865 = vmatpush1.bf16.msra.mxu1 %v7079_v26  ;;  %6692 = vmatpush3.bf16.msra.mxu0 %v7083_v27 }
 0x282   : > { %1866 = vmatprep.subr.bf16.mxu1 %v7086_v28  ;;  %6693 = vmatprep.subr.bf16.mxu0 %v7087_v29 }
 0x285   : > { %1867 = vmatpush1.bf16.msra.mxu1 %v7084_v30  ;;  %6694 = vmatpush3.bf16.msra.mxu0 %v7088_v31  ;;  %v1199_v30 = vld [vmem:[%s8948_s6 + $0x3] sm:$0x7] }
 0x286   : > { %1868 = vmatprep.subr.bf16.mxu1 %v7091_v32  ;;  %6695 = vmatprep.subr.bf16.mxu0 %v7092_v33  ;;  %v1256_v31 = vrot.slane %v1199_v30, %v8562_v1  ;;  %v1260_v33 = vrot.slane %v1199_v30, %v8589_v6 }
 0x289   : > { %1869 = vmatpush1.bf16.msra.mxu1 %v7089_v34  ;;  %6696 = vmatpush3.bf16.msra.mxu0 %v7093_v35 }
 0x28a   : > { %1870 = vmatprep.subr.bf16.mxu1 %v7096_v36  ;;  %6697 = vmatprep.subr.bf16.mxu0 %v7097_v37  ;;  %v1252_v37 = vrot.slane %v1199_v30, %v8565_v2  ;;  %v7151_v30 = vld [vmem:[#allocation13 + $0x10] ss:$8 sps:$4 sm:$0xff]  }
 0x28d   : > { %1871 = vmatpush1.bf16.msra.mxu1 %v7094_v38  ;;  %6698 = vmatpush3.bf16.msra.mxu0 %v7098_v39 }
 0x28e   : > { %1872 = vmatprep.subr.bf16.mxu1 %v7101_v40  ;;  %6699 = vmatprep.subr.bf16.mxu0 %v7102_v41 }
 0x291   : > { %1873 = vmatpush1.bf16.msra.mxu1 %v7099_v42  ;;  %6700 = vmatpush3.bf16.msra.mxu0 %v7103_v43 }
 0x292   : > { %1874 = vmatprep.subr.bf16.mxu1 %v7106_v44  ;;  %6701 = vmatprep.subr.bf16.mxu0 %v7107_v45 }
 0x295   : > { %1875 = vmatpush1.bf16.msra.mxu1 %v7104_v46  ;;  %6702 = vmatpush3.bf16.msra.mxu0 %v7108_v47  ;;  %v1022_v46 = vand.u32 127, %v1019_v63 }
 0x296   : > { %1876 = vmatprep.subr.bf16.mxu1 %v7111_v48  ;;  %6769 = vmatprep.subr.bf16.mxu0 %v8104_v4 }
 0x297   : > { %vm1023_vm2 = vcmp.gt.s32.totalorder %v1022_v46, %v8559_v0  ;;  %v7171_v46 = vld [vmem:[#allocation13 + $0xb4] ss:$8 sps:$4 sm:$0xff]  }
 0x298   : > { %1934 = vmatmul.mubr.bf16.vlgmr.msra.gmra.mxu0 %v8573_v18  ;;  %v1024_v48 = vsel %vm1023_vm2, -1e+09, %v8104_v4 }
 0x299   : > { %1877 = vmatpush2.bf16.msra.mxu1 %v7109_v49  ;;  %6771 = vmatprep.mubr.msk.bf16.mxu0 %vm8105_vm0, %v8104_v4 }
 0x29a   : > { %1878 = vmatprep.subr.bf16.mxu1 %v7114_v50 }
 0x29d   : > { %1879 = vmatpush2.bf16.msra.mxu1 %v7112_v51 }
 0x29e   : > { %1880 = vmatprep.subr.bf16.mxu1 %v7117_v52 }
 0x2a1   : > { %1881 = vmatpush2.bf16.msra.mxu1 %v7115_v53 }
 0x2a2   : > { %1882 = vmatprep.subr.bf16.mxu1 %v7120_v54 }
 0x2a5   : > { %1883 = vmatpush2.bf16.msra.mxu1 %v7118_v55 }
 0x2a6   : > { %1884 = vmatprep.subr.bf16.mxu1 %v7123_v56 }
 0x2a9   : > { %1885 = vmatpush2.bf16.msra.mxu1 %v7121_v57 }
 0x2aa   : > { %1886 = vmatprep.subr.bf16.mxu1 %v7126_v58 }
 0x2ad   : > { %1887 = vmatpush2.bf16.msra.mxu1 %v7124_v59 }
 0x2ae   : > { %1888 = vmatprep.subr.bf16.mxu1 %v7129_v60 }
 0x2b1   : > { %1889 = vmatpush2.bf16.msra.mxu1 %v7127_v61 }
 0x2b2   : > { %1890 = vmatprep.subr.bf16.mxu1 %v7132_v62 }
 0x2b5   : > { %1891 = vmatpush2.bf16.msra.mxu1 %v7130_v3 }
 0x2b6   : > { %6775 = vmatprep.subr.bf16.mxu1 %v8104_v4 }
 0x2b8   : > { %1893 = vmatmul.mubr.bf16.vlgmr.msra.gmra.mxu1 %v8573_v18 }
 0x2b9   : > { %6777 = vmatprep.mubr.msk.bf16.mxu1 %vm8105_vm0, %v8104_v4 }
 0x338   : > { %v1557_v8 = vpop.f32.mrf.mxu0  ;;  %v6681_v9 = vpop.f32.mrf.mxu1 }
 0x339   : > { %v1558_v22 = vadd.f32 %v1557_v8, %v1240_v15 }
 0x33a   : > { %v1559_v10 = vpop.f32.mrf.mxu0  ;;  %v6682_v12 = vpop.f32.mrf.mxu1 }
 0x33b   : > { %v1560_v13 = vadd.f32 %v1559_v10, %v1244_v7  ;;  %v6683_v14 = vadd.f32 %v6682_v12, %v6681_v9  ;;  %v1941_v24 = vpack.c.bf16 %v1558_v22, %v1558_v22  ;;  %v7139_v22 = vld [vmem:[#allocation13 + $0x50] ss:$8 sps:$4 sm:$0xff]  }
 0x33c   : > { %v1561_v16 = vpop.f32.mrf.mxu0  ;;  %v6684_v17 = vpop.f32.mrf.mxu1 }
 0x33d   : > { %v1943_v18 = vpack.c.bf16 %v1560_v13, %v1560_v13  ;;  %v1599_v19 = vadd.f32 %v6683_v14, %v1248_v11  ;;  %v7135_v13 = vld [vmem:[#allocation13 + $0x74] ss:$8 sps:$4 sm:$0xff]   ;;  %v7133_v17 = vld [vmem:[#allocation13 + $0x70] ss:$8 sps:$4 sm:$0xff]  }
 0x33e   : > { %v1562_v20 = vpop.f32.mrf.mxu0  ;;  %v6685_v21 = vpop.f32.mrf.mxu1 }
 0x33f   : > { %6770 = vmatpush3.bf16.xpose.msra.mxu0 %v1943_v18  ;;  %v1945_v23 = vpack.c.bf16 %v1599_v19, %v1599_v19  ;;  %v7138_v19 = vld [vmem:[#allocation13 + $0x64] ss:$8 sps:$4 sm:$0xff]   ;;  %v7136_v20 = vld [vmem:[#allocation13 + $0x60] ss:$8 sps:$4 sm:$0xff]   ;;  %v7141_v21 = vld [vmem:[#allocation13 + $0x54] ss:$8 sps:$4 sm:$0xff]  }
 0x340   : > { %6781 = vmatprep.subr.bf16.mxu0 %v8104_v4 }
 0x341   : > { %v2061_v25 = vsel %vm2059_vm1, %v1945_v23, 0  ;;  %v7144_v23 = vld [vmem:[#allocation13 + $0x44] ss:$8 sps:$4 sm:$0xff]  }
 0x346   : > { %6772 = vmatmul.mubr.bf16.vlgmr.msra.gmra.mxu0 %v1941_v24  ;;  %v7142_v24 = vld [vmem:[#allocation13 + $0x40] ss:$8 sps:$4 sm:$0xff]  }
 0x347   : > { %6782 = vmatpush3.bf16.msra.mxu0 %v2061_v25  ;;  %6783 = vmatprep.mubr.msk.bf16.mxu0 %vm8105_vm0, %v8104_v4  ;;  %v7147_v25 = vld [vmem:[#allocation13 + $0x34] ss:$8 sps:$4 sm:$0xff]  }
 0x348   : > { %2231 = vmatprep.subr.bf16.mxu0 %v7135_v13 }
 0x358   : > { %v6703_v26 = vpop.f32.mrf.mxu0 }
 0x35a   : > { %v6704_v27 = vpop.f32.mrf.mxu0 }
 0x35b   : > { %v6705_v34 = vadd.f32 %v6704_v27, %v6703_v26  ;;  %v7145_v26 = vld [vmem:[#allocation13 + $0x30] ss:$8 sps:$4 sm:$0xff]   ;;  %v7150_v27 = vld [vmem:[#allocation13 + $0x24] ss:$8 sps:$4 sm:$0xff]  }
 0x35c   : > { %v6706_v28 = vpop.f32.mrf.mxu0 }
 0x35d   : > { %v1936_v40 = vadd.f32 %v6705_v34, %v1260_v33  ;;  %v7148_v28 = vld [vmem:[#allocation13 + $0x20] ss:$8 sps:$4 sm:$0xff]  }
 0x35e   : > { %v6707_v29 = vpop.f32.mrf.mxu0 }
 0x35f   : > { %v1946_v43 = vpack.c.bf16 %v1936_v40, %v1936_v40  ;;  %v7153_v29 = vld [vmem:[#allocation13 + $0x14] ss:$8 sps:$4 sm:$0xff]   ;;  %v7162_v40 = vld [vmem:[#allocation13 + $0xe4] ss:$8 sps:$4 sm:$0xff]  }
 0x361   : > { %v2107_v45 = vsel %vm2059_vm1, %v1946_v43, 0  ;;  %v7163_v43 = vld [vmem:[#allocation13 + $0xd0] ss:$8 sps:$4 sm:$0xff]  }
 0x378   : > { %v1894_v32 = vpop.f32.mrf.mxu1 }
 0x379   : > { %v1895_v42 = vadd.f32 %v1894_v32, %v1252_v37  ;;  %v7154_v32 = vld [vmem:[#allocation13] ss:$8 sps:$4 sm:$0xff]   ;;  %v8106_v37 = vmov 0  }
 0x37a   : > { %v1896_v35 = vpop.f32.mrf.mxu1 }
 0x37b   : > { %v1897_v36 = vadd.f32 %v1896_v35, %v1256_v31  ;;  %v1942_v44 = vpack.c.bf16 %v1895_v42, %v1895_v42  ;;  %v7156_v31 = vld [vmem:[#allocation13 + $0x4] ss:$8 sps:$4 sm:$0xff]   ;;  %v7165_v42 = vld [vmem:[#allocation13 + $0xd4] ss:$8 sps:$4 sm:$0xff]  }
 0x37c   : > { %v1898_v38 = vpop.f32.mrf.mxu1 }
 0x37d   : > { %v1944_v39 = vpack.c.bf16 %v1897_v36, %v1897_v36  ;;  %v7157_v38 = vld [vmem:[#allocation13 + $0xf0] ss:$8 sps:$4 sm:$0xff]  }
 0x37e   : > { %v1899_v41 = vpop.f32.mrf.mxu1 }
 0x37f   : > { %6776 = vmatpush3.bf16.xpose.msra.mxu1 %v1944_v39  ;;  %v7159_v39 = vld [vmem:[#allocation13 + $0xf4] ss:$8 sps:$4 sm:$0xff]   ;;  %v7160_v41 = vld [vmem:[#allocation13 + $0xe0] ss:$8 sps:$4 sm:$0xff]  }
 0x380   : > { %6787 = vmatprep.subr.bf16.mxu1 %v8104_v4 }
 0x386   : > { %6778 = vmatmul.mubr.bf16.vlgmr.msra.gmra.mxu1 %v1942_v44  ;;  %v7168_v44 = vld [vmem:[#allocation13 + $0xc4] ss:$8 sps:$4 sm:$0xff]  }
 0x387   : > { %6788 = vmatpush3.bf16.msra.mxu1 %v2107_v45  ;;  %6789 = vmatprep.mubr.msk.bf16.mxu1 %vm8105_vm0, %v8104_v4  ;;  %v7166_v45 = vld [vmem:[#allocation13 + $0xc0] ss:$8 sps:$4 sm:$0xff]  }
 0x388   : > { %2352 = vmatprep.subr.bf16.mxu1 %v7159_v39 }
 0x406   : > { %v1981_v47 = vpop.f32.mrf.mxu0 }
 0x407   : > { %v2027_v49 = vmul.f32 0.088388346, %v1981_v47  ;;  %v7169_v47 = vld [vmem:[#allocation13 + $0xb0] ss:$8 sps:$4 sm:$0xff]  }
 0x408   : > { %v6773_v50 = vpop.f32.mrf.mxu0 }
 0x409   : > { %v2029_v51 = vadd.f32 %v2027_v49, %v1024_v48  ;;  %v7172_v49 = vld [vmem:[#allocation13 + $0xa0] ss:$8 sps:$4 sm:$0xff]   ;;  %v7177_v50 = vld [vmem:[#allocation13 + $0x94] ss:$8 sps:$4 sm:$0xff]  }
 0x40a   : > { %v1984_v52 = vpop.f32.mrf.mxu0 }
 0x40b   : > { %v2032_v53 = vsel %vm2031_vm3, %v2029_v51, -inf  ;;  %v7180_v52 = vld [vmem:[#allocation13 + $0x84] ss:$8 sps:$4 sm:$0xff]  }
 0x40c   : > { %2033 = vmax.xlane.f32.xlu1 %v2032_v53  ;;  %v6774_v54 = vpop.f32.mrf.mxu0  ;;  %v7178_v53 = vld [vmem:[#allocation13 + $0x80] ss:$8 sps:$4 sm:$0xff]  }
 0x446   : > { %v2021_v55 = vpop.f32.mrf.mxu1 }
 0x447   : > { %v2028_v56 = vmul.f32 0.088388346, %v2021_v55 }
 0x448   : > { %v6779_v57 = vpop.f32.mrf.mxu1 }
 0x449   : > { %v2030_v58 = vadd.f32 %v2028_v56, %v1024_v48  ;;  %v7174_v48 = vld [vmem:[#allocation13 + $0xa4] ss:$8 sps:$4 sm:$0xff]  }
 0x44a   : > { %v2024_v59 = vpop.f32.mrf.mxu1 }
 0x44b   : > { %v2035_v63 = vsel %vm2031_vm3, %v2030_v58, -inf }
 0x44c   : > { %v6780_v60 = vpop.f32.mrf.mxu1  ;;  %2036 = vmax.xlane.f32.xlu1 %v2035_v63 }
 0x495   : > { %v2034_v61 = vpop.xlane.xlu1 %2033 }
 0x496   : > { %v2038_v62 = vsub.f32 %v2029_v51, %v2034_v61  ;;  %v7175_v51 = vld [vmem:[#allocation13 + $0x90] ss:$8 sps:$4 sm:$0xff]  }
 0x498   : > { %v2040_v3 = vmul.f32 1.442695, %v2038_v62 }
 0x49a   : > { %7553 = vpow2.f32 %v2040_v3 }
 0x4a7   : > { %v7554_v5 = vpop.eup %7553 }
 0x4a8   : > { %v2044_v7 = vsel %vm2031_vm3, %v7554_v5, 0.0 }
 0x4a9   : > { %2045 = vadd.xlane.f32.xlu0 %v2044_v7 }
 0x4d5   : > { %v2037_v8 = vpop.xlane.xlu1 %2036 }
 0x4d6   : > { %v2039_v9 = vsub.f32 %v2030_v58, %v2037_v8 }
 0x4d8   : > { %v2042_v10 = vmul.f32 1.442695, %v2039_v9  ;;  %v1232_v9 = vld [vmem:[#allocation14] sm:$0x3] }
 0x4d9   : > { %v2403_v13 = vrot.slane %v1232_v9, %v8562_v1 }
 0x4da   : > { %7555 = vpow2.f32 %v2042_v10  ;;  %v2399_v10 = vrot.slane %v1232_v9, %v8565_v2 }
 0x4e7   : > { %v7556_v11 = vpop.eup %7555 }
 0x4e8   : > { %v2047_v12 = vsel %vm2031_vm3, %v7556_v11, 0.0 }
 0x4e9   : > { %2048 = vadd.xlane.f32.xlu1 %v2047_v12 }
 0x532   : > { %v2046_v14 = vpop.xlane.xlu0 %2045 }
 0x533   : > { %7557 = vrcp.f32 %v2046_v14 }
 0x540   : > { %v7558_v15 = vpop.eup %7557 }
 0x541   : > { %v2052_v16 = vmul.f32 %v7558_v15, %v7554_v5 }
 0x543   : > { %v2054_v18 = vpack.c.bf16 %v2052_v16, %v2052_v16 }
 0x545   : > { %6784 = vmatmul.mubr.msk.bf16.vlgmr.msra.gmra.mxu0 %vm2031_vm3, %v2054_v18 }
 0x546   : > { %2232 = vmatpush1.bf16.msra.mxu0 %v7133_v17  ;;  %2263 = vmatprep.mubr.bf16.mxu0 %v8106_v37 }
 0x547   : > { %2233 = vmatprep.subr.bf16.mxu0 %v7138_v19 }
 0x54a   : > { %2234 = vmatpush1.bf16.msra.mxu0 %v7136_v20  ;;  %v7589_v20 = vld [vmem:[%s8509_s8] sm:$0xff] }
 0x54b   : > { %2235 = vmatprep.subr.bf16.mxu0 %v7141_v21 }
 0x54e   : > { %2236 = vmatpush1.bf16.msra.mxu0 %v7139_v22  ;;  %v7590_v22 = vld [vmem:[%s8509_s8 + $0x8] sm:$0xff] }
 0x54f   : > { %2237 = vmatprep.subr.bf16.mxu0 %v7144_v23 }
 0x552   : > { %2238 = vmatpush1.bf16.msra.mxu0 %v7142_v24 }
 0x553   : > { %2239 = vmatprep.subr.bf16.mxu0 %v7147_v25  ;;  %v7181_v25 = vld [vmem:[#allocation19 + $0x78] sm:$0xff]  }
 0x556   : > { %2240 = vmatpush1.bf16.msra.mxu0 %v7145_v26  ;;  %v7182_v26 = vld [vmem:[#allocation19 + $0xf8] sm:$0xff]  }
 0x557   : > { %2241 = vmatprep.subr.bf16.mxu0 %v7150_v27  ;;  %v7183_v27 = vld [vmem:[#allocation19 + $0x38] sm:$0xff]  }
 0x55a   : > { %2242 = vmatpush1.bf16.msra.mxu0 %v7148_v28  ;;  %v7184_v28 = vld [vmem:[#allocation19 + $0xb8] sm:$0xff]  }
 0x55b   : > { %2243 = vmatprep.subr.bf16.mxu0 %v7153_v29  ;;  %v7185_v29 = vld [vmem:[#allocation19 + $0x70] sm:$0xff]  }
 0x55e   : > { %2244 = vmatpush1.bf16.msra.mxu0 %v7151_v30  ;;  %v7186_v30 = vld [vmem:[#allocation19 + $0xf0] sm:$0xff]  }
 0x55f   : > { %2245 = vmatprep.subr.bf16.mxu0 %v7156_v31  ;;  %v7187_v31 = vld [vmem:[#allocation19 + $0x30] sm:$0xff]  }
 0x562   : > { %2246 = vmatpush1.bf16.msra.mxu0 %v7154_v32  ;;  %v7188_v32 = vld [vmem:[#allocation19 + $0xb0] sm:$0xff]  }
 0x563   : > { %6717 = vmatprep.subr.bf16.mxu0 %v7181_v25 }
 0x572   : > { %v2049_v33 = vpop.xlane.xlu1 %2048 }
 0x573   : > { %7559 = vrcp.f32 %v2049_v33 }
 0x580   : > { %v7560_v34 = vpop.eup %7559 }
 0x581   : > { %v2053_v35 = vmul.f32 %v7560_v34, %v7556_v11 }
 0x583   : > { %v2055_v36 = vpack.c.bf16 %v2053_v35, %v2053_v35 }
 0x585   : > { %6790 = vmatmul.mubr.msk.bf16.vlgmr.msra.gmra.mxu1 %vm2031_vm3, %v2055_v36 }
 0x586   : > { %2384 = vmatprep.mubr.bf16.mxu1 %v8106_v37  ;;  %2353 = vmatpush1.bf16.msra.mxu1 %v7157_v38 }
 0x587   : > { %2354 = vmatprep.subr.bf16.mxu1 %v7162_v40 }
 0x58a   : > { %2355 = vmatpush1.bf16.msra.mxu1 %v7160_v41  ;;  %v7189_v41 = vld [vmem:[#allocation19 + $0x68] sm:$0xff]  }
 0x58b   : > { %2356 = vmatprep.subr.bf16.mxu1 %v7165_v42  ;;  %v7190_v42 = vld [vmem:[#allocation19 + $0xe8] sm:$0xff]  }
 0x58e   : > { %2357 = vmatpush1.bf16.msra.mxu1 %v7163_v43  ;;  %v7191_v43 = vld [vmem:[#allocation19 + $0x28] sm:$0xff]  }
 0x58f   : > { %2358 = vmatprep.subr.bf16.mxu1 %v7168_v44  ;;  %v7192_v44 = vld [vmem:[#allocation19 + $0xa8] sm:$0xff]  }
 0x592   : > { %2359 = vmatpush1.bf16.msra.mxu1 %v7166_v45  ;;  %v7193_v45 = vld [vmem:[#allocation19 + $0x60] sm:$0xff]  }
 0x593   : > { %2360 = vmatprep.subr.bf16.mxu1 %v7171_v46  ;;  %v7194_v46 = vld [vmem:[#allocation19 + $0xe0] sm:$0xff]  }
 0x596   : > { %2361 = vmatpush1.bf16.msra.mxu1 %v7169_v47  ;;  %v7195_v47 = vld [vmem:[#allocation19 + $0x20] sm:$0xff]  }
 0x597   : > { %2362 = vmatprep.subr.bf16.mxu1 %v7174_v48  ;;  %v7196_v48 = vld [vmem:[#allocation19 + $0xa0] sm:$0xff]  }
 0x59a   : > { %2363 = vmatpush1.bf16.msra.mxu1 %v7172_v49  ;;  %v7197_v49 = vld [vmem:[#allocation19 + $0x58] sm:$0xff]  }
 0x59b   : > { %2364 = vmatprep.subr.bf16.mxu1 %v7177_v50  ;;  %v7198_v50 = vld [vmem:[#allocation19 + $0xd8] sm:$0xff]  }
 0x59e   : > { %2365 = vmatpush1.bf16.msra.mxu1 %v7175_v51  ;;  %v7199_v51 = vld [vmem:[#allocation19 + $0x18] sm:$0xff]  }
 0x59f   : > { %2366 = vmatprep.subr.bf16.mxu1 %v7180_v52  ;;  %v7200_v52 = vld [vmem:[#allocation19 + $0x98] sm:$0xff]  }
 0x5a2   : > { %2367 = vmatpush1.bf16.msra.mxu1 %v7178_v53  ;;  %v7201_v53 = vld [vmem:[#allocation19 + $0x50] sm:$0xff]  }
 0x5a3   : > { %6739 = vmatprep.subr.bf16.mxu1 %v7182_v26  ;;  %v8646_v26 = vld [vmem:[%s8517_s26] sm:$0xff]  ;;  %s7987_s26 = scalar_lea.vmem %s5875_s30, 256 }
 0x5a4   : > { %p7988_p13 = scmp.ne.s32.totalorder %s5875_s30, %s7987_s26 }
 0x5a6   : > { %p7989_p6 = pnand %p7988_p13, %p8954_p12 }
 0x5a8   : > { %p7990_p5 = pneg %p7989_p6 }
 0x605   : > { %v2097_v54 = vpop.f32.mrf.mxu0 }
 0x606   : > { %v2149_v55 = vpack.c.bf16 %v2097_v54, %v2097_v54  ;;  %v7202_v54 = vld [vmem:[#allocation19 + $0xd0] sm:$0xff]  }
 0x607   : > { %v6785_v56 = vpop.f32.mrf.mxu0 }
 0x608   : > { %2264 = vmatmul.mubr.bf16.vlgmr.msra.gmra.mxu0 %v2149_v55  ;;  %v7203_v55 = vld [vmem:[#allocation19 + $0x10] sm:$0xff]  }
 0x609   : > { %v2100_v57 = vpop.f32.mrf.mxu0  ;;  %6718 = vmatpush3.bf16.msra.mxu0 %v7183_v27  ;;  %v7204_v56 = vld [vmem:[#allocation19 + $0x90] sm:$0xff]  }
 0x60a   : > { %6719 = vmatprep.subr.bf16.mxu0 %v7185_v29  ;;  %v7205_v57 = vld [vmem:[#allocation19 + $0x48] sm:$0xff]   ;;  %v7216_v29 = vld [vmem:[#allocation20 + $0x170] ss:$8 sps:$4 sm:$0xff]  }
 0x60b   : > { %v6786_v58 = vpop.f32.mrf.mxu0 }
 0x60c   : > { %v7206_v58 = vld [vmem:[#allocation19 + $0xc8] sm:$0xff]  }
 0x60d   : > { %6720 = vmatpush3.bf16.msra.mxu0 %v7187_v31  ;;  %v7221_v31 = vld [vmem:[#allocation20 + $0x64] ss:$8 sps:$4 sm:$0xff]  }
 0x60e   : > { %6721 = vmatprep.subr.bf16.mxu0 %v7189_v41  ;;  %v7233_v41 = vld [vmem:[#allocation20 + $0x44] ss:$8 sps:$4 sm:$0xff]  }
 0x611   : > { %6722 = vmatpush3.bf16.msra.mxu0 %v7191_v43  ;;  %v7231_v43 = vld [vmem:[#allocation20 + $0x40] ss:$8 sps:$4 sm:$0xff]  }
 0x612   : > { %6723 = vmatprep.subr.bf16.mxu0 %v7193_v45  ;;  %v7239_v45 = vld [vmem:[#allocation20 + $0x34] ss:$8 sps:$4 sm:$0xff]  }
 0x615   : > { %6724 = vmatpush3.bf16.msra.mxu0 %v7195_v47  ;;  %v7237_v47 = vld [vmem:[#allocation20 + $0x30] ss:$8 sps:$4 sm:$0xff]  }
 0x616   : > { %6725 = vmatprep.subr.bf16.mxu0 %v7197_v49  ;;  %v7245_v49 = vld [vmem:[#allocation20 + $0x24] ss:$8 sps:$4 sm:$0xff]  }
 0x619   : > { %6726 = vmatpush3.bf16.msra.mxu0 %v7199_v51  ;;  %v7243_v51 = vld [vmem:[#allocation20 + $0x20] ss:$8 sps:$4 sm:$0xff]  }
 0x61a   : > { %6727 = vmatprep.subr.bf16.mxu0 %v7201_v53  ;;  %v7251_v53 = vld [vmem:[#allocation20 + $0x14] ss:$8 sps:$4 sm:$0xff]  }
 0x61d   : > { %6728 = vmatpush3.bf16.msra.mxu0 %v7203_v55  ;;  %v7249_v55 = vld [vmem:[#allocation20 + $0x10] ss:$8 sps:$4 sm:$0xff]  }
 0x61e   : > { %6729 = vmatprep.subr.bf16.mxu0 %v7205_v57  ;;  %v7257_v57 = vld [vmem:[#allocation20 + $0x4] ss:$8 sps:$4 sm:$0xff]  }
 0x645   : > { %v2143_v59 = vpop.f32.mrf.mxu1 }
 0x646   : > { %v2150_v63 = vpack.c.bf16 %v2143_v59, %v2143_v59  ;;  %v7207_v59 = vld [vmem:[#allocation19 + $0x8] sm:$0xff]  }
 0x647   : > { %v6791_v60 = vpop.f32.mrf.mxu1  ;;  %6730 = vmatpush3.bf16.msra.mxu0 %v7207_v59  ;;  %v7255_v59 = vld [vmem:[#allocation20] ss:$8 sps:$4 sm:$0xff]  }
 0x648   : > { %2385 = vmatmul.mubr.bf16.vlgmr.msra.gmra.mxu1 %v2150_v63  ;;  %v7208_v63 = vld [vmem:[#allocation19 + $0x88] sm:$0xff]   ;;  %v7209_v60 = vld [vmem:[#allocation19 + $0x40] sm:$0xff]  }
 0x649   : > { %v2146_v61 = vpop.f32.mrf.mxu1  ;;  %6740 = vmatpush3.bf16.msra.mxu1 %v7184_v28  ;;  %6731 = vmatprep.subr.bf16.mxu0 %v7209_v60  ;;  %v7213_v28 = vld [vmem:[#allocation20 + $0x70] ss:$8 sps:$4 sm:$0xff]   ;;  %v7263_v60 = vld [vmem:[#allocation20 + $0xf4] ss:$8 sps:$4 sm:$0xff]  }
 0x64a   : > { %6741 = vmatprep.subr.bf16.mxu1 %v7186_v30  ;;  %v7210_v61 = vld [vmem:[#allocation19 + $0xc0] sm:$0xff]  }
 0x64b   : > { %v6792_v62 = vpop.f32.mrf.mxu1 }
 0x64c   : > { %v7211_v62 = vld [vmem:[#allocation19] sm:$0xff]  }
 0x64d   : > { %6742 = vmatpush3.bf16.msra.mxu1 %v7188_v32  ;;  %6732 = vmatpush3.bf16.msra.mxu0 %v7211_v62  ;;  %v7224_v32 = vld [vmem:[#allocation20 + $0x164] ss:$8 sps:$4 sm:$0xff]   ;;  %v7261_v62 = vld [vmem:[#allocation20 + $0xf0] ss:$8 sps:$4 sm:$0xff]  }
 0x64e   : > { %6743 = vmatprep.subr.bf16.mxu1 %v7190_v42  ;;  %v7236_v42 = vld [vmem:[#allocation20 + $0x144] ss:$8 sps:$4 sm:$0xff]  }
 0x651   : > { %6744 = vmatpush3.bf16.msra.mxu1 %v7192_v44  ;;  %v7234_v44 = vld [vmem:[#allocation20 + $0x140] ss:$8 sps:$4 sm:$0xff]  }
 0x652   : > { %6745 = vmatprep.subr.bf16.mxu1 %v7194_v46  ;;  %v7242_v46 = vld [vmem:[#allocation20 + $0x134] ss:$8 sps:$4 sm:$0xff]  }
 0x655   : > { %6746 = vmatpush3.bf16.msra.mxu1 %v7196_v48  ;;  %v7240_v48 = vld [vmem:[#allocation20 + $0x130] ss:$8 sps:$4 sm:$0xff]  }
 0x656   : > { %6747 = vmatprep.subr.bf16.mxu1 %v7198_v50  ;;  %v7248_v50 = vld [vmem:[#allocation20 + $0x124] ss:$8 sps:$4 sm:$0xff]  }
 0x659   : > { %6748 = vmatpush3.bf16.msra.mxu1 %v7200_v52  ;;  %v7246_v52 = vld [vmem:[#allocation20 + $0x120] ss:$8 sps:$4 sm:$0xff]  }
 0x65a   : > { %6749 = vmatprep.subr.bf16.mxu1 %v7202_v54  ;;  %v7254_v54 = vld [vmem:[#allocation20 + $0x114] ss:$8 sps:$4 sm:$0xff]  }
 0x65d   : > { %6750 = vmatpush3.bf16.msra.mxu1 %v7204_v56  ;;  %v7252_v56 = vld [vmem:[#allocation20 + $0x110] ss:$8 sps:$4 sm:$0xff]  }
 0x65e   : > { %6751 = vmatprep.subr.bf16.mxu1 %v7206_v58  ;;  %v7260_v58 = vld [vmem:[#allocation20 + $0x104] ss:$8 sps:$4 sm:$0xff]  }
 0x661   : > { %6752 = vmatpush3.bf16.msra.mxu1 %v7208_v63  ;;  %v7258_v63 = vld [vmem:[#allocation20 + $0x100] ss:$8 sps:$4 sm:$0xff]  }
 0x662   : > { %6753 = vmatprep.subr.bf16.mxu1 %v7210_v61  ;;  %v7266_v61 = vld [vmem:[#allocation20 + $0x1f4] ss:$8 sps:$4 sm:$0xff]  }
 0x6c8   : > { %v2265_v3 = vpop.f32.mrf.mxu0 }
 0x6ca   : > { %v2267_v5 = vpop.f32.mrf.mxu0 }
 0x6cc   : > { %v2269_v7 = vpop.f32.mrf.mxu0 }
 0x6cd   : > { %v7218_v7 = vld [vmem:[#allocation20 + $0x174] ss:$8 sps:$4 sm:$0xff]  }
 0x6ce   : > { %v2270_v8 = vpop.f32.mrf.mxu0 }
 0x708   : > { %v2386_v11 = vpop.f32.mrf.mxu1 }
 0x709   : > { %v2393_v12 = vadd.f32 %v2386_v11, %v2265_v3  ;;  %v7212_v3 = vld [vmem:[#allocation19 + $0x80] sm:$0xff]   ;;  %v2410_v11 = vld [vmem:[#allocation16] sm:$0x3] }
 0x70a   : > { %v2388_v14 = vpop.f32.mrf.mxu1  ;;  %6754 = vmatpush3.bf16.msra.mxu1 %v7212_v3  ;;  %v7264_v3 = vld [vmem:[#allocation20 + $0x1f0] ss:$8 sps:$4 sm:$0xff]  }
 0x70b   : > { %v2406_v15 = vadd.f32 %v2399_v10, %v2393_v12  ;;  %v2394_v16 = vadd.f32 %v2388_v14, %v2267_v5  ;;  %v7215_v5 = vld [vmem:[#allocation20 + $0x74] ss:$8 sps:$4 sm:$0xff]   ;;  %3297 = vmatprep.subr.bf16.mxu1 %v7218_v7  ;;  %v2436_v14 = vrot.slane %v2410_v11, %v8562_v1  ;;  %v7272_v7 = vld [vmem:[#allocation20 + $0x1e4] ss:$8 sps:$4 sm:$0xff]  }
 0x70c   : > { %v2390_v17 = vpop.f32.mrf.mxu1  ;;  %3096 = vmatprep.subr.bf16.mxu0 %v7215_v5  ;;  %v2411_v12 = vld [vmem:[#allocation17] sm:$0x3]  ;;  %v7269_v5 = vld [vmem:[#allocation20 + $0xe4] ss:$8 sps:$4 sm:$0xff]  }
 0x70d   : > { %v2407_v18 = vadd.f32 %v2403_v13, %v2394_v16  ;;  %v8622_v21 = vadd.f32 %v7589_v20, %v2406_v15  ;;  %v2432_v13 = vrot.slane %v2410_v11, %v8565_v2  ;;  %v2445_v17 = vrot.slane %v2411_v12, %v8565_v2  ;;  %v7278_v11 = vld [vmem:[#allocation20 + $0x1d4] ss:$8 sps:$4 sm:$0xff]  }
 0x70e   : > { %v2391_v19 = vpop.f32.mrf.mxu1 }
 0x70f   : > { %v8625_v23 = vadd.f32 %v7590_v22, %v2407_v18  ;;  %v2449_v18 = vrot.slane %v2411_v12, %v8562_v1  ;;  %v7273_v12 = vld [vmem:[#allocation20 + $0xd0] ss:$8 sps:$4 sm:$0xff]  }
 0x711   : > { %v2412_v24 = vadd.f32 %v8625_v23, %v8622_v21 }
 0x713   : > { %2413 = vadd.xlane.f32.xlu0 %v2412_v24 }
 0x79c   : > { %v2414_v33 = vpop.xlane.xlu0 %2413 }
 0x79d   : > { %v2415_v34 = vmul.f32 0.00390625, %v2414_v33  ;;  %v6301_v33 = vcombine.high %v8646_v26, %v8646_v26 }
 0x79f   : > { %v8630_v35 = vsub.f32 %v8622_v21, %v2415_v34  ;;  %v8633_v36 = vsub.f32 %v8625_v23, %v2415_v34  ;;  %v7219_v34 = vld [vmem:[#allocation20 + $0x60] ss:$8 sps:$4 sm:$0xff]  }
 0x7a1   : > { %v2418_v38 = vmul.f32 %v8630_v35, %v8630_v35  ;;  %v2419_v39 = vmul.f32 %v8633_v36, %v8633_v36 }
 0x7a3   : > { %v2420_v40 = vadd.f32 %v2419_v39, %v2418_v38  ;;  %v7230_v38 = vld [vmem:[#allocation20 + $0x154] ss:$8 sps:$4 sm:$0xff]   ;;  %v7225_v39 = vld [vmem:[#allocation20 + $0x50] ss:$8 sps:$4 sm:$0xff]  }
 0x7a5   : > { %2421 = vadd.xlane.f32.xlu1 %v2420_v40  ;;  %v7228_v40 = vld [vmem:[#allocation20 + $0x150] ss:$8 sps:$4 sm:$0xff]  }
 0x82e   : > { %v2422_v8 = vpop.xlane.xlu1 %2421 }
 0x82f   : > { %v2423_v9 = vmul.f32 0.00390625, %v2422_v8  ;;  %v7267_v8 = vld [vmem:[#allocation20 + $0xe0] ss:$8 sps:$4 sm:$0xff]  }
 0x831   : > { %v2424_v10 = vadd.f32 1e-05, %v2423_v9  ;;  %v7270_v9 = vld [vmem:[#allocation20 + $0x1e0] ss:$8 sps:$4 sm:$0xff]  }
 0x833   : > { %7561 = vrsqrt.f32 %v2424_v10  ;;  %v7275_v10 = vld [vmem:[#allocation20 + $0xd4] ss:$8 sps:$4 sm:$0xff]  }
 0x840   : > { %v7562_v15 = vpop.eup %7561 }
 0x841   : > { %v2427_v16 = vmul.f32 %v7562_v15, %v8633_v36  ;;  %v2426_v19 = vmul.f32 %v7562_v15, %v8630_v35  ;;  %v7222_v35 = vld [vmem:[#allocation20 + $0x160] ss:$8 sps:$4 sm:$0xff]   ;;  %v7227_v36 = vld [vmem:[#allocation20 + $0x54] ss:$8 sps:$4 sm:$0xff]   ;;  %v7284_v15 = vld [vmem:[#allocation20 + $0x1c4] ss:$8 sps:$4 sm:$0xff]  }
 0x843   : > { %v2440_v20 = vmul.f32 %v2436_v14, %v2427_v16  ;;  %v2439_v22 = vmul.f32 %v2432_v13, %v2426_v19  ;;  %v7276_v13 = vld [vmem:[#allocation20 + $0x1d0] ss:$8 sps:$4 sm:$0xff]   ;;  %v7281_v14 = vld [vmem:[#allocation20 + $0xc4] ss:$8 sps:$4 sm:$0xff]   ;;  %v7279_v16 = vld [vmem:[#allocation20 + $0xc0] ss:$8 sps:$4 sm:$0xff]  }
 0x844   : > { %v7290_v19 = vld [vmem:[#allocation20 + $0x1b4] ss:$8 sps:$4 sm:$0xff]  }
 0x845   : > { %v2453_v24 = vadd.f32 %v2449_v18, %v2440_v20  ;;  %v2452_v25 = vadd.f32 %v2445_v17, %v2439_v22  ;;  %v7282_v17 = vld [vmem:[#allocation20 + $0x1c0] ss:$8 sps:$4 sm:$0xff]   ;;  %v7287_v18 = vld [vmem:[#allocation20 + $0xb4] ss:$8 sps:$4 sm:$0xff]   ;;  %v7285_v20 = vld [vmem:[#allocation20 + $0xb0] ss:$8 sps:$4 sm:$0xff]  }
 0x846   : > { %v7288_v22 = vld [vmem:[#allocation20 + $0x1b0] ss:$8 sps:$4 sm:$0xff]  }
 0x847   : > { %v2620_v27 = vpack.c.bf16 %v2453_v24, %v2453_v24  ;;  %v2619_v30 = vpack.c.bf16 %v2452_v25, %v2452_v25  ;;  %v7293_v24 = vld [vmem:[#allocation20 + $0xa4] ss:$8 sps:$4 sm:$0xff]  }
 0x848   : > { %v7296_v25 = vld [vmem:[#allocation20 + $0x1a4] ss:$8 sps:$4 sm:$0xff]  }
 0x849   : > { %2761 = vmatprep.mubr.bf16.mxu0 %v2620_v27  ;;  %2897 = vmatprep.mubr.bf16.mxu1 %v2620_v27  ;;  %v7291_v27 = vld [vmem:[#allocation20 + $0xa0] ss:$8 sps:$4 sm:$0xff]  }
 0x84a   : > { %2762 = vmatmul.mubr.bf16.vlgmr.msra.gmra.mxu0 %v2619_v30  ;;  %2898 = vmatmul.mubr.bf16.vlgmr.msra.gmra.mxu1 %v2619_v30  ;;  %v7302_v30 = vld [vmem:[#allocation20 + $0x194] ss:$8 sps:$4 sm:$0xff]  }
 0x84b   : > { %3097 = vmatpush1.bf16.msra.mxu0 %v7213_v28  ;;  %3298 = vmatpush1.bf16.msra.mxu1 %v7216_v29  ;;  %v7294_v28 = vld [vmem:[#allocation20 + $0x1a0] ss:$8 sps:$4 sm:$0xff]   ;;  %v7299_v29 = vld [vmem:[#allocation20 + $0x94] ss:$8 sps:$4 sm:$0xff]  }
 0x84c   : > { %3098 = vmatprep.subr.bf16.mxu0 %v7221_v31  ;;  %3299 = vmatprep.subr.bf16.mxu1 %v7224_v32  ;;  %v7297_v31 = vld [vmem:[#allocation20 + $0x90] ss:$8 sps:$4 sm:$0xff]  }
 0x84d   : > { %3128 = vmatprep.mubr.bf16.mxu0 %v6301_v33  ;;  %3329 = vmatprep.mubr.bf16.mxu1 %v6301_v33  ;;  %v7300_v32 = vld [vmem:[#allocation20 + $0x190] ss:$8 sps:$4 sm:$0xff]   ;;  %v7305_v33 = vld [vmem:[#allocation20 + $0x84] ss:$8 sps:$4 sm:$0xff]  }
 0x84f   : > { %3099 = vmatpush1.bf16.msra.mxu0 %v7219_v34  ;;  %3300 = vmatpush1.bf16.msra.mxu1 %v7222_v35  ;;  %v7308_v34 = vld [vmem:[#allocation20 + $0x184] ss:$8 sps:$4 sm:$0xff]   ;;  %v7303_v35 = vld [vmem:[#allocation20 + $0x80] ss:$8 sps:$4 sm:$0xff]  }
 0x850   : > { %3100 = vmatprep.subr.bf16.mxu0 %v7227_v36  ;;  %3301 = vmatprep.subr.bf16.mxu1 %v7230_v38  ;;  %v7306_v36 = vld [vmem:[#allocation20 + $0x180] ss:$8 sps:$4 sm:$0xff]   ;;  %v6300_v38 = vcombine.low %v8646_v26, %v8646_v26 }
 0x853   : > { %3101 = vmatpush1.bf16.msra.mxu0 %v7225_v39  ;;  %3302 = vmatpush1.bf16.msra.mxu1 %v7228_v40 }
 0x854   : > { %3102 = vmatprep.subr.bf16.mxu0 %v7233_v41  ;;  %3303 = vmatprep.subr.bf16.mxu1 %v7236_v42 }
 0x857   : > { %3103 = vmatpush1.bf16.msra.mxu0 %v7231_v43  ;;  %3304 = vmatpush1.bf16.msra.mxu1 %v7234_v44 }
 0x858   : > { %3104 = vmatprep.subr.bf16.mxu0 %v7239_v45  ;;  %3305 = vmatprep.subr.bf16.mxu1 %v7242_v46 }
 0x85b   : > { %3105 = vmatpush1.bf16.msra.mxu0 %v7237_v47  ;;  %3306 = vmatpush1.bf16.msra.mxu1 %v7240_v48  ;;  %v2584_v48 = vld [vmem:[%s8840_s14] sm:$0x3] }
 0x85c   : > { %3106 = vmatprep.subr.bf16.mxu0 %v7245_v49  ;;  %3307 = vmatprep.subr.bf16.mxu1 %v7248_v50  ;;  %v2585_v49 = vld [vmem:[%s8840_s14 + $0x2] sm:$0x3]  ;;  %v2912_v50 = vrot.slane %v2584_v48, %v8565_v2 }
 0x85f   : > { %3107 = vmatpush1.bf16.msra.mxu0 %v7243_v51  ;;  %3308 = vmatpush1.bf16.msra.mxu1 %v7246_v52  ;;  %v2920_v51 = vrot.slane %v2585_v49, %v8565_v2 }
 0x860   : > { %3108 = vmatprep.subr.bf16.mxu0 %v7251_v53  ;;  %3309 = vmatprep.subr.bf16.mxu1 %v7254_v54  ;;  %v2916_v54 = vrot.slane %v2584_v48, %v8562_v1 }
 0x863   : > { %3109 = vmatpush1.bf16.msra.mxu0 %v7249_v55  ;;  %3310 = vmatpush1.bf16.msra.mxu1 %v7252_v56  ;;  %v2924_v55 = vrot.slane %v2585_v49, %v8562_v1 }
 0x864   : > { %3110 = vmatprep.subr.bf16.mxu0 %v7257_v57  ;;  %3311 = vmatprep.subr.bf16.mxu1 %v7260_v58 }
 0x867   : > { %3111 = vmatpush1.bf16.msra.mxu0 %v7255_v59  ;;  %3312 = vmatpush1.bf16.msra.mxu1 %v7258_v63  ;;  %v6266_v63 = vld [vmem:[%s8838_s12] ss:$0 sm:$0xff] }
 0x868   : > { %3112 = vmatprep.subr.bf16.mxu0 %v7263_v60  ;;  %3313 = vmatprep.subr.bf16.mxu1 %v7266_v61  ;;  %v6267_v60 = vld [vmem:[%s8838_s12 + $0x1] ss:$0 sm:$0xff] }
 0x86b   : > { %3113 = vmatpush2.bf16.msra.mxu0 %v7261_v62  ;;  %3314 = vmatpush2.bf16.msra.mxu1 %v7264_v3 }
 0x86c   : > { %3114 = vmatprep.subr.bf16.mxu0 %v7269_v5  ;;  %3315 = vmatprep.subr.bf16.mxu1 %v7272_v7 }
 0x86f   : > { %3115 = vmatpush2.bf16.msra.mxu0 %v7267_v8  ;;  %3316 = vmatpush2.bf16.msra.mxu1 %v7270_v9 }
 0x870   : > { %3116 = vmatprep.subr.bf16.mxu0 %v7275_v10  ;;  %3317 = vmatprep.subr.bf16.mxu1 %v7278_v11 }
 0x873   : > { %3117 = vmatpush2.bf16.msra.mxu0 %v7273_v12  ;;  %3318 = vmatpush2.bf16.msra.mxu1 %v7276_v13 }
 0x874   : > { %3118 = vmatprep.subr.bf16.mxu0 %v7281_v14  ;;  %3319 = vmatprep.subr.bf16.mxu1 %v7284_v15 }
 0x877   : > { %3119 = vmatpush2.bf16.msra.mxu0 %v7279_v16  ;;  %3320 = vmatpush2.bf16.msra.mxu1 %v7282_v17 }
 0x878   : > { %3120 = vmatprep.subr.bf16.mxu0 %v7287_v18  ;;  %3321 = vmatprep.subr.bf16.mxu1 %v7290_v19 }
 0x87b   : > { %3121 = vmatpush2.bf16.msra.mxu0 %v7285_v20  ;;  %3322 = vmatpush2.bf16.msra.mxu1 %v7288_v22  ;;  %v6366_v22 = vld [vmem:[%s890_s19] ss:$0 sm:$0xff]  ;;  %s7993_s19 = scalar_lea.vmem %s7992_s22, 512 }
 0x87c   : > { %3122 = vmatprep.subr.bf16.mxu0 %v7293_v24  ;;  %3323 = vmatprep.subr.bf16.mxu1 %v7296_v25  ;;  %p7995_p1 = scmp.lt.s32.totalorder %s7993_s19, %s7987_s26 }
 0x87e   : > { %p7996_p4 = por %p7995_p1, %p7994_p8 }
 0x87f   : > { %3123 = vmatpush2.bf16.msra.mxu0 %v7291_v27  ;;  %3324 = vmatpush2.bf16.msra.mxu1 %v7294_v28 }
 0x880   : > { %3124 = vmatprep.subr.bf16.mxu0 %v7299_v29  ;;  %3325 = vmatprep.subr.bf16.mxu1 %v7302_v30  ;;  %p7997_p0 = pnand %p7996_p4, %p7990_p5 }
 0x883   : > { %3125 = vmatpush2.bf16.msra.mxu0 %v7297_v31  ;;  %3326 = vmatpush2.bf16.msra.mxu1 %v7300_v32 }
 0x884   : > { %3126 = vmatprep.subr.bf16.mxu0 %v7305_v33  ;;  %3327 = vmatprep.subr.bf16.mxu1 %v7308_v34 }
 0x887   : > { %3127 = vmatpush2.bf16.msra.mxu0 %v7303_v35  ;;  %3328 = vmatpush2.bf16.msra.mxu1 %v7306_v36 }
 0x888   : > { %6793 = vmatprep.subr.bf16.mxu0 %v8104_v4  ;;  %6799 = vmatprep.subr.bf16.mxu1 %v8104_v4 }
 0x88a   : > { %3129 = vmatmul.mubr.bf16.vlgmr.msra.gmra.mxu0 %v6300_v38  ;;  %3330 = vmatmul.mubr.bf16.vlgmr.msra.gmra.mxu1 %v6300_v38 }
 0x88b   : > { %6795 = vmatprep.mubr.msk.bf16.mxu0 %vm8105_vm0, %v8104_v4  ;;  %6801 = vmatprep.mubr.msk.bf16.mxu1 %vm8105_vm0, %v8104_v4 }
 0x90a   : > { %v6733_v39 = vpop.f32.mrf.mxu0  ;;  %v6755_v40 = vpop.f32.mrf.mxu1 }
 0x90c   : > { %v6734_v41 = vpop.f32.mrf.mxu0  ;;  %v6756_v42 = vpop.f32.mrf.mxu1 }
 0x90d   : > { %v6735_v43 = vadd.f32 %v6734_v41, %v6733_v39  ;;  %v6757_v26 = vadd.f32 %v6756_v42, %v6755_v40 }
 0x90e   : > { %v6736_v44 = vpop.f32.mrf.mxu0  ;;  %v6758_v45 = vpop.f32.mrf.mxu1 }
 0x90f   : > { %v2764_v9 = vadd.f32 %v6735_v43, %v6266_v63  ;;  %v2900_v10 = vadd.f32 %v6757_v26, %v6267_v60  ;;  %v7320_v63 = vld [vmem:[#allocation22 + $0xe0] ss:$8 sps:$4 sm:$0xff]  }
 0x910   : > { %v6737_v46 = vpop.f32.mrf.mxu0  ;;  %v6759_v47 = vpop.f32.mrf.mxu1  ;;  %v7317_v60 = vld [vmem:[#allocation22 + $0x60] ss:$8 sps:$4 sm:$0xff]  }
 0x911   : > { %v2905_v15 = vpack.c.bf16 %v2764_v9, %v2764_v9  ;;  %v2906_v16 = vpack.c.bf16 %v2900_v10, %v2900_v10  ;;  %v7313_v46 = vld [vmem:[#allocation22 + $0x74] ss:$8 sps:$4 sm:$0xff]   ;;  %v7332_v9 = vld [vmem:[#allocation22 + $0xc0] ss:$8 sps:$4 sm:$0xff]  }
 0x912   : > { %v7316_v47 = vld [vmem:[#allocation22 + $0xf4] ss:$8 sps:$4 sm:$0xff]   ;;  %v7329_v10 = vld [vmem:[#allocation22 + $0x40] ss:$8 sps:$4 sm:$0xff]  }
 0x94a   : > { %v3130_v52 = vpop.f32.mrf.mxu0  ;;  %v3331_v53 = vpop.f32.mrf.mxu1 }
 0x94b   : > { %v3131_v56 = vadd.f32 %v3130_v52, %v2912_v50  ;;  %v3332_v57 = vadd.f32 %v3331_v53, %v2920_v51 }
 0x94c   : > { %v3132_v58 = vpop.f32.mrf.mxu0  ;;  %v3333_v59 = vpop.f32.mrf.mxu1 }
 0x94d   : > { %v3338_v61 = vpack.c.bf16 %v3131_v56, %v3131_v56  ;;  %v3339_v62 = vpack.c.bf16 %v3332_v57, %v3332_v57  ;;  %v3133_v3 = vadd.f32 %v3132_v58, %v2916_v54  ;;  %v3334_v5 = vadd.f32 %v3333_v59, %v2924_v55  ;;  %v7314_v54 = vld [vmem:[#allocation22 + $0xf0] ss:$8 sps:$4 sm:$0xff]   ;;  %v7322_v57 = vld [vmem:[#allocation22 + $0xe4] ss:$8 sps:$4 sm:$0xff]  }
 0x94e   : > { %v3134_v7 = vpop.f32.mrf.mxu0  ;;  %v3335_v8 = vpop.f32.mrf.mxu1  ;;  %v7311_v56 = vld [vmem:[#allocation22 + $0x70] ss:$8 sps:$4 sm:$0xff]   ;;  %v7319_v59 = vld [vmem:[#allocation22 + $0x64] ss:$8 sps:$4 sm:$0xff]  }
 0x94f   : > { %6794 = vmatpush3.bf16.xpose.msra.mxu0 %v3338_v61  ;;  %6800 = vmatpush3.bf16.xpose.msra.mxu1 %v3339_v62  ;;  %v3340_v13 = vpack.c.bf16 %v3133_v3, %v3133_v3  ;;  %v3341_v14 = vpack.c.bf16 %v3334_v5, %v3334_v5  ;;  %v7328_v61 = vld [vmem:[#allocation22 + $0xd4] ss:$8 sps:$4 sm:$0xff]   ;;  %v7326_v3 = vld [vmem:[#allocation22 + $0xd0] ss:$8 sps:$4 sm:$0xff]   ;;  %v7334_v7 = vld [vmem:[#allocation22 + $0xc4] ss:$8 sps:$4 sm:$0xff]  }
 0x950   : > { %v3135_v11 = vpop.f32.mrf.mxu0  ;;  %v3336_v12 = vpop.f32.mrf.mxu1  ;;  %6805 = vmatprep.subr.bf16.mxu0 %v8104_v4  ;;  %6811 = vmatprep.subr.bf16.mxu1 %v8104_v4  ;;  %v7325_v62 = vld [vmem:[#allocation22 + $0x54] ss:$8 sps:$4 sm:$0xff]   ;;  %v7323_v5 = vld [vmem:[#allocation22 + $0x50] ss:$8 sps:$4 sm:$0xff]   ;;  %v7331_v8 = vld [vmem:[#allocation22 + $0x44] ss:$8 sps:$4 sm:$0xff]  }
 0x951   : > { %v3460_v17 = vsel %vm2059_vm1, %v3340_v13, 0  ;;  %v3506_v18 = vsel %vm2059_vm1, %v3341_v14, 0  ;;  %v7340_v11 = vld [vmem:[#allocation22 + $0xb4] ss:$8 sps:$4 sm:$0xff]   ;;  %v7338_v13 = vld [vmem:[#allocation22 + $0xb0] ss:$8 sps:$4 sm:$0xff]  }
 0x952   : > { %v7337_v12 = vld [vmem:[#allocation22 + $0x34] ss:$8 sps:$4 sm:$0xff]   ;;  %v7346_v14 = vld [vmem:[#allocation22 + $0xa4] ss:$8 sps:$4 sm:$0xff]  }
 0x956   : > { %6796 = vmatmul.mubr.bf16.vlgmr.msra.gmra.mxu0 %v2905_v15  ;;  %6802 = vmatmul.mubr.bf16.vlgmr.msra.gmra.mxu1 %v2906_v16  ;;  %v7343_v15 = vld [vmem:[#allocation22 + $0x24] ss:$8 sps:$4 sm:$0xff]   ;;  %v7344_v16 = vld [vmem:[#allocation22 + $0xa0] ss:$8 sps:$4 sm:$0xff]  }
 0x957   : > { %6806 = vmatpush3.bf16.msra.mxu0 %v3460_v17  ;;  %6812 = vmatpush3.bf16.msra.mxu1 %v3506_v18  ;;  %v7341_v17 = vld [vmem:[#allocation22 + $0x20] ss:$8 sps:$4 sm:$0xff]   ;;  %v7352_v18 = vld [vmem:[#allocation22 + $0x94] ss:$8 sps:$4 sm:$0xff]  }
 0x958   : > { %6807 = vmatprep.mubr.msk.bf16.mxu0 %vm8105_vm0, %v8104_v4  ;;  %6813 = vmatprep.mubr.msk.bf16.mxu1 %vm8105_vm0, %v8104_v4 }
 0x959   : > { %3630 = vmatprep.subr.bf16.mxu0 %v7313_v46  ;;  %3751 = vmatprep.subr.bf16.mxu1 %v7316_v47 }
 0xa16   : > { %v3376_v19 = vpop.f32.mrf.mxu0  ;;  %v3416_v20 = vpop.f32.mrf.mxu1 }
 0xa17   : > { %v3422_v24 = vmul.f32 0.088388346, %v3376_v19  ;;  %v3423_v25 = vmul.f32 0.088388346, %v3416_v20  ;;  %v7349_v19 = vld [vmem:[#allocation22 + $0x14] ss:$8 sps:$4 sm:$0xff]  }
 0xa18   : > { %v6797_v27 = vpop.f32.mrf.mxu0  ;;  %v6803_v28 = vpop.f32.mrf.mxu1  ;;  %v7350_v20 = vld [vmem:[#allocation22 + $0x90] ss:$8 sps:$4 sm:$0xff]  }
 0xa19   : > { %v3431_v29 = vadd.f32 %v6366_v22, %v3423_v25  ;;  %v3430_v30 = vadd.f32 %v6366_v22, %v3422_v24  ;;  %v7347_v22 = vld [vmem:[#allocation22 + $0x10] ss:$8 sps:$4 sm:$0xff]   ;;  %v7358_v24 = vld [vmem:[#allocation22 + $0x84] ss:$8 sps:$4 sm:$0xff]   ;;  %v7356_v27 = vld [vmem:[#allocation22 + $0x80] ss:$8 sps:$4 sm:$0xff]  }
 0xa1a   : > { %v3379_v31 = vpop.f32.mrf.mxu0  ;;  %v3419_v32 = vpop.f32.mrf.mxu1  ;;  %v7355_v25 = vld [vmem:[#allocation22 + $0x4] ss:$8 sps:$4 sm:$0xff]   ;;  %v7353_v28 = vld [vmem:[#allocation22] ss:$8 sps:$4 sm:$0xff]  }
 0xa1b   : > { %v3435_v33 = vsel %vm2031_vm3, %v3431_v29, -inf  ;;  %v3432_v34 = vsel %vm2031_vm3, %v3430_v30, -inf }
 0xa1c   : > { %3436 = vmax.xlane.f32.xlu1 %v3435_v33  ;;  %v6804_v35 = vpop.f32.mrf.mxu1  ;;  %3433 = vmax.xlane.f32.xlu0 %v3432_v34  ;;  %v6798_v4 = vpop.f32.mrf.mxu0 }
 0xaa5   : > { %v3437_v36 = vpop.xlane.xlu1 %3436  ;;  %v3434_v38 = vpop.xlane.xlu0 %3433 }
 0xaa6   : > { %v3439_v39 = vsub.f32 %v3431_v29, %v3437_v36  ;;  %v3438_v40 = vsub.f32 %v3430_v30, %v3434_v38 }
 0xaa8   : > { %v3442_v41 = vmul.f32 1.442695, %v3439_v39  ;;  %v3440_v42 = vmul.f32 1.442695, %v3438_v40  ;;  %v2618_v39 = vld [vmem:[%s8842_s16] sm:$0x3] }
 0xaaa   : > { %7563 = vpow2.f32 %v3442_v41  ;;  %v3798_v41 = vrot.slane %v2618_v39, %v8565_v2 }
 0xaab   : > { %7565 = vpow2.f32 %v3440_v42 }
 0xab7   : > { %v7564_v43 = vpop.eup %7563 }
 0xab8   : > { %v7566_v26 = vpop.eup %7565  ;;  %v3447_v44 = vsel %vm2031_vm3, %v7564_v43, 0.0 }
 0xab9   : > { %3448 = vadd.xlane.f32.xlu1 %v3447_v44  ;;  %v3444_v45 = vsel %vm2031_vm3, %v7566_v26, 0.0  ;;  %v3802_v44 = vrot.slane %v2618_v39, %v8562_v1 }
 0xaba   : > { %3445 = vadd.xlane.f32.xlu0 %v3444_v45 }
 0xb42   : > { %v3449_v48 = vpop.xlane.xlu1 %3448 }
 0xb43   : > { %7567 = vrcp.f32 %v3449_v48  ;;  %v3446_v49 = vpop.xlane.xlu0 %3445 }
 0xb44   : > { %7569 = vrcp.f32 %v3446_v49 }
 0xb50   : > { %v7568_v50 = vpop.eup %7567 }
 0xb51   : > { %v7570_v51 = vpop.eup %7569  ;;  %v3453_v52 = vmul.f32 %v7568_v50, %v7564_v43 }
 0xb52   : > { %v3452_v53 = vmul.f32 %v7570_v51, %v7566_v26 }
 0xb53   : > { %v3455_v55 = vpack.c.bf16 %v3453_v52, %v3453_v52 }
 0xb54   : > { %v3454_v58 = vpack.c.bf16 %v3452_v53, %v3452_v53 }
 0xb55   : > { %6814 = vmatmul.mubr.msk.bf16.vlgmr.msra.gmra.mxu1 %vm2031_vm3, %v3455_v55 }
 0xb56   : > { %6808 = vmatmul.mubr.msk.bf16.vlgmr.msra.gmra.mxu0 %vm2031_vm3, %v3454_v58  ;;  %3752 = vmatpush1.bf16.msra.mxu1 %v7314_v54  ;;  %v3910_v58 = vld [vmem:[#allocation23 + $0x1c8] sm:$0xff] }
 0xb57   : > { %3631 = vmatpush1.bf16.msra.mxu0 %v7311_v56  ;;  %3753 = vmatprep.subr.bf16.mxu1 %v7322_v57  ;;  %v3909_v56 = vld [vmem:[#allocation23 + $0x1c0] sm:$0xff] }
 0xb58   : > { %3632 = vmatprep.subr.bf16.mxu0 %v7319_v59  ;;  %3662 = vmatprep.mubr.bf16.mxu0 %v8106_v37  ;;  %v3913_v57 = vld [vmem:[#allocation23 + $0x1e0] sm:$0xff] }
 0xb59   : > { %3783 = vmatprep.mubr.bf16.mxu1 %v8106_v37  ;;  %v7335_v37 = vld [vmem:[#allocation22 + $0x30] ss:$8 sps:$4 sm:$0xff]   ;;  %v6457_v59 = vcombine.low %v3909_v56, %v3913_v57 }
 0xb5a   : > { %3754 = vmatpush1.bf16.msra.mxu1 %v7320_v63  ;;  %v6458_v63 = vcombine.high %v3909_v56, %v3913_v57 }
 0xb5b   : > { %3633 = vmatpush1.bf16.msra.mxu0 %v7317_v60  ;;  %3755 = vmatprep.subr.bf16.mxu1 %v7328_v61  ;;  %v3914_v60 = vld [vmem:[#allocation23 + $0x1e8] sm:$0xff]  ;;  %v3901_v61 = vld [vmem:[#allocation23 + $0x180] sm:$0xff] }
 0xb5c   : > { %3634 = vmatprep.subr.bf16.mxu0 %v7325_v62  ;;  %v3905_v62 = vld [vmem:[#allocation23 + $0x1a0] sm:$0xff] }
 0xb5e   : > { %3756 = vmatpush1.bf16.msra.mxu1 %v7326_v3  ;;  %v6459_v3 = vcombine.low %v3910_v58, %v3914_v60 }
 0xb5f   : > { %3635 = vmatpush1.bf16.msra.mxu0 %v7323_v5  ;;  %3757 = vmatprep.subr.bf16.mxu1 %v7334_v7  ;;  %v6460_v5 = vcombine.high %v3910_v58, %v3914_v60  ;;  %v6450_v7 = vcombine.high %v3901_v61, %v3905_v62  ;;  %v3977_v60 = vld [vmem:[#allocation23 + $0x3e0] sm:$0xff] }
 0xb60   : > { %3636 = vmatprep.subr.bf16.mxu0 %v7331_v8  ;;  %v3906_v8 = vld [vmem:[#allocation23 + $0x1a8] sm:$0xff] }
 0xb62   : > { %3758 = vmatpush1.bf16.msra.mxu1 %v7332_v9  ;;  %v3893_v9 = vld [vmem:[#allocation23 + $0x140] sm:$0xff] }
 0xb63   : > { %3637 = vmatpush1.bf16.msra.mxu0 %v7329_v10  ;;  %3759 = vmatprep.subr.bf16.mxu1 %v7340_v11  ;;  %v3897_v10 = vld [vmem:[#allocation23 + $0x160] sm:$0xff]  ;;  %v3894_v11 = vld [vmem:[#allocation23 + $0x148] sm:$0xff] }
 0xb64   : > { %3638 = vmatprep.subr.bf16.mxu0 %v7337_v12  ;;  %v3898_v12 = vld [vmem:[#allocation23 + $0x168] sm:$0xff] }
 0xb66   : > { %3760 = vmatpush1.bf16.msra.mxu1 %v7338_v13  ;;  %v6449_v13 = vcombine.low %v3901_v61, %v3905_v62  ;;  %v3974_v61 = vld [vmem:[#allocation23 + $0x3c8] sm:$0xff] }
 0xb67   : > { %3639 = vmatpush1.bf16.msra.mxu0 %v7335_v37  ;;  %3761 = vmatprep.subr.bf16.mxu1 %v7346_v14  ;;  %v6442_v14 = vcombine.high %v3893_v9, %v3897_v10  ;;  %v3978_v62 = vld [vmem:[#allocation23 + $0x3e8] sm:$0xff] }
 0xb68   : > { %3640 = vmatprep.subr.bf16.mxu0 %v7343_v15  ;;  %v6444_v15 = vcombine.high %v3894_v11, %v3898_v12 }
 0xb6a   : > { %3762 = vmatpush1.bf16.msra.mxu1 %v7344_v16  ;;  %v3885_v16 = vld [vmem:[#allocation23 + $0x100] sm:$0xff] }
 0xb6b   : > { %3641 = vmatpush1.bf16.msra.mxu0 %v7341_v17  ;;  %3763 = vmatprep.subr.bf16.mxu1 %v7352_v18  ;;  %v3889_v17 = vld [vmem:[#allocation23 + $0x120] sm:$0xff]  ;;  %v3886_v18 = vld [vmem:[#allocation23 + $0x108] sm:$0xff] }
 0xb6c   : > { %3642 = vmatprep.subr.bf16.mxu0 %v7349_v19  ;;  %v3890_v19 = vld [vmem:[#allocation23 + $0x128] sm:$0xff] }
 0xb6e   : > { %3764 = vmatpush1.bf16.msra.mxu1 %v7350_v20  ;;  %v6441_v20 = vcombine.low %v3893_v9, %v3897_v10  ;;  %v3969_v9 = vld [vmem:[#allocation23 + $0x3a0] sm:$0xff]  ;;  %v3970_v10 = vld [vmem:[#allocation23 + $0x3a8] sm:$0xff] }
 0xb6f   : > { %3643 = vmatpush1.bf16.msra.mxu0 %v7347_v22  ;;  %3765 = vmatprep.subr.bf16.mxu1 %v7358_v24  ;;  %v6443_v22 = vcombine.low %v3894_v11, %v3898_v12  ;;  %v6434_v24 = vcombine.high %v3885_v16, %v3889_v17  ;;  %v6523_v12 = vcombine.low %v3974_v61, %v3978_v62 }
 0xb70   : > { %3644 = vmatprep.subr.bf16.mxu0 %v7355_v25  ;;  %v6436_v25 = vcombine.high %v3886_v18, %v3890_v19 }
 0xb72   : > { %3766 = vmatpush1.bf16.msra.mxu1 %v7356_v27  ;;  %v3877_v27 = vld [vmem:[#allocation23 + $0xc0] sm:$0xff] }
 0xb73   : > { %3645 = vmatpush1.bf16.msra.mxu0 %v7353_v28  ;;  %4834 = vmatprep.subr.bf16.mxu1 %v6460_v5  ;;  %v3881_v28 = vld [vmem:[#allocation23 + $0xe0] sm:$0xff] }
 0xb74   : > { %4793 = vmatprep.subr.bf16.mxu0 %v6458_v63  ;;  %v6425_v39 = vcombine.low %v3877_v27, %v3881_v28  ;;  %v3973_v63 = vld [vmem:[#allocation23 + $0x3c0] sm:$0xff] }
 0xb75   : > { %v6521_v11 = vcombine.low %v3973_v63, %v3977_v60 }
 0xc15   : > { %v3542_v29 = vpop.f32.mrf.mxu1 }
 0xc16   : > { %v3496_v30 = vpop.f32.mrf.mxu0  ;;  %v3549_v31 = vpack.c.bf16 %v3542_v29, %v3542_v29  ;;  %v3878_v29 = vld [vmem:[#allocation23 + $0xc8] sm:$0xff] }
 0xc17   : > { %v3548_v32 = vpack.c.bf16 %v3496_v30, %v3496_v30  ;;  %v6815_v33 = vpop.f32.mrf.mxu1  ;;  %v3882_v30 = vld [vmem:[#allocation23 + $0xe8] sm:$0xff] }
 0xc18   : > { %v6809_v34 = vpop.f32.mrf.mxu0  ;;  %3784 = vmatmul.mubr.bf16.vlgmr.msra.gmra.mxu1 %v3549_v31  ;;  %v6433_v31 = vcombine.low %v3885_v16, %v3889_v17  ;;  %v6426_v33 = vcombine.high %v3877_v27, %v3881_v28  ;;  %v3961_v27 = vld [vmem:[#allocation23 + $0x360] sm:$0xff]  ;;  %v3958_v28 = vld [vmem:[#allocation23 + $0x348] sm:$0xff] }
 0xc19   : > { %3663 = vmatmul.mubr.bf16.vlgmr.msra.gmra.mxu0 %v3548_v32  ;;  %v3545_v35 = vpop.f32.mrf.mxu1  ;;  %4835 = vmatpush1.bf16.msra.mxu1 %v6459_v3  ;;  %v6435_v32 = vcombine.low %v3886_v18, %v3890_v19  ;;  %v6428_v34 = vcombine.high %v3878_v29, %v3882_v30 }
 0xc1a   : > { %v3499_v4 = vpop.f32.mrf.mxu0  ;;  %4794 = vmatpush1.bf16.msra.mxu0 %v6457_v59  ;;  %v3869_v35 = vld [vmem:[#allocation23 + $0x80] sm:$0xff] }
 0xc1b   : > { %v6816_v36 = vpop.f32.mrf.mxu1  ;;  %4795 = vmatprep.subr.bf16.mxu0 %v6450_v7  ;;  %v3873_v4 = vld [vmem:[#allocation23 + $0xa0] sm:$0xff]  ;;  %v6522_v7 = vcombine.high %v3973_v63, %v3977_v60  ;;  %v3930_v63 = vld [vmem:[#allocation23 + $0x268] sm:$0xff] }
 0xc1c   : > { %v6810_v38 = vpop.f32.mrf.mxu0  ;;  %v3870_v36 = vld [vmem:[#allocation23 + $0x88] sm:$0xff] }
 0xc1d   : > { %v3874_v38 = vld [vmem:[#allocation23 + $0xa8] sm:$0xff] }
 0xc1e   : > { %4796 = vmatpush1.bf16.msra.mxu0 %v6449_v13 }
 0xc1f   : > { %4797 = vmatprep.subr.bf16.mxu0 %v6442_v14 }
 0xc22   : > { %4798 = vmatpush1.bf16.msra.mxu0 %v6441_v20 }
 0xc23   : > { %4799 = vmatprep.subr.bf16.mxu0 %v6434_v24 }
 0xc26   : > { %4800 = vmatpush1.bf16.msra.mxu0 %v6433_v31 }
 0xc27   : > { %4801 = vmatprep.subr.bf16.mxu0 %v6426_v33 }
 0xc2a   : > { %4802 = vmatpush1.bf16.msra.mxu0 %v6425_v39  ;;  %v3954_v39 = vld [vmem:[#allocation23 + $0x328] sm:$0xff] }
 0xcd8   : > { %v3785_v40 = vpop.f32.mrf.mxu1 }
 0xcd9   : > { %v3664_v42 = vpop.f32.mrf.mxu0 }
 0xcda   : > { %v3792_v43 = vadd.f32 %v3785_v40, %v3664_v42  ;;  %v3787_v26 = vpop.f32.mrf.mxu1  ;;  %v6427_v40 = vcombine.low %v3878_v29, %v3882_v30  ;;  %v6420_v42 = vcombine.high %v3870_v36, %v3874_v38  ;;  %v3962_v30 = vld [vmem:[#allocation23 + $0x368] sm:$0xff] }
 0xcdb   : > { %v3666_v45 = vpop.f32.mrf.mxu0  ;;  %v6508_v33 = vcombine.high %v3958_v28, %v3962_v30 }
 0xcdc   : > { %v3805_v46 = vadd.f32 %v3798_v41, %v3792_v43  ;;  %v3793_v47 = vadd.f32 %v3787_v26, %v3666_v45  ;;  %v3789_v48 = vpop.f32.mrf.mxu1  ;;  %v6418_v41 = vcombine.high %v3869_v35, %v3873_v4  ;;  %v3861_v43 = vld [vmem:[#allocation23 + $0x40] sm:$0xff]  ;;  %v3866_v45 = vld [vmem:[#allocation23 + $0x68] sm:$0xff] }
 0xcdd   : > { %v3668_v49 = vpop.f32.mrf.mxu0  ;;  %v3865_v26 = vld [vmem:[#allocation23 + $0x60] sm:$0xff] }
 0xcde   : > { %v3806_v50 = vadd.f32 %v3802_v44, %v3793_v47  ;;  %v3790_v51 = vpop.f32.mrf.mxu1  ;;  %v8698_v53 = vadd.f32 %v3805_v46, %v8622_v21  ;;  %v3902_v21 = vld [vmem:[#allocation23 + $0x188] sm:$0xff]  ;;  %v6417_v46 = vcombine.low %v3869_v35, %v3873_v4  ;;  %4803 = vmatprep.subr.bf16.mxu0 %v6418_v41  ;;  %v6419_v47 = vcombine.low %v3870_v36, %v3874_v38  ;;  %v3953_v35 = vld [vmem:[#allocation23 + $0x320] sm:$0xff] }
 0xcdf   : > { %v3669_v52 = vpop.f32.mrf.mxu0  ;;  %v6451_v37 = vcombine.low %v3902_v21, %v3906_v8  ;;  %v3862_v44 = vld [vmem:[#allocation23 + $0x48] sm:$0xff]  ;;  %v6410_v48 = vcombine.high %v3861_v43, %v3865_v26  ;;  %v3857_v51 = vld [vmem:[#allocation23 + $0x20] sm:$0xff]  ;;  %v6409_v56 = vcombine.low %v3861_v43, %v3865_v26 }
 0xce0   : > { %v8701_v54 = vadd.f32 %v3806_v50, %v8625_v23  ;;  %v6452_v23 = vcombine.high %v3902_v21, %v3906_v8  ;;  %v6412_v49 = vcombine.high %v3862_v44, %v3866_v45  ;;  %v3853_v50 = vld [vmem:[#allocation23] sm:$0xff]  ;;  %v3854_v52 = vld [vmem:[#allocation23 + $0x8] sm:$0xff]  ;;  %4804 = vmatpush1.bf16.msra.mxu0 %v6417_v46  ;;  %v6411_v57 = vcombine.low %v3862_v44, %v3866_v45 }
 0xce1   : > { %4805 = vmatprep.subr.bf16.mxu0 %v6410_v48  ;;  %v6402_v58 = vcombine.high %v3853_v50, %v3857_v51  ;;  %v6401_v3 = vcombine.low %v3853_v50, %v3857_v51  ;;  %v6524_v21 = vcombine.high %v3974_v61, %v3978_v62  ;;  %v3965_v8 = vld [vmem:[#allocation23 + $0x380] sm:$0xff]  ;;  %v3950_v4 = vld [vmem:[#allocation23 + $0x308] sm:$0xff] }
 0xce2   : > { %v3811_v55 = vadd.f32 %v8701_v54, %v8698_v53  ;;  %4836 = vmatprep.subr.bf16.mxu1 %v6452_v23  ;;  %v3966_v23 = vld [vmem:[#allocation23 + $0x388] sm:$0xff]  ;;  %v6514_v13 = vcombine.high %v3965_v8, %v3969_v9  ;;  %v6513_v14 = vcombine.low %v3965_v8, %v3969_v9  ;;  %v3945_v41 = vld [vmem:[#allocation23 + $0x2e0] sm:$0xff]  ;;  %v6500_v43 = vcombine.high %v3950_v4, %v3954_v39 }
 0xce3   : > { %4837 = vmatpush1.bf16.msra.mxu1 %v6451_v37  ;;  %v6516_v37 = vcombine.high %v3966_v23, %v3970_v10  ;;  %v3942_v44 = vld [vmem:[#allocation23 + $0x2c8] sm:$0xff]  ;;  %v3933_v46 = vld [vmem:[#allocation23 + $0x280] sm:$0xff] }
 0xce4   : > { %3812 = vadd.xlane.f32.xlu0 %v3811_v55  ;;  %4838 = vmatprep.subr.bf16.mxu1 %v6444_v15  ;;  %v3858_v55 = vld [vmem:[#allocation23 + $0x28] sm:$0xff]  ;;  %v6515_v15 = vcombine.low %v3966_v23, %v3970_v10  ;;  %v3937_v48 = vld [vmem:[#allocation23 + $0x2a0] sm:$0xff] }
 0xce5   : > { %v6404_v59 = vcombine.high %v3854_v52, %v3858_v55  ;;  %4806 = vmatpush1.bf16.msra.mxu0 %v6409_v56  ;;  %v6403_v5 = vcombine.low %v3854_v52, %v3858_v55  ;;  %v3946_v45 = vld [vmem:[#allocation23 + $0x2e8] sm:$0xff]  ;;  %v6482_v55 = vcombine.high %v3933_v46, %v3937_v48  ;;  %v6481_v60 = vcombine.low %v3933_v46, %v3937_v48 }
 0xce6   : > { %4807 = vmatprep.subr.bf16.mxu0 %v6402_v58  ;;  %v3938_v50 = vld [vmem:[#allocation23 + $0x2a8] sm:$0xff]  ;;  %v6491_v52 = vcombine.low %v3942_v44, %v3946_v45  ;;  %v3929_v58 = vld [vmem:[#allocation23 + $0x260] sm:$0xff] }
 0xce7   : > { %4839 = vmatpush1.bf16.msra.mxu1 %v6443_v22  ;;  %v3922_v8 = vld [vmem:[#allocation23 + $0x228] sm:$0xff] }
 0xce8   : > { %4840 = vmatprep.subr.bf16.mxu1 %v6436_v25  ;;  %v3957_v25 = vld [vmem:[#allocation23 + $0x340] sm:$0xff] }
 0xce9   : > { %4808 = vmatpush1.bf16.msra.mxu0 %v6401_v3  ;;  %v6506_v29 = vcombine.high %v3957_v25, %v3961_v27  ;;  %v6505_v31 = vcombine.low %v3957_v25, %v3961_v27 }
 0xcea   : > { %4809 = vmatprep.subr.bf16.mxu0 %v6522_v7  ;;  %v3921_v7 = vld [vmem:[#allocation23 + $0x220] sm:$0xff] }
 0xceb   : > { %4841 = vmatpush1.bf16.msra.mxu1 %v6435_v32  ;;  %v6507_v32 = vcombine.low %v3958_v28, %v3962_v30  ;;  %v3810_v30 = vld [vmem:[%s8949_s25] sm:$0x3] }
 0xcec   : > { %4842 = vmatprep.subr.bf16.mxu1 %v6428_v34  ;;  %v3949_v34 = vld [vmem:[#allocation23 + $0x300] sm:$0xff] }
 0xced   : > { %4810 = vmatpush2.bf16.msra.mxu0 %v6521_v11  ;;  %v6497_v36 = vcombine.low %v3949_v34, %v3953_v35  ;;  %v6498_v38 = vcombine.high %v3949_v34, %v3953_v35  ;;  %v3848_v35 = vrot.slane %v3810_v30, %v8562_v1 }
 0xcee   : > { %4811 = vmatprep.subr.bf16.mxu0 %v6514_v13 }
 0xcef   : > { %4843 = vmatpush1.bf16.msra.mxu1 %v6427_v40  ;;  %v3941_v40 = vld [vmem:[#allocation23 + $0x2c0] sm:$0xff] }
 0xcf0   : > { %4844 = vmatprep.subr.bf16.mxu1 %v6420_v42  ;;  %v6499_v42 = vcombine.low %v3950_v4, %v3954_v39  ;;  %v6490_v26 = vcombine.high %v3941_v40, %v3945_v41  ;;  %v6489_v51 = vcombine.low %v3941_v40, %v3945_v41 }
 0xcf1   : > { %4812 = vmatpush2.bf16.msra.mxu0 %v6513_v14  ;;  %v3915_v14 = vld [vmem:[#allocation23 + $0x1f0] sm:$0xff] }
 0xcf2   : > { %4813 = vmatprep.subr.bf16.mxu0 %v6506_v29  ;;  %v3809_v29 = vld [vmem:[%s8843_s17] sm:$0x3] }
 0xcf3   : > { %4845 = vmatpush1.bf16.msra.mxu1 %v6419_v47  ;;  %v6492_v47 = vcombine.high %v3942_v44, %v3946_v45  ;;  %v3908_v44 = vld [vmem:[#allocation23 + $0x1b8] sm:$0xff] }
 0xcf4   : > { %4846 = vmatprep.subr.bf16.mxu1 %v6412_v49  ;;  %v3934_v49 = vld [vmem:[#allocation23 + $0x288] sm:$0xff] }
 0xcf5   : > { %4814 = vmatpush2.bf16.msra.mxu0 %v6505_v31  ;;  %v6484_v56 = vcombine.high %v3934_v49, %v3938_v50  ;;  %v6483_v61 = vcombine.low %v3934_v49, %v3938_v50  ;;  %v3835_v31 = vrot.slane %v3809_v29, %v8562_v1  ;;  %v3899_v49 = vld [vmem:[#allocation23 + $0x170] sm:$0xff]  ;;  %v3900_v50 = vld [vmem:[#allocation23 + $0x178] sm:$0xff] }
 0xcf6   : > { %4815 = vmatprep.subr.bf16.mxu0 %v6498_v38 }
 0xcf7   : > { %4847 = vmatpush1.bf16.msra.mxu1 %v6411_v57  ;;  %v3925_v57 = vld [vmem:[#allocation23 + $0x240] sm:$0xff] }
 0xcf8   : > { %4848 = vmatprep.subr.bf16.mxu1 %v6404_v59  ;;  %v3926_v59 = vld [vmem:[#allocation23 + $0x248] sm:$0xff]  ;;  %v6474_v62 = vcombine.high %v3925_v57, %v3929_v58  ;;  %v6473_v9 = vcombine.low %v3925_v57, %v3929_v58  ;;  %v3887_v57 = vld [vmem:[#allocation23 + $0x110] sm:$0xff] }
 0xcf9   : > { %4816 = vmatpush2.bf16.msra.mxu0 %v6497_v36  ;;  %v6476_v3 = vcombine.high %v3926_v59, %v3930_v63  ;;  %v6475_v23 = vcombine.low %v3926_v59, %v3930_v63  ;;  %v3844_v36 = vrot.slane %v3810_v30, %v8565_v2  ;;  %v3891_v58 = vld [vmem:[#allocation23 + $0x130] sm:$0xff]  ;;  %v3888_v59 = vld [vmem:[#allocation23 + $0x118] sm:$0xff] }
 0xcfa   : > { %4817 = vmatprep.subr.bf16.mxu0 %v6490_v26  ;;  %v3904_v26 = vld [vmem:[#allocation23 + $0x198] sm:$0xff] }
 0xcfb   : > { %4849 = vmatpush1.bf16.msra.mxu1 %v6403_v5  ;;  %v3917_v5 = vld [vmem:[#allocation23 + $0x200] sm:$0xff]  ;;  %v6456_v48 = vcombine.high %v3904_v26, %v3908_v44  ;;  %v3892_v63 = vld [vmem:[#allocation23 + $0x138] sm:$0xff] }
 0xcfc   : > { %4850 = vmatprep.subr.bf16.mxu1 %v6524_v21  ;;  %v3918_v21 = vld [vmem:[#allocation23 + $0x208] sm:$0xff]  ;;  %v6466_v10 = vcombine.high %v3917_v5, %v3921_v7 }
 0xcfd   : > { %4818 = vmatpush2.bf16.msra.mxu0 %v6489_v51  ;;  %v6468_v11 = vcombine.high %v3918_v21, %v3922_v8  ;;  %v6467_v13 = vcombine.low %v3918_v21, %v3922_v8  ;;  %v3880_v21 = vld [vmem:[#allocation23 + $0xd8] sm:$0xff] }
 0xcfe   : > { %4819 = vmatprep.subr.bf16.mxu0 %v6482_v55  ;;  %v3884_v8 = vld [vmem:[#allocation23 + $0xf8] sm:$0xff] }
 0xcff   : > { %4851 = vmatpush2.bf16.msra.mxu1 %v6523_v12  ;;  %v6465_v12 = vcombine.low %v3917_v5, %v3921_v7  ;;  %v3879_v5 = vld [vmem:[#allocation23 + $0xd0] sm:$0xff] }
 0xd00   : > { %4852 = vmatprep.subr.bf16.mxu1 %v6516_v37  ;;  %v3911_v37 = vld [vmem:[#allocation23 + $0x1d0] sm:$0xff] }
 0xd01   : > { %4820 = vmatpush2.bf16.msra.mxu0 %v6481_v60  ;;  %v3883_v7 = vld [vmem:[#allocation23 + $0xf0] sm:$0xff] }
 0xd02   : > { %4821 = vmatprep.subr.bf16.mxu0 %v6474_v62  ;;  %v6438_v62 = vcombine.high %v3887_v57, %v3891_v58 }
 0xd03   : > { %4853 = vmatpush2.bf16.msra.mxu1 %v6515_v15  ;;  %v3912_v15 = vld [vmem:[#allocation23 + $0x1d8] sm:$0xff] }
 0xd04   : > { %4854 = vmatprep.subr.bf16.mxu1 %v6508_v33 }
 0xd05   : > { %4822 = vmatpush2.bf16.msra.mxu0 %v6473_v9  ;;  %v6437_v9 = vcombine.low %v3887_v57, %v3891_v58  ;;  %v3963_v57 = vld [vmem:[#allocation23 + $0x370] sm:$0xff]  ;;  %v3960_v58 = vld [vmem:[#allocation23 + $0x358] sm:$0xff] }
 0xd06   : > { %4823 = vmatprep.subr.bf16.mxu0 %v6466_v10  ;;  %v6430_v10 = vcombine.high %v3879_v5, %v3883_v7 }
 0xd07   : > { %4855 = vmatpush2.bf16.msra.mxu1 %v6507_v32  ;;  %v3831_v32 = vrot.slane %v3809_v29, %v8565_v2 }
 0xd08   : > { %4856 = vmatprep.subr.bf16.mxu1 %v6500_v43  ;;  %v3907_v43 = vld [vmem:[#allocation23 + $0x1b0] sm:$0xff] }
 0xd09   : > { %4824 = vmatpush2.bf16.msra.mxu0 %v6465_v12  ;;  %v3871_v12 = vld [vmem:[#allocation23 + $0x90] sm:$0xff] }
 0xd0b   : > { %4857 = vmatpush2.bf16.msra.mxu1 %v6499_v42  ;;  %v3903_v42 = vld [vmem:[#allocation23 + $0x190] sm:$0xff] }
 0xd0c   : > { %4858 = vmatprep.subr.bf16.mxu1 %v6492_v47  ;;  %v3895_v47 = vld [vmem:[#allocation23 + $0x150] sm:$0xff]  ;;  %v6453_v51 = vcombine.low %v3903_v42, %v3907_v43 }
 0xd0d   : > { %v6446_v55 = vcombine.high %v3895_v47, %v3899_v49  ;;  %v6445_v60 = vcombine.low %v3895_v47, %v3899_v49  ;;  %v3968_v49 = vld [vmem:[#allocation23 + $0x398] sm:$0xff] }
 0xd0f   : > { %4859 = vmatpush2.bf16.msra.mxu1 %v6491_v52  ;;  %v6455_v52 = vcombine.low %v3904_v26, %v3908_v44 }
 0xd10   : > { %4860 = vmatprep.subr.bf16.mxu1 %v6484_v56 }
 0xd13   : > { %4861 = vmatpush2.bf16.msra.mxu1 %v6483_v61 }
 0xd14   : > { %4862 = vmatprep.subr.bf16.mxu1 %v6476_v3  ;;  %v6440_v3 = vcombine.high %v3888_v59, %v3892_v63 }
 0xd17   : > { %4863 = vmatpush2.bf16.msra.mxu1 %v6475_v23  ;;  %v6439_v23 = vcombine.low %v3888_v59, %v3892_v63  ;;  %v3964_v59 = vld [vmem:[#allocation23 + $0x378] sm:$0xff] }
 0xd18   : > { %4864 = vmatprep.subr.bf16.mxu1 %v6468_v11  ;;  %v6432_v11 = vcombine.high %v3880_v21, %v3884_v8 }
 0xd1b   : > { %4865 = vmatpush2.bf16.msra.mxu1 %v6467_v13  ;;  %v3875_v13 = vld [vmem:[#allocation23 + $0xb0] sm:$0xff] }
 0xd6d   : > { %v3813_v16 = vpop.xlane.xlu0 %3812 }
 0xd6e   : > { %v3814_v17 = vmul.f32 0.00390625, %v3813_v16  ;;  %v6462_v16 = vcombine.high %v3911_v37, %v3915_v14 }
 0xd70   : > { %v8706_v18 = vsub.f32 %v8698_v53, %v3814_v17  ;;  %v8709_v19 = vsub.f32 %v8701_v54, %v3814_v17  ;;  %v3916_v17 = vld [vmem:[#allocation23 + $0x1f8] sm:$0xff]  ;;  %4875 = vmatprep.subr.bf16.mxu0 %v6462_v16  ;;  %v6431_v16 = vcombine.low %v3880_v21, %v3884_v8 }
 0xd71   : > { %v3956_v21 = vld [vmem:[#allocation23 + $0x338] sm:$0xff] }
 0xd72   : > { %v3817_v20 = vmul.f32 %v8706_v18, %v8706_v18  ;;  %v3818_v22 = vmul.f32 %v8709_v19, %v8709_v19 }
 0xd74   : > { %v3819_v24 = vadd.f32 %v3818_v22, %v3817_v20  ;;  %v6461_v20 = vcombine.low %v3911_v37, %v3915_v14  ;;  %v6463_v22 = vcombine.low %v3912_v15, %v3916_v17  ;;  %v3872_v37 = vld [vmem:[#allocation23 + $0x98] sm:$0xff] }
 0xd75   : > { %v3876_v14 = vld [vmem:[#allocation23 + $0xb8] sm:$0xff] }
 0xd76   : > { %3820 = vadd.xlane.f32.xlu1 %v3819_v24  ;;  %v6464_v24 = vcombine.high %v3912_v15, %v3916_v17  ;;  %v6429_v15 = vcombine.low %v3879_v5, %v3883_v7  ;;  %v6422_v17 = vcombine.high %v3871_v12, %v3875_v13  ;;  %v6423_v29 = vcombine.low %v3872_v37, %v3876_v14  ;;  %v3955_v5 = vld [vmem:[#allocation23 + $0x330] sm:$0xff]  ;;  %v3952_v7 = vld [vmem:[#allocation23 + $0x318] sm:$0xff] }
 0xd78   : > { %4916 = vmatprep.subr.bf16.mxu1 %v6464_v24  ;;  %v3867_v24 = vld [vmem:[#allocation23 + $0x70] sm:$0xff] }
 0xdff   : > { %v3821_v25 = vpop.xlane.xlu1 %3820 }
 0xe00   : > { %v3822_v27 = vmul.f32 0.00390625, %v3821_v25  ;;  %v3864_v25 = vld [vmem:[#allocation23 + $0x58] sm:$0xff] }
 0xe02   : > { %v3823_v28 = vadd.f32 1e-05, %v3822_v27  ;;  %v3868_v27 = vld [vmem:[#allocation23 + $0x78] sm:$0xff] }
 0xe04   : > { %7571 = vrsqrt.f32 %v3823_v28  ;;  %v6421_v28 = vcombine.low %v3871_v12, %v3875_v13  ;;  %v3947_v12 = vld [vmem:[#allocation23 + $0x2f0] sm:$0xff]  ;;  %v3944_v13 = vld [vmem:[#allocation23 + $0x2d8] sm:$0xff] }
 0xe11   : > { %v7572_v33 = vpop.eup %7571 }
 0xe12   : > { %v3826_v34 = vmul.f32 %v7572_v33, %v8709_v19  ;;  %v3825_v4 = vmul.f32 %v7572_v33, %v8706_v18  ;;  %v6454_v19 = vcombine.high %v3903_v42, %v3907_v43  ;;  %v3896_v18 = vld [vmem:[#allocation23 + $0x158] sm:$0xff]  ;;  %v3859_v33 = vld [vmem:[#allocation23 + $0x30] sm:$0xff] }
 0xe13   : > { %v6448_v56 = vcombine.high %v3896_v18, %v3900_v50  ;;  %v6447_v61 = vcombine.low %v3896_v18, %v3900_v50  ;;  %v3976_v42 = vld [vmem:[#allocation23 + $0x3d8] sm:$0xff] }
 0xe14   : > { %v3839_v38 = vmul.f32 %v3835_v31, %v3826_v34  ;;  %v3838_v39 = vmul.f32 %v3831_v32, %v3825_v4  ;;  %v6416_v31 = vcombine.high %v3864_v25, %v3868_v27  ;;  %v3855_v32 = vld [vmem:[#allocation23 + $0x10] sm:$0xff]  ;;  %v3856_v34 = vld [vmem:[#allocation23 + $0x18] sm:$0xff] }
 0xe15   : > { %v3980_v43 = vld [vmem:[#allocation23 + $0x3f8] sm:$0xff]  ;;  %v6405_v26 = vcombine.low %v3855_v32, %v3859_v33 }
 0xe16   : > { %v3852_v40 = vadd.f32 %v3848_v35, %v3839_v38  ;;  %v3851_v41 = vadd.f32 %v3844_v36, %v3838_v39  ;;  %v3860_v35 = vld [vmem:[#allocation23 + $0x38] sm:$0xff]  ;;  %v6415_v36 = vcombine.low %v3864_v25, %v3868_v27  ;;  %v6406_v38 = vcombine.high %v3855_v32, %v3859_v33  ;;  %v3931_v32 = vld [vmem:[#allocation23 + $0x270] sm:$0xff] }
 0xe17   : > { %v6408_v39 = vcombine.high %v3856_v34, %v3860_v35  ;;  %v6407_v44 = vcombine.low %v3856_v34, %v3860_v35  ;;  %v6528_v47 = vcombine.high %v3976_v42, %v3980_v43  ;;  %v3972_v18 = vld [vmem:[#allocation23 + $0x3b8] sm:$0xff] }
 0xe18   : > { %v4110_v45 = vpack.c.bf16 %v3852_v40, %v3852_v40  ;;  %v8727_v46 = vpack.c.bf16 %v3851_v41, %v3851_v41  ;;  %v3975_v40 = vld [vmem:[#allocation23 + $0x3d0] sm:$0xff]  ;;  %v3940_v25 = vld [vmem:[#allocation23 + $0x2b8] sm:$0xff] }
 0xe19   : > { %v3979_v41 = vld [vmem:[#allocation23 + $0x3f0] sm:$0xff]  ;;  %v3928_v33 = vld [vmem:[#allocation23 + $0x258] sm:$0xff] }
 0xe1a   : > { %4825 = vmatprep.mubr.bf16.mxu0 %v4110_v45  ;;  %4866 = vmatprep.mubr.bf16.mxu1 %v4110_v45  ;;  %v6525_v50 = vcombine.low %v3975_v40, %v3979_v41  ;;  %v3932_v34 = vld [vmem:[#allocation23 + $0x278] sm:$0xff] }
 0xe1b   : > { %4826 = vmatmul.mubr.bf16.vlgmr.msra.gmra.mxu0 %v8727_v46  ;;  %4867 = vmatmul.mubr.bf16.vlgmr.msra.gmra.mxu1 %v8727_v46 }
 0xe1c   : > { %4876 = vmatpush1.bf16.msra.mxu0 %v6461_v20  ;;  %4917 = vmatpush1.bf16.msra.mxu1 %v6463_v22  ;;  %v6424_v20 = vcombine.high %v3872_v37, %v3876_v14  ;;  %v3863_v22 = vld [vmem:[#allocation23 + $0x50] sm:$0xff]  ;;  %v3948_v37 = vld [vmem:[#allocation23 + $0x2f8] sm:$0xff] }
 0xe1d   : > { %4907 = vmatprep.mubr.bf16.mxu0 %v4110_v45  ;;  %4948 = vmatprep.mubr.bf16.mxu1 %v4110_v45  ;;  %v6414_v30 = vcombine.high %v3863_v22, %v3867_v24  ;;  %v6413_v4 = vcombine.low %v3863_v22, %v3867_v24  ;;  %v6526_v45 = vcombine.high %v3975_v40, %v3979_v41  ;;  %v3939_v22 = vld [vmem:[#allocation23 + $0x2b0] sm:$0xff]  ;;  %v3936_v24 = vld [vmem:[#allocation23 + $0x298] sm:$0xff] }
 0xe1e   : > { %4877 = vmatprep.subr.bf16.mxu0 %v6454_v19  ;;  %4918 = vmatprep.subr.bf16.mxu1 %v6456_v48  ;;  %v3967_v19 = vld [vmem:[#allocation23 + $0x390] sm:$0xff]  ;;  %v3920_v41 = vld [vmem:[#allocation23 + $0x218] sm:$0xff] }
 0xe1f   : > { %v3971_v48 = vld [vmem:[#allocation23 + $0x3b0] sm:$0xff] }
 0xe20   : > { %4878 = vmatpush1.bf16.msra.mxu0 %v6453_v51  ;;  %4919 = vmatpush1.bf16.msra.mxu1 %v6455_v52  ;;  %v6527_v51 = vcombine.low %v3976_v42, %v3980_v43  ;;  %v6518_v52 = vcombine.high %v3967_v19, %v3971_v48  ;;  %v6517_v63 = vcombine.low %v3967_v19, %v3971_v48  ;;  %v3923_v40 = vld [vmem:[#allocation23 + $0x230] sm:$0xff]  ;;  %v3924_v42 = vld [vmem:[#allocation23 + $0x238] sm:$0xff] }
 0xe21   : > { %4879 = vmatprep.subr.bf16.mxu0 %v6446_v55  ;;  %4920 = vmatprep.subr.bf16.mxu1 %v6448_v56  ;;  %v6520_v55 = vcombine.high %v3968_v49, %v3972_v18  ;;  %v3959_v56 = vld [vmem:[#allocation23 + $0x350] sm:$0xff]  ;;  %v6471_v19 = vcombine.low %v3920_v41, %v3924_v42 }
 0xe22   : > { %v6509_v8 = vcombine.low %v3959_v56, %v3963_v57  ;;  %v7361_v48 = vld [vmem:[#allocation25 + $0x74] ss:$8 sps:$4 sm:$0xff]  }
 0xe24   : > { %4880 = vmatpush1.bf16.msra.mxu0 %v6445_v60  ;;  %4921 = vmatpush1.bf16.msra.mxu1 %v6447_v61  ;;  %v6519_v60 = vcombine.low %v3968_v49, %v3972_v18  ;;  %v6510_v61 = vcombine.high %v3959_v56, %v3963_v57  ;;  %v7364_v49 = vld [vmem:[#allocation25 + $0x174] ss:$8 sps:$4 sm:$0xff]   ;;  %v7359_v18 = vld [vmem:[#allocation25 + $0x70] ss:$8 sps:$4 sm:$0xff]   ;;  %v7368_v56 = vld [vmem:[#allocation25 + $0x160] ss:$8 sps:$4 sm:$0xff]  }
 0xe25   : > { %4881 = vmatprep.subr.bf16.mxu0 %v6438_v62  ;;  %4922 = vmatprep.subr.bf16.mxu1 %v6440_v3  ;;  %v6512_v62 = vcombine.high %v3960_v58, %v3964_v59  ;;  %v3951_v3 = vld [vmem:[#allocation23 + $0x310] sm:$0xff] }
 0xe26   : > { %v6501_v14 = vcombine.low %v3951_v3, %v3955_v5  ;;  %v7373_v57 = vld [vmem:[#allocation25 + $0x54] ss:$8 sps:$4 sm:$0xff]  }
 0xe28   : > { %4882 = vmatpush1.bf16.msra.mxu0 %v6437_v9  ;;  %4923 = vmatpush1.bf16.msra.mxu1 %v6439_v23  ;;  %v6511_v9 = vcombine.low %v3960_v58, %v3964_v59  ;;  %v6502_v23 = vcombine.high %v3951_v3, %v3955_v5  ;;  %v7376_v58 = vld [vmem:[#allocation25 + $0x154] ss:$8 sps:$4 sm:$0xff]   ;;  %v7371_v59 = vld [vmem:[#allocation25 + $0x50] ss:$8 sps:$4 sm:$0xff]  }
 0xe29   : > { %4883 = vmatprep.subr.bf16.mxu0 %v6430_v10  ;;  %4924 = vmatprep.subr.bf16.mxu1 %v6432_v11  ;;  %v6504_v10 = vcombine.high %v3952_v7, %v3956_v21  ;;  %v3943_v11 = vld [vmem:[#allocation23 + $0x2d0] sm:$0xff] }
 0xe2a   : > { %v6493_v27 = vcombine.low %v3943_v11, %v3947_v12  ;;  %v7385_v3 = vld [vmem:[#allocation25 + $0x34] ss:$8 sps:$4 sm:$0xff]  }
 0xe2b   : > { %v7388_v5 = vld [vmem:[#allocation25 + $0x134] ss:$8 sps:$4 sm:$0xff]  }
 0xe2c   : > { %4884 = vmatpush1.bf16.msra.mxu0 %v6429_v15  ;;  %4925 = vmatpush1.bf16.msra.mxu1 %v6431_v16  ;;  %v6503_v15 = vcombine.low %v3952_v7, %v3956_v21  ;;  %v6494_v16 = vcombine.high %v3943_v11, %v3947_v12  ;;  %v7383_v7 = vld [vmem:[#allocation25 + $0x30] ss:$8 sps:$4 sm:$0xff]   ;;  %v7397_v11 = vld [vmem:[#allocation25 + $0x14] ss:$8 sps:$4 sm:$0xff]  }
 0xe2d   : > { %4885 = vmatprep.subr.bf16.mxu0 %v6422_v17  ;;  %4926 = vmatprep.subr.bf16.mxu1 %v6424_v20  ;;  %v6496_v17 = vcombine.high %v3944_v13, %v3948_v37  ;;  %v3935_v20 = vld [vmem:[#allocation23 + $0x290] sm:$0xff] }
 0xe2e   : > { %v6485_v35 = vcombine.low %v3935_v20, %v3939_v22  ;;  %v7386_v21 = vld [vmem:[#allocation25 + $0x130] ss:$8 sps:$4 sm:$0xff]   ;;  %v7400_v12 = vld [vmem:[#allocation25 + $0x114] ss:$8 sps:$4 sm:$0xff]  }
 0xe30   : > { %4886 = vmatpush1.bf16.msra.mxu0 %v6421_v28  ;;  %4927 = vmatpush1.bf16.msra.mxu1 %v6423_v29  ;;  %v6495_v28 = vcombine.low %v3944_v13, %v3948_v37  ;;  %v6486_v29 = vcombine.high %v3935_v20, %v3939_v22  ;;  %v7395_v13 = vld [vmem:[#allocation25 + $0x10] ss:$8 sps:$4 sm:$0xff]   ;;  %v7409_v20 = vld [vmem:[#allocation25 + $0xf4] ss:$8 sps:$4 sm:$0xff]  }
 0xe31   : > { %4887 = vmatprep.subr.bf16.mxu0 %v6414_v30  ;;  %4928 = vmatprep.subr.bf16.mxu1 %v6416_v31  ;;  %v6488_v30 = vcombine.high %v3936_v24, %v3940_v25  ;;  %v3927_v31 = vld [vmem:[#allocation23 + $0x250] sm:$0xff] }
 0xe32   : > { %v6477_v43 = vcombine.low %v3927_v31, %v3931_v32  ;;  %v7398_v37 = vld [vmem:[#allocation25 + $0x110] ss:$8 sps:$4 sm:$0xff]   ;;  %v7412_v22 = vld [vmem:[#allocation25 + $0x1f4] ss:$8 sps:$4 sm:$0xff]  }
 0xe34   : > { %4888 = vmatpush1.bf16.msra.mxu0 %v6413_v4  ;;  %4929 = vmatpush1.bf16.msra.mxu1 %v6415_v36  ;;  %v6487_v4 = vcombine.low %v3936_v24, %v3940_v25  ;;  %v6478_v36 = vcombine.high %v3927_v31, %v3931_v32  ;;  %v7407_v24 = vld [vmem:[#allocation25 + $0xf0] ss:$8 sps:$4 sm:$0xff]   ;;  %v7421_v31 = vld [vmem:[#allocation25 + $0xd4] ss:$8 sps:$4 sm:$0xff]  }
 0xe35   : > { %4889 = vmatprep.subr.bf16.mxu0 %v6406_v38  ;;  %4930 = vmatprep.subr.bf16.mxu1 %v6408_v39  ;;  %v6480_v38 = vcombine.high %v3928_v33, %v3932_v34  ;;  %v3919_v39 = vld [vmem:[#allocation23 + $0x210] sm:$0xff] }
 0xe36   : > { %v7410_v25 = vld [vmem:[#allocation25 + $0x1f0] ss:$8 sps:$4 sm:$0xff]   ;;  %v7424_v32 = vld [vmem:[#allocation25 + $0x1d4] ss:$8 sps:$4 sm:$0xff]  }
 0xe38   : > { %4890 = vmatpush1.bf16.msra.mxu0 %v6405_v26  ;;  %4931 = vmatpush1.bf16.msra.mxu1 %v6407_v44  ;;  %v6479_v26 = vcombine.low %v3928_v33, %v3932_v34  ;;  %v6470_v44 = vcombine.high %v3919_v39, %v3923_v40  ;;  %v7419_v33 = vld [vmem:[#allocation25 + $0xd0] ss:$8 sps:$4 sm:$0xff]  }
 0xe39   : > { %4891 = vmatprep.subr.bf16.mxu0 %v6526_v45  ;;  %4932 = vmatprep.subr.bf16.mxu1 %v6528_v47  ;;  %v6472_v45 = vcombine.high %v3920_v41, %v3924_v42  ;;  %v6469_v47 = vcombine.low %v3919_v39, %v3923_v40  ;;  %v7422_v34 = vld [vmem:[#allocation25 + $0x1d0] ss:$8 sps:$4 sm:$0xff]   ;;  %v7433_v39 = vld [vmem:[#allocation25 + $0xb4] ss:$8 sps:$4 sm:$0xff]  }
 0xe3a   : > { %v7436_v40 = vld [vmem:[#allocation25 + $0x1b4] ss:$8 sps:$4 sm:$0xff]   ;;  %v7431_v41 = vld [vmem:[#allocation25 + $0xb0] ss:$8 sps:$4 sm:$0xff]  }
 0xe3b   : > { %v7434_v42 = vld [vmem:[#allocation25 + $0x1b0] ss:$8 sps:$4 sm:$0xff]  }
 0xe3c   : > { %4892 = vmatpush2.bf16.msra.mxu0 %v6525_v50  ;;  %4933 = vmatpush2.bf16.msra.mxu1 %v6527_v51  ;;  %v7362_v50 = vld [vmem:[#allocation25 + $0x170] ss:$8 sps:$4 sm:$0xff]   ;;  %v7367_v51 = vld [vmem:[#allocation25 + $0x64] ss:$8 sps:$4 sm:$0xff]  }
 0xe3d   : > { %4893 = vmatprep.subr.bf16.mxu0 %v6518_v52  ;;  %4934 = vmatprep.subr.bf16.mxu1 %v6520_v55  ;;  %v7370_v52 = vld [vmem:[#allocation25 + $0x164] ss:$8 sps:$4 sm:$0xff]   ;;  %v7365_v55 = vld [vmem:[#allocation25 + $0x60] ss:$8 sps:$4 sm:$0xff]  }
 0xe40   : > { %4894 = vmatpush2.bf16.msra.mxu0 %v6517_v63  ;;  %4935 = vmatpush2.bf16.msra.mxu1 %v6519_v60  ;;  %v7374_v63 = vld [vmem:[#allocation25 + $0x150] ss:$8 sps:$4 sm:$0xff]   ;;  %v7379_v60 = vld [vmem:[#allocation25 + $0x44] ss:$8 sps:$4 sm:$0xff]  }
 0xe41   : > { %4895 = vmatprep.subr.bf16.mxu0 %v6510_v61  ;;  %4936 = vmatprep.subr.bf16.mxu1 %v6512_v62  ;;  %v7382_v61 = vld [vmem:[#allocation25 + $0x144] ss:$8 sps:$4 sm:$0xff]   ;;  %v7377_v62 = vld [vmem:[#allocation25 + $0x40] ss:$8 sps:$4 sm:$0xff]  }
 0xe44   : > { %4896 = vmatpush2.bf16.msra.mxu0 %v6509_v8  ;;  %4937 = vmatpush2.bf16.msra.mxu1 %v6511_v9  ;;  %v7391_v8 = vld [vmem:[#allocation25 + $0x24] ss:$8 sps:$4 sm:$0xff]  }
 0xe45   : > { %4897 = vmatprep.subr.bf16.mxu0 %v6502_v23  ;;  %4938 = vmatprep.subr.bf16.mxu1 %v6504_v10  ;;  %v7394_v9 = vld [vmem:[#allocation25 + $0x124] ss:$8 sps:$4 sm:$0xff]   ;;  %v7389_v23 = vld [vmem:[#allocation25 + $0x20] ss:$8 sps:$4 sm:$0xff]  }
 0xe46   : > { %v7392_v10 = vld [vmem:[#allocation25 + $0x120] ss:$8 sps:$4 sm:$0xff]  }
 0xe48   : > { %4898 = vmatpush2.bf16.msra.mxu0 %v6501_v14  ;;  %4939 = vmatpush2.bf16.msra.mxu1 %v6503_v15  ;;  %v7403_v14 = vld [vmem:[#allocation25 + $0x4] ss:$8 sps:$4 sm:$0xff]  }
 0xe49   : > { %4899 = vmatprep.subr.bf16.mxu0 %v6494_v16  ;;  %4940 = vmatprep.subr.bf16.mxu1 %v6496_v17  ;;  %v7406_v15 = vld [vmem:[#allocation25 + $0x104] ss:$8 sps:$4 sm:$0xff]   ;;  %v7401_v16 = vld [vmem:[#allocation25] ss:$8 sps:$4 sm:$0xff]  }
 0xe4a   : > { %v7404_v17 = vld [vmem:[#allocation25 + $0x100] ss:$8 sps:$4 sm:$0xff]  }
 0xe4c   : > { %4900 = vmatpush2.bf16.msra.mxu0 %v6493_v27  ;;  %4941 = vmatpush2.bf16.msra.mxu1 %v6495_v28  ;;  %v7415_v27 = vld [vmem:[#allocation25 + $0xe4] ss:$8 sps:$4 sm:$0xff]  }
 0xe4d   : > { %4901 = vmatprep.subr.bf16.mxu0 %v6486_v29  ;;  %4942 = vmatprep.subr.bf16.mxu1 %v6488_v30  ;;  %v7418_v28 = vld [vmem:[#allocation25 + $0x1e4] ss:$8 sps:$4 sm:$0xff]   ;;  %v7413_v29 = vld [vmem:[#allocation25 + $0xe0] ss:$8 sps:$4 sm:$0xff]  }
 0xe4e   : > { %v7416_v30 = vld [vmem:[#allocation25 + $0x1e0] ss:$8 sps:$4 sm:$0xff]  }
 0xe50   : > { %4902 = vmatpush2.bf16.msra.mxu0 %v6485_v35  ;;  %4943 = vmatpush2.bf16.msra.mxu1 %v6487_v4  ;;  %v7427_v35 = vld [vmem:[#allocation25 + $0xc4] ss:$8 sps:$4 sm:$0xff]  }
 0xe51   : > { %4903 = vmatprep.subr.bf16.mxu0 %v6478_v36  ;;  %4944 = vmatprep.subr.bf16.mxu1 %v6480_v38  ;;  %v7430_v4 = vld [vmem:[#allocation25 + $0x1c4] ss:$8 sps:$4 sm:$0xff]   ;;  %v7425_v36 = vld [vmem:[#allocation25 + $0xc0] ss:$8 sps:$4 sm:$0xff]  }
 0xe52   : > { %v7428_v38 = vld [vmem:[#allocation25 + $0x1c0] ss:$8 sps:$4 sm:$0xff]  }
 0xe54   : > { %4904 = vmatpush2.bf16.msra.mxu0 %v6477_v43  ;;  %4945 = vmatpush2.bf16.msra.mxu1 %v6479_v26  ;;  %v7439_v43 = vld [vmem:[#allocation25 + $0xa4] ss:$8 sps:$4 sm:$0xff]  }
 0xe55   : > { %4905 = vmatprep.subr.bf16.mxu0 %v6470_v44  ;;  %4946 = vmatprep.subr.bf16.mxu1 %v6472_v45  ;;  %v7442_v26 = vld [vmem:[#allocation25 + $0x1a4] ss:$8 sps:$4 sm:$0xff]   ;;  %v7437_v44 = vld [vmem:[#allocation25 + $0xa0] ss:$8 sps:$4 sm:$0xff]  }
 0xe56   : > { %v7440_v45 = vld [vmem:[#allocation25 + $0x1a0] ss:$8 sps:$4 sm:$0xff]  }
 0xe58   : > { %4906 = vmatpush2.bf16.msra.mxu0 %v6469_v47  ;;  %4947 = vmatpush2.bf16.msra.mxu1 %v6471_v19  ;;  %v7445_v47 = vld [vmem:[#allocation25 + $0x94] ss:$8 sps:$4 sm:$0xff]  }
 0xe59   : > { %5677 = vmatprep.subr.bf16.mxu0 %v7361_v48  ;;  %5718 = vmatprep.subr.bf16.mxu1 %v7364_v49  ;;  %v7448_v19 = vld [vmem:[#allocation25 + $0x194] ss:$8 sps:$4 sm:$0xff]   ;;  %v7443_v48 = vld [vmem:[#allocation25 + $0x90] ss:$8 sps:$4 sm:$0xff]  }
 0xe5a   : > { %v7446_v49 = vld [vmem:[#allocation25 + $0x190] ss:$8 sps:$4 sm:$0xff]  }
 0xe5b   : > { %4908 = vmatmul.mubr.bf16.vlgmr.msra.gmra.mxu0 %v8727_v46  ;;  %4949 = vmatmul.mubr.bf16.vlgmr.msra.gmra.mxu1 %v8727_v46  ;;  %v7380_v46 = vld [vmem:[#allocation25 + $0x140] ss:$8 sps:$4 sm:$0xff]  }
 0xe5c   : > { %5678 = vmatpush1.bf16.msra.mxu0 %v7359_v18  ;;  %5719 = vmatpush1.bf16.msra.mxu1 %v7362_v50  ;;  %v7451_v18 = vld [vmem:[#allocation25 + $0x84] ss:$8 sps:$4 sm:$0xff]  }
 0xe5d   : > { %5679 = vmatprep.subr.bf16.mxu0 %v7367_v51  ;;  %5720 = vmatprep.subr.bf16.mxu1 %v7370_v52  ;;  %v7454_v50 = vld [vmem:[#allocation25 + $0x184] ss:$8 sps:$4 sm:$0xff]   ;;  %v7449_v51 = vld [vmem:[#allocation25 + $0x80] ss:$8 sps:$4 sm:$0xff]  }
 0xe5e   : > { %v7452_v52 = vld [vmem:[#allocation25 + $0x180] ss:$8 sps:$4 sm:$0xff]  }
 0xe60   : > { %5680 = vmatpush1.bf16.msra.mxu0 %v7365_v55  ;;  %5721 = vmatpush1.bf16.msra.mxu1 %v7368_v56  ;;  %v7457_v55 = vld [vmem:[#allocation25 + $0x274] ss:$8 sps:$4 sm:$0xff]  }
 0xe61   : > { %5681 = vmatprep.subr.bf16.mxu0 %v7373_v57  ;;  %5722 = vmatprep.subr.bf16.mxu1 %v7376_v58  ;;  %v7460_v56 = vld [vmem:[#allocation25 + $0x374] ss:$8 sps:$4 sm:$0xff]   ;;  %v8736_v57 = vld [vmem:[%s8950_s18] sm:$0xff]  ;;  %v4127_v58 = vsub.s32 3, %v8559_v0 }
 0xe64   : > { %5682 = vmatpush1.bf16.msra.mxu0 %v7371_v59  ;;  %5723 = vmatpush1.bf16.msra.mxu1 %v7374_v63  ;;  %v4116_v59 = vrot.slane %v8736_v57, %v8565_v2  ;;  %v4124_v63 = vrot.slane %v8736_v57, %v8589_v6 }
 0xe65   : > { %5683 = vmatprep.subr.bf16.mxu0 %v7379_v60  ;;  %5724 = vmatprep.subr.bf16.mxu1 %v7382_v61  ;;  %v4120_v60 = vrot.slane %v8736_v57, %v8562_v1  ;;  %v4128_v61 = vrot.slane %v8736_v57, %v4127_v58  ;;  %v7463_v58 = vld [vmem:[#allocation25 + $0x264] ss:$8 sps:$4 sm:$0xff]  }
 0xe68   : > { %5684 = vmatpush1.bf16.msra.mxu0 %v7377_v62  ;;  %5725 = vmatpush1.bf16.msra.mxu1 %v7380_v46 }
 0xe69   : > { %5685 = vmatprep.subr.bf16.mxu0 %v7385_v3  ;;  %5726 = vmatprep.subr.bf16.mxu1 %v7388_v5 }
 0xe6c   : > { %5686 = vmatpush1.bf16.msra.mxu0 %v7383_v7  ;;  %5727 = vmatpush1.bf16.msra.mxu1 %v7386_v21 }
 0xe6d   : > { %5687 = vmatprep.subr.bf16.mxu0 %v7391_v8  ;;  %5728 = vmatprep.subr.bf16.mxu1 %v7394_v9 }
 0xe70   : > { %5688 = vmatpush1.bf16.msra.mxu0 %v7389_v23  ;;  %5729 = vmatpush1.bf16.msra.mxu1 %v7392_v10 }
 0xe71   : > { %5689 = vmatprep.subr.bf16.mxu0 %v7397_v11  ;;  %5730 = vmatprep.subr.bf16.mxu1 %v7400_v12 }
 0xe74   : > { %5690 = vmatpush1.bf16.msra.mxu0 %v7395_v13  ;;  %5731 = vmatpush1.bf16.msra.mxu1 %v7398_v37 }
 0xe75   : > { %5691 = vmatprep.subr.bf16.mxu0 %v7403_v14  ;;  %5732 = vmatprep.subr.bf16.mxu1 %v7406_v15 }
 0xe78   : > { %5692 = vmatpush1.bf16.msra.mxu0 %v7401_v16  ;;  %5733 = vmatpush1.bf16.msra.mxu1 %v7404_v17 }
 0xe79   : > { %5693 = vmatprep.subr.bf16.mxu0 %v7409_v20  ;;  %5734 = vmatprep.subr.bf16.mxu1 %v7412_v22 }
 0xe7c   : > { %5694 = vmatpush2.bf16.msra.mxu0 %v7407_v24  ;;  %5735 = vmatpush2.bf16.msra.mxu1 %v7410_v25 }
 0xe7d   : > { %5695 = vmatprep.subr.bf16.mxu0 %v7415_v27  ;;  %5736 = vmatprep.subr.bf16.mxu1 %v7418_v28 }
 0xe80   : > { %5696 = vmatpush2.bf16.msra.mxu0 %v7413_v29  ;;  %5737 = vmatpush2.bf16.msra.mxu1 %v7416_v30 }
 0xe81   : > { %5697 = vmatprep.subr.bf16.mxu0 %v7421_v31  ;;  %5738 = vmatprep.subr.bf16.mxu1 %v7424_v32 }
 0xe84   : > { %5698 = vmatpush2.bf16.msra.mxu0 %v7419_v33  ;;  %5739 = vmatpush2.bf16.msra.mxu1 %v7422_v34 }
 0xe85   : > { %5699 = vmatprep.subr.bf16.mxu0 %v7427_v35  ;;  %5740 = vmatprep.subr.bf16.mxu1 %v7430_v4 }
 0xe88   : > { %5700 = vmatpush2.bf16.msra.mxu0 %v7425_v36  ;;  %5741 = vmatpush2.bf16.msra.mxu1 %v7428_v38 }
 0xe89   : > { %5701 = vmatprep.subr.bf16.mxu0 %v7433_v39  ;;  %5742 = vmatprep.subr.bf16.mxu1 %v7436_v40 }
 0xe8c   : > { %5702 = vmatpush2.bf16.msra.mxu0 %v7431_v41  ;;  %5743 = vmatpush2.bf16.msra.mxu1 %v7434_v42 }
 0xe8d   : > { %5703 = vmatprep.subr.bf16.mxu0 %v7439_v43  ;;  %5744 = vmatprep.subr.bf16.mxu1 %v7442_v26 }
 0xe90   : > { %5704 = vmatpush2.bf16.msra.mxu0 %v7437_v44  ;;  %5745 = vmatpush2.bf16.msra.mxu1 %v7440_v45 }
 0xe91   : > { %5705 = vmatprep.subr.bf16.mxu0 %v7445_v47  ;;  %5746 = vmatprep.subr.bf16.mxu1 %v7448_v19 }
 0xe94   : > { %5706 = vmatpush2.bf16.msra.mxu0 %v7443_v48  ;;  %5747 = vmatpush2.bf16.msra.mxu1 %v7446_v49 }
 0xe95   : > { %5707 = vmatprep.subr.bf16.mxu0 %v7451_v18  ;;  %5748 = vmatprep.subr.bf16.mxu1 %v7454_v50 }
 0xe98   : > { %5708 = vmatpush2.bf16.msra.mxu0 %v7449_v51  ;;  %5749 = vmatpush2.bf16.msra.mxu1 %v7452_v52  ;;  %v7455_v51 = vld [vmem:[#allocation25 + $0x270] ss:$8 sps:$4 sm:$0xff]  }
 0xe99   : > { %5759 = vmatprep.subr.bf16.mxu0 %v7457_v55  ;;  %5800 = vmatprep.subr.bf16.mxu1 %v7460_v56  ;;  %v7458_v55 = vld [vmem:[#allocation25 + $0x370] ss:$8 sps:$4 sm:$0xff]  }
 0xedb   : > { %v4827_v62 = vpop.f32.mrf.mxu0  ;;  %v4868_v46 = vpop.f32.mrf.mxu1 }
 0xedc   : > { %v4828_v3 = vadd.f32 %v4827_v62, %v4116_v59  ;;  %v4869_v5 = vadd.f32 %v4868_v46, %v4124_v63  ;;  %v7466_v63 = vld [vmem:[#allocation25 + $0x364] ss:$8 sps:$4 sm:$0xff]   ;;  %v7469_v62 = vld [vmem:[#allocation25 + $0x254] ss:$8 sps:$4 sm:$0xff]  }
 0xedd   : > { %v4829_v7 = vpop.f32.mrf.mxu0  ;;  %v4870_v21 = vpop.f32.mrf.mxu1  ;;  %v7472_v46 = vld [vmem:[#allocation25 + $0x354] ss:$8 sps:$4 sm:$0xff]  }
 0xede   : > { %v4965_v8 = vmul.f32 0.044715, %v4828_v3  ;;  %v4967_v9 = vmul.f32 0.044715, %v4869_v5  ;;  %v4830_v23 = vadd.f32 %v4829_v7, %v4120_v60  ;;  %v4871_v10 = vadd.f32 %v4870_v21, %v4128_v61  ;;  %v7461_v60 = vld [vmem:[#allocation25 + $0x260] ss:$8 sps:$4 sm:$0xff]  }
 0xedf   : > { %v4831_v11 = vpop.f32.mrf.mxu0  ;;  %v4872_v12 = vpop.f32.mrf.mxu1  ;;  %v4957_v40 = vmul.f32 0.5, %v4828_v3  ;;  %v4959_v44 = vmul.f32 0.5, %v4869_v5  ;;  %v7464_v61 = vld [vmem:[#allocation25 + $0x360] ss:$8 sps:$4 sm:$0xff]   ;;  %v7475_v7 = vld [vmem:[#allocation25 + $0x244] ss:$8 sps:$4 sm:$0xff]  }
 0xee0   : > { %v4973_v13 = vmul.f32 %v4965_v8, %v4828_v3  ;;  %v4975_v37 = vmul.f32 %v4967_v9, %v4869_v5  ;;  %v4966_v6 = vmul.f32 0.044715, %v4830_v23  ;;  %v4968_v14 = vmul.f32 0.044715, %v4871_v10  ;;  %v7478_v21 = vld [vmem:[#allocation25 + $0x344] ss:$8 sps:$4 sm:$0xff]  }
 0xee1   : > { %v4832_v15 = vpop.f32.mrf.mxu0  ;;  %v4873_v16 = vpop.f32.mrf.mxu1  ;;  %v4958_v43 = vmul.f32 0.5, %v4830_v23  ;;  %v4960_v45 = vmul.f32 0.5, %v4871_v10  ;;  %v7473_v8 = vld [vmem:[#allocation25 + $0x240] ss:$8 sps:$4 sm:$0xff]   ;;  %v7479_v11 = vld [vmem:[#allocation25 + $0x230] ss:$8 sps:$4 sm:$0xff]  }
 0xee2   : > { %v4981_v17 = vmul.f32 %v4973_v13, %v4828_v3  ;;  %v4983_v20 = vmul.f32 %v4975_v37, %v4869_v5  ;;  %v4974_v22 = vmul.f32 %v4966_v6, %v4830_v23  ;;  %v4976_v24 = vmul.f32 %v4968_v14, %v4871_v10  ;;  %v7476_v9 = vld [vmem:[#allocation25 + $0x340] ss:$8 sps:$4 sm:$0xff]   ;;  %v7482_v12 = vld [vmem:[#allocation25 + $0x330] ss:$8 sps:$4 sm:$0xff]   ;;  %v7487_v13 = vld [vmem:[#allocation25 + $0x224] ss:$8 sps:$4 sm:$0xff]  }
 0xee3   : > { %v7490_v37 = vld [vmem:[#allocation25 + $0x324] ss:$8 sps:$4 sm:$0xff]   ;;  %v7485_v6 = vld [vmem:[#allocation25 + $0x220] ss:$8 sps:$4 sm:$0xff]   ;;  %v7493_v15 = vld [vmem:[#allocation25 + $0x214] ss:$8 sps:$4 sm:$0xff]  }
 0xee4   : > { %v4989_v25 = vadd.f32 %v4981_v17, %v4828_v3  ;;  %v4991_v27 = vadd.f32 %v4983_v20, %v4869_v5  ;;  %v4982_v28 = vmul.f32 %v4974_v22, %v4830_v23  ;;  %v4984_v29 = vmul.f32 %v4976_v24, %v4871_v10  ;;  %v7467_v3 = vld [vmem:[#allocation25 + $0x250] ss:$8 sps:$4 sm:$0xff]   ;;  %v7488_v14 = vld [vmem:[#allocation25 + $0x320] ss:$8 sps:$4 sm:$0xff]   ;;  %v7496_v16 = vld [vmem:[#allocation25 + $0x314] ss:$8 sps:$4 sm:$0xff]  }
 0xee5   : > { %v7470_v5 = vld [vmem:[#allocation25 + $0x350] ss:$8 sps:$4 sm:$0xff]   ;;  %v4131_v20 = vsub.s32 4, %v8559_v0  ;;  %v4139_v22 = vsub.s32 6, %v8559_v0 }
 0xee6   : > { %v4997_v30 = vmul.f32 0.7978846, %v4989_v25  ;;  %v4999_v31 = vmul.f32 0.7978846, %v4991_v27  ;;  %v4990_v32 = vadd.f32 %v4982_v28, %v4830_v23  ;;  %v4992_v33 = vadd.f32 %v4984_v29, %v4871_v10  ;;  %v7481_v23 = vld [vmem:[#allocation25 + $0x234] ss:$8 sps:$4 sm:$0xff]  }
 0xee7   : > { %v7484_v10 = vld [vmem:[#allocation25 + $0x334] ss:$8 sps:$4 sm:$0xff]   ;;  %v7491_v17 = vld [vmem:[#allocation25 + $0x210] ss:$8 sps:$4 sm:$0xff]   ;;  %v7499_v25 = vld [vmem:[#allocation25 + $0x204] ss:$8 sps:$4 sm:$0xff]  }
 0xee8   : > { %v4998_v34 = vmul.f32 0.7978846, %v4990_v32  ;;  %v5000_v35 = vmul.f32 0.7978846, %v4992_v33  ;;  %7573 = vtanh.f32 %v4997_v30  ;;  %v7494_v24 = vld [vmem:[#allocation25 + $0x310] ss:$8 sps:$4 sm:$0xff]   ;;  %v4132_v30 = vrot.slane %v8736_v57, %v4131_v20 }
 0xee9   : > { %7575 = vtanh.f32 %v4999_v31  ;;  %v7502_v27 = vld [vmem:[#allocation25 + $0x304] ss:$8 sps:$4 sm:$0xff]   ;;  %v4135_v28 = vsub.s32 5, %v8559_v0  ;;  %v4143_v29 = vsub.s32 7, %v8559_v0  ;;  %v4140_v31 = vrot.slane %v8736_v57, %v4139_v22  ;;  %v7497_v32 = vld [vmem:[#allocation25 + $0x200] ss:$8 sps:$4 sm:$0xff]  }
 0xeea   : > { %7577 = vtanh.f32 %v4998_v34  ;;  %v7500_v33 = vld [vmem:[#allocation25 + $0x300] ss:$8 sps:$4 sm:$0xff]   ;;  %v7505_v34 = vld [vmem:[#allocation25 + $0x2f4] ss:$8 sps:$4 sm:$0xff]  }
 0xeeb   : > { %7579 = vtanh.f32 %v5000_v35  ;;  %v4136_v35 = vrot.slane %v8736_v57, %v4135_v28  ;;  %v7524_v20 = vld [vmem:[#allocation25 + $0x3c0] ss:$8 sps:$4 sm:$0xff]   ;;  %v7529_v22 = vld [vmem:[#allocation25 + $0x2b4] ss:$8 sps:$4 sm:$0xff]   ;;  %v7535_v28 = vld [vmem:[#allocation25 + $0x2a4] ss:$8 sps:$4 sm:$0xff]  }
 0xef5   : > { %v7574_v4 = vpop.eup %7573 }
 0xef6   : > { %v7576_v36 = vpop.eup %7575  ;;  %v5013_v38 = vadd.f32 1.0, %v7574_v4  ;;  %v4144_v4 = vrot.slane %v8736_v57, %v4143_v29  ;;  %v7538_v29 = vld [vmem:[#allocation25 + $0x3a4] ss:$8 sps:$4 sm:$0xff]  }
 0xef7   : > { %v7578_v39 = vpop.eup %7577  ;;  %v5015_v41 = vadd.f32 1.0, %v7576_v36  ;;  %v7508_v36 = vld [vmem:[#allocation25 + $0x3f4] ss:$8 sps:$4 sm:$0xff]  }
 0xef8   : > { %v7580_v42 = vpop.eup %7579  ;;  %v5014_v26 = vadd.f32 1.0, %v7578_v39  ;;  %v5021_v19 = vmul.f32 %v5013_v38, %v4957_v40 }
 0xef9   : > { %v5016_v47 = vadd.f32 1.0, %v7580_v42  ;;  %v5023_v49 = vmul.f32 %v5015_v41, %v4959_v44  ;;  %v7503_v41 = vld [vmem:[#allocation25 + $0x2f0] ss:$8 sps:$4 sm:$0xff]   ;;  %v7511_v44 = vld [vmem:[#allocation25 + $0x2e4] ss:$8 sps:$4 sm:$0xff]  }
 0xefa   : > { %v5022_v48 = vmul.f32 %v5014_v26, %v4958_v43  ;;  %v5029_v56 = vpack.c.bf16 %v5021_v19, %v5021_v19  ;;  %v7506_v26 = vld [vmem:[#allocation25 + $0x3f0] ss:$8 sps:$4 sm:$0xff]  }
 0xefb   : > { %v5024_v18 = vmul.f32 %v5016_v47, %v4960_v45  ;;  %v5031_v59 = vpack.c.bf16 %v5023_v49, %v5023_v49 }
 0xefc   : > { %v5030_v50 = vpack.c.bf16 %v5022_v48, %v5022_v48  ;;  %v7514_v48 = vld [vmem:[#allocation25 + $0x3e4] ss:$8 sps:$4 sm:$0xff]  }
 0xefd   : > { %v5032_v52 = vpack.c.bf16 %v5024_v18, %v5024_v18 }
 0xefe   : > { %5709 = vmatprep.mubr.bf16.mxu0 %v5030_v50 }
 0xeff   : > { %5750 = vmatprep.mubr.bf16.mxu1 %v5032_v52  ;;  %5710 = vmatmul.mubr.bf16.vlgmr.msra.gmra.mxu0 %v5029_v56  ;;  %v7509_v56 = vld [vmem:[#allocation25 + $0x2e0] ss:$8 sps:$4 sm:$0xff]  }
 0xf00   : > { %5751 = vmatmul.mubr.bf16.vlgmr.msra.gmra.mxu1 %v5031_v59  ;;  %5760 = vmatpush1.bf16.msra.mxu0 %v7455_v51 }
 0xf01   : > { %5801 = vmatpush1.bf16.msra.mxu1 %v7458_v55  ;;  %5761 = vmatprep.subr.bf16.mxu0 %v7463_v58 }
 0xf02   : > { %5802 = vmatprep.subr.bf16.mxu1 %v7466_v63  ;;  %v7512_v63 = vld [vmem:[#allocation25 + $0x3e0] ss:$8 sps:$4 sm:$0xff]  }
 0xf04   : > { %5762 = vmatpush1.bf16.msra.mxu0 %v7461_v60  ;;  %v7517_v60 = vld [vmem:[#allocation25 + $0x2d4] ss:$8 sps:$4 sm:$0xff]  }
 0xf05   : > { %5803 = vmatpush1.bf16.msra.mxu1 %v7464_v61  ;;  %5763 = vmatprep.subr.bf16.mxu0 %v7469_v62 }
 0xf06   : > { %5804 = vmatprep.subr.bf16.mxu1 %v7472_v46 }
 0xf08   : > { %5764 = vmatpush1.bf16.msra.mxu0 %v7467_v3 }
 0xf09   : > { %5805 = vmatpush1.bf16.msra.mxu1 %v7470_v5  ;;  %5765 = vmatprep.subr.bf16.mxu0 %v7475_v7  ;;  %v7520_v5 = vld [vmem:[#allocation25 + $0x3d4] ss:$8 sps:$4 sm:$0xff]  }
 0xf0a   : > { %5806 = vmatprep.subr.bf16.mxu1 %v7478_v21 }
 0xf0c   : > { %5766 = vmatpush1.bf16.msra.mxu0 %v7473_v8  ;;  %v7515_v8 = vld [vmem:[#allocation25 + $0x2d0] ss:$8 sps:$4 sm:$0xff]  }
 0xf0d   : > { %5807 = vmatpush1.bf16.msra.mxu1 %v7476_v9  ;;  %5767 = vmatprep.subr.bf16.mxu0 %v7481_v23 }
 0xf0e   : > { %5808 = vmatprep.subr.bf16.mxu1 %v7484_v10  ;;  %v7518_v10 = vld [vmem:[#allocation25 + $0x3d0] ss:$8 sps:$4 sm:$0xff]  }
 0xf10   : > { %5768 = vmatpush1.bf16.msra.mxu0 %v7479_v11  ;;  %v7523_v11 = vld [vmem:[#allocation25 + $0x2c4] ss:$8 sps:$4 sm:$0xff]  }
 0xf11   : > { %5809 = vmatpush1.bf16.msra.mxu1 %v7482_v12  ;;  %5769 = vmatprep.subr.bf16.mxu0 %v7487_v13 }
 0xf12   : > { %5810 = vmatprep.subr.bf16.mxu1 %v7490_v37  ;;  %v7526_v37 = vld [vmem:[#allocation25 + $0x3c4] ss:$8 sps:$4 sm:$0xff]  }
 0xf14   : > { %5770 = vmatpush1.bf16.msra.mxu0 %v7485_v6 }
 0xf15   : > { %5811 = vmatpush1.bf16.msra.mxu1 %v7488_v14  ;;  %5771 = vmatprep.subr.bf16.mxu0 %v7493_v15  ;;  %v7521_v15 = vld [vmem:[#allocation25 + $0x2c0] ss:$8 sps:$4 sm:$0xff]  }
 0xf16   : > { %5812 = vmatprep.subr.bf16.mxu1 %v7496_v16 }
 0xf18   : > { %5772 = vmatpush1.bf16.msra.mxu0 %v7491_v17 }
 0xf19   : > { %5813 = vmatpush1.bf16.msra.mxu1 %v7494_v24  ;;  %5773 = vmatprep.subr.bf16.mxu0 %v7499_v25  ;;  %v7532_v24 = vld [vmem:[#allocation25 + $0x3b4] ss:$8 sps:$4 sm:$0xff]   ;;  %v7527_v25 = vld [vmem:[#allocation25 + $0x2b0] ss:$8 sps:$4 sm:$0xff]  }
 0xf1a   : > { %5814 = vmatprep.subr.bf16.mxu1 %v7502_v27  ;;  %v7530_v27 = vld [vmem:[#allocation25 + $0x3b0] ss:$8 sps:$4 sm:$0xff]  }
 0xf1b   : > { %v4909_v38 = vpop.f32.mrf.mxu0  ;;  %v4950_v39 = vpop.f32.mrf.mxu1 }
 0xf1c   : > { %v8754_v40 = vadd.f32 %v4909_v38, %v4132_v30  ;;  %v8756_v0 = vadd.f32 %v4950_v39, %v4140_v31  ;;  %5774 = vmatpush1.bf16.msra.mxu0 %v7497_v32  ;;  %v7533_v30 = vld [vmem:[#allocation25 + $0x2a0] ss:$8 sps:$4 sm:$0xff]   ;;  %v7541_v32 = vld [vmem:[#allocation25 + $0x294] ss:$8 sps:$4 sm:$0xff]   ;;  %v7550_v39 = vld [vmem:[#allocation25 + $0x384] ss:$8 sps:$4 sm:$0xff]  }
 0xf1d   : > { %5815 = vmatpush1.bf16.msra.mxu1 %v7500_v33  ;;  %v4911_v42 = vpop.f32.mrf.mxu0  ;;  %v4952_v43 = vpop.f32.mrf.mxu1  ;;  %5775 = vmatprep.subr.bf16.mxu0 %v7505_v34  ;;  %v7536_v31 = vld [vmem:[#allocation25 + $0x3a0] ss:$8 sps:$4 sm:$0xff]   ;;  %v7544_v33 = vld [vmem:[#allocation25 + $0x394] ss:$8 sps:$4 sm:$0xff]   ;;  %v7539_v34 = vld [vmem:[#allocation25 + $0x290] ss:$8 sps:$4 sm:$0xff]  }
 0xf1e   : > { %v4969_v45 = vmul.f32 0.044715, %v8754_v40  ;;  %v4971_v47 = vmul.f32 0.044715, %v8756_v0  ;;  %v8760_v57 = vadd.f32 %v4911_v42, %v4136_v35  ;;  %v8762_v19 = vadd.f32 %v4952_v43, %v4144_v4  ;;  %5816 = vmatprep.subr.bf16.mxu1 %v7508_v36  ;;  %v7542_v4 = vld [vmem:[#allocation25 + $0x390] ss:$8 sps:$4 sm:$0xff]  }
 0xf1f   : > { %v4913_v49 = vpop.f32.mrf.mxu0  ;;  %v4954_v18 = vpop.f32.mrf.mxu1  ;;  %v7547_v36 = vld [vmem:[#allocation25 + $0x284] ss:$8 sps:$4 sm:$0xff]   ;;  %v4961_v43 = vmul.f32 0.5, %v8754_v40 }
 0xf20   : > { %v4977_v50 = vmul.f32 %v4969_v45, %v8754_v40  ;;  %v4979_v51 = vmul.f32 %v4971_v47, %v8756_v0  ;;  %v4970_v52 = vmul.f32 0.044715, %v8760_v57  ;;  %v4972_v55 = vmul.f32 0.044715, %v8762_v19  ;;  %5776 = vmatpush2.bf16.msra.mxu0 %v7503_v41  ;;  %v7545_v45 = vld [vmem:[#allocation25 + $0x280] ss:$8 sps:$4 sm:$0xff]  }
 0xf21   : > { %5817 = vmatpush2.bf16.msra.mxu1 %v7506_v26  ;;  %v4914_v58 = vpop.f32.mrf.mxu0  ;;  %v4955_v59 = vpop.f32.mrf.mxu1  ;;  %5777 = vmatprep.subr.bf16.mxu0 %v7511_v44  ;;  %v4962_v47 = vmul.f32 0.5, %v8760_v57  ;;  %v4963_v49 = vmul.f32 0.5, %v8756_v0  ;;  %v7548_v18 = vld [vmem:[#allocation25 + $0x380] ss:$8 sps:$4 sm:$0xff]  }
 0xf22   : > { %v4985_v61 = vmul.f32 %v4977_v50, %v8754_v40  ;;  %v4987_v62 = vmul.f32 %v4979_v51, %v8756_v0  ;;  %v4978_v46 = vmul.f32 %v4970_v52, %v8760_v57  ;;  %v4980_v3 = vmul.f32 %v4972_v55, %v8762_v19  ;;  %5818 = vmatprep.subr.bf16.mxu1 %v7514_v48 }
 0xf23   : > { %v4964_v50 = vmul.f32 0.5, %v8762_v19 }
 0xf24   : > { %v4993_v7 = vadd.f32 %v4985_v61, %v8754_v40  ;;  %v4995_v21 = vadd.f32 %v4987_v62, %v8756_v0  ;;  %5778 = vmatpush2.bf16.msra.mxu0 %v7509_v56  ;;  %v4986_v9 = vmul.f32 %v4978_v46, %v8760_v57  ;;  %v4988_v23 = vmul.f32 %v4980_v3, %v8762_v19 }
 0xf25   : > { %5819 = vmatpush2.bf16.msra.mxu1 %v7512_v63  ;;  %5779 = vmatprep.subr.bf16.mxu0 %v7517_v60 }
 0xf26   : > { %v5001_v12 = vmul.f32 0.7978846, %v4993_v7  ;;  %v5003_v13 = vmul.f32 0.7978846, %v4995_v21  ;;  %5820 = vmatprep.subr.bf16.mxu1 %v7520_v5  ;;  %v4994_v6 = vadd.f32 %v4986_v9, %v8760_v57  ;;  %v4996_v14 = vadd.f32 %v4988_v23, %v8762_v19 }
 0xf28   : > { %5780 = vmatpush2.bf16.msra.mxu0 %v7515_v8  ;;  %v5002_v16 = vmul.f32 0.7978846, %v4994_v6  ;;  %v5004_v17 = vmul.f32 0.7978846, %v4996_v14  ;;  %7581 = vtanh.f32 %v5001_v12  ;;  %v5843_v8 = vld [vmem:[%s8951_s24] sm:$0x3] }
 0xf29   : > { %5821 = vmatpush2.bf16.msra.mxu1 %v7518_v10  ;;  %5781 = vmatprep.subr.bf16.mxu0 %v7523_v11  ;;  %7583 = vtanh.f32 %v5003_v13  ;;  %v5848_v13 = vrot.slane %v5843_v8, %v8565_v2 }
 0xf2a   : > { %5822 = vmatprep.subr.bf16.mxu1 %v7526_v37  ;;  %7585 = vtanh.f32 %v5002_v16 }
 0xf2b   : > { %7587 = vtanh.f32 %v5004_v17  ;;  %v5852_v17 = vrot.slane %v5843_v8, %v8562_v1 }
 0xf2c   : > { %5782 = vmatpush2.bf16.msra.mxu0 %v7521_v15 }
 0xf2d   : > { %5823 = vmatpush2.bf16.msra.mxu1 %v7524_v20  ;;  %5783 = vmatprep.subr.bf16.mxu0 %v7529_v22 }
 0xf2e   : > { %5824 = vmatprep.subr.bf16.mxu1 %v7532_v24 }
 0xf30   : > { %5784 = vmatpush2.bf16.msra.mxu0 %v7527_v25 }
 0xf31   : > { %5825 = vmatpush2.bf16.msra.mxu1 %v7530_v27  ;;  %5785 = vmatprep.subr.bf16.mxu0 %v7535_v28 }
 0xf32   : > { %5826 = vmatprep.subr.bf16.mxu1 %v7538_v29 }
 0xf34   : > { %5786 = vmatpush2.bf16.msra.mxu0 %v7533_v30 }
 0xf35   : > { %v7582_v35 = vpop.eup %7581  ;;  %5827 = vmatpush2.bf16.msra.mxu1 %v7536_v31  ;;  %5787 = vmatprep.subr.bf16.mxu0 %v7541_v32 }
 0xf36   : > { %v7584_v38 = vpop.eup %7583  ;;  %5828 = vmatprep.subr.bf16.mxu1 %v7544_v33  ;;  %v5017_v41 = vadd.f32 1.0, %v7582_v35 }
 0xf37   : > { %v7586_v42 = vpop.eup %7585  ;;  %v5019_v26 = vadd.f32 1.0, %v7584_v38 }
 0xf38   : > { %v7588_v44 = vpop.eup %7587  ;;  %5788 = vmatpush2.bf16.msra.mxu0 %v7539_v34  ;;  %v5018_v48 = vadd.f32 1.0, %v7586_v42  ;;  %v5025_v52 = vmul.f32 %v5017_v41, %v4961_v43 }
 0xf39   : > { %5829 = vmatpush2.bf16.msra.mxu1 %v7542_v4  ;;  %5789 = vmatprep.subr.bf16.mxu0 %v7547_v36  ;;  %v5020_v51 = vadd.f32 1.0, %v7588_v44  ;;  %v5027_v56 = vmul.f32 %v5019_v26, %v4963_v49 }
 0xf3a   : > { %5830 = vmatprep.subr.bf16.mxu1 %v7550_v39  ;;  %v5026_v55 = vmul.f32 %v5018_v48, %v4962_v47  ;;  %v5033_v63 = vpack.c.bf16 %v5025_v52, %v5025_v52 }
 0xf3b   : > { %v5028_v40 = vmul.f32 %v5020_v51, %v4964_v50  ;;  %v5035_v57 = vpack.c.bf16 %v5027_v56, %v5027_v56 }
 0xf3c   : > { %5790 = vmatpush2.bf16.msra.mxu0 %v7545_v45  ;;  %v5034_v58 = vpack.c.bf16 %v5026_v55, %v5026_v55 }
 0xf3d   : > { %5831 = vmatpush2.bf16.msra.mxu1 %v7548_v18  ;;  %v5036_v59 = vpack.c.bf16 %v5028_v40, %v5028_v40 }
 0xf3e   : > { %5791 = vmatprep.mubr.bf16.mxu0 %v5034_v58 }
 0xf3f   : > { %5832 = vmatprep.mubr.bf16.mxu1 %v5036_v59  ;;  %5792 = vmatmul.mubr.bf16.vlgmr.msra.gmra.mxu0 %v5033_v63 }
 0xf40   : > { %5833 = vmatmul.mubr.bf16.vlgmr.msra.gmra.mxu1 %v5035_v57 }
 0xfbf   : > { %v5711_v0 = vpop.f32.mrf.mxu0 }
 0xfc0   : > { %v5752_v60 = vpop.f32.mrf.mxu1 }
 0xfc1   : > { %v5713_v61 = vpop.f32.mrf.mxu0  ;;  %v5753_v7 = vadd.f32 %v5752_v60, %v5711_v0 }
 0xfc2   : > { %v5754_v19 = vpop.f32.mrf.mxu1 }
 0xfc3   : > { %v5715_v62 = vpop.f32.mrf.mxu0  ;;  %v5755_v9 = vadd.f32 %v5754_v19, %v5713_v61 }
 0xfc4   : > { %v5756_v46 = vpop.f32.mrf.mxu1 }
 0xfc5   : > { %v5716_v3 = vpop.f32.mrf.mxu0 }
 0xfc6   : > { %v5757_v5 = vpop.f32.mrf.mxu1 }
 0xfff   : > { %v5793_v21 = vpop.f32.mrf.mxu0 }
0x1000   : > { %v5794_v23 = vadd.f32 %v5793_v21, %v5753_v7  ;;  %v5834_v10 = vpop.f32.mrf.mxu1 }
0x1001   : > { %v5795_v11 = vpop.f32.mrf.mxu0 }
0x1002   : > { %v5835_v12 = vadd.f32 %v5834_v10, %v5794_v23  ;;  %v5796_v37 = vadd.f32 %v5795_v11, %v5755_v9  ;;  %v5836_v6 = vpop.f32.mrf.mxu1 }
0x1003   : > { %v5797_v14 = vpop.f32.mrf.mxu0 }
0x1004   : > { %v5841_v15 = vadd.f32 %v5835_v12, %v8698_v53  ;;  %v5837_v16 = vadd.f32 %v5836_v6, %v5796_v37  ;;  %v5838_v20 = vpop.f32.mrf.mxu1 }
0x1005   : > { %v5798_v22 = vpop.f32.mrf.mxu0 }
0x1006   : > { %v5855_v24 = vadd.f32 %v5848_v13, %v5841_v15  ;;  %v5842_v25 = vadd.f32 %v5837_v16, %v8701_v54  ;;  %v5839_v2 = vpop.f32.mrf.mxu1 }
0x1008   : > { %v5856_v27 = vadd.f32 %v5852_v17, %v5842_v25  ;;  %5857 = vst [vmem:[%s1013_s29] sm:$0xff] %v5855_v24 }
0x100a   : > { %5858 = vst [vmem:[%s1013_s29 + $0x8] sm:$0xff] %v5856_v27 }
0x100b   : > { %8000 = shalt.err (!%p7997_p0)
}
0x100c   : > { %s8001_s25 = scalar_lea.hbm %s5872_s27, 256  ;;  %s8005_s20 = scalar_lea.hbm %s8953_s3, 512 }
0x100d   : > { %p8002_p2 = scmp.ne.s32.totalorder %s5872_s27, %s8001_s25  ;;  %p8006_p3 = scmp.lt.s32.totalorder %s5872_s27, %s8953_s3 }
0x100e   : > { %p8007_p7 = scmp.lt.s32.totalorder %s8005_s20, %s8001_s25 }
0x100f   : > { %p8003_p9 = pnand %p8002_p2, %p8954_p12 }
0x1010   : > { %p8008_p11 = por %p8007_p7, %p8006_p3 }
0x1011   : > { %p8004_p10 = pneg %p8003_p9 }
0x1013   : > { %p8009_p13 = pnand %p8008_p11, %p8004_p10 }
0x1015   : > { %8012 = shalt.err (!%p8009_p13)
}
0x1016   : > { %6871 = dma.vmem_to_hbm [thread:$0]  (%p8954_p12), %s5875_s30, 256, %s5872_s27, %s5860_s4  }
0x1017 PF: > { %s8955_s13 = sld [smem:[#allocation36_spill]]  ;;  %p8958_p5 = scmp.ge.s32.totalorder %s8079_s2, 2 }
0x1018   : > { %s8956_s24 = sld [smem:[#allocation41_spill]] }
0x101d   : > { %s5886_s10 = sand.u32 1, %s8955_s13  }
0x101e   : > { %p8957_p6 = scmp.ne.s32.totalorder %s8956_s24, 0  ;;  %s5887_s29 = scalar_lea.sflag [#allocation4], %s5886_s10 }
0x1020   : > { %p6921_p8 = pnand %p8958_p5, %p8957_p6 }
0x1022   : > { %p6922_p1 = pneg %p6921_p8 }
0x1024   : > { %8062 = dma.done.wait (%p6922_p1), %s5887_s29, 256  }
0x1025   : > { %8064 = vsyncadd (%p6922_p1), %s5887_s29, 4294967040  ;;  %s8959_s2 = sld [smem:[#allocation38_spill]]  ;;  %s8962_s29 = smov %s8071_s23 }
0x1026   : > { %s8960_s1 = sld [smem:[#allocation37_spill]] }
0x1027   : > { %s8961_s24 = sld [smem:[#allocation39_spill]] }
0x102b   : > { %p47_p4 = scmp.ge.s32.totalorder %s8959_s2, 4  }
0x102c   : > { %s8963_s23 = smov %s8960_s1 }
0x102d   :  { %49 = sbr.rel (!%p47_p4) target bundleno = 32 (0x20), region = 237 }
0x1032   :  { %5892 = vsyncpa [#allocation3], 1 }
0x1033   :  { %5894 = vsyncpa [#allocation3 + $0x1], 1 }
0x1034   :  { %5895 = vsyncpa [#allocation6], 1 }
0x1035   :  { %5897 = vsyncpa [#allocation6 + $0x1], 1 }
0x1036   :  { %5898 = vsyncpa [#allocation9], 1 }
0x1037   :  { %5899 = vsyncpa [#allocation12], 1 }
0x1038   :  { %5900 = vsyncpa [#allocation15], 1 }
0x1039   :  { %5901 = vsyncpa [#allocation18], 1 }
0x103a   :  { %5902 = vsyncpa [#allocation21], 1 }
0x103b   :  { %5903 = vsyncpa [#allocation24], 1 }
0x103c   :  { %5904 = vsyncpa [#allocation4], 1 }
0x103d   :  { %5906 = vsyncpa [#allocation4 + $0x1], 1 }

</bundles_post_ra>
